<compile_context>
chip_gen: v6e
topology: v6e:2x2x1
jax: 0.10.0
libtpu: 0.0.40
codegen_flags: <defaults>
</compile_context>

<pallas_src>
import jax
import jax.numpy as jnp
from jax.experimental import pallas as pl
from jax.experimental.pallas import tpu as pltpu


# ---------------------------------------------------------------------------
# Fused kernel: one (batch, row-tile) of the whole BottomBlock per grid step.
# ---------------------------------------------------------------------------
def _bottom_block_kernel(x_ref, w1_ref, b1_ref, w2_ref, b2_ref,
                         wt0_ref, wt1_ref, bt_ref, o_ref,
                         xpad_ref, h1pad_ref):
    # x_ref   : (1, H, W, Cin)        bf16, full image (resident across row tiles)
    # w1_ref  : (3, 3, Cin, Chid)     bf16 (BN1 scale folded)
    # b1_ref  : (1, Chid)             f32  (BN1 bias)
    # w2_ref  : (3, 3, Chid, Chid)    bf16 (BN2 scale folded)
    # b2_ref  : (1, Chid)             f32  (BN2 bias)
    # wt0/wt1 : (Chid, 2*Cout)        bf16 convT weights for sub-pixel row a=0/1
    # bt_ref  : (1, 2*Cout)           f32  convT bias tiled over kw
    # o_ref   : (1, TH, 2, W, 2*Cout) f32  output row tile (a plane explicit)
    # xpad_ref: (TH+4, W+2, Cin)      bf16 scratch (padded input tile)
    # h1pad_ref:(TH+2, W+2, Chid)     bf16 scratch (padded h1 tile)
    H = x_ref.shape[1]
    W = x_ref.shape[2]
    cin = x_ref.shape[3]
    TH = o_ref.shape[1]
    c2 = o_ref.shape[4]
    chid = w1_ref.shape[3]
    f32 = jnp.float32
    cdt = xpad_ref.dtype

    rt = pl.program_id(1)
    b = pl.multiple_of(rt * TH, TH)          # first output (h2) row of this tile

    # ---- stage 0: padded input row tile (2-row halo, 1-col zero pad) -------
    # xpad row j <-> x row (b - 2 + j); cols 1..W hold x, cols 0 / W+1 = pad.
    xpad_ref[...] = jnp.zeros_like(xpad_ref)
    xpad_ref[2:TH + 2, 1:W + 1, :] = x_ref[0, pl.ds(b, TH), :, :]
    for j in range(2):                       # top halo: x rows b-2, b-1
        src = b - 2 + j

        @pl.when(src >= 0)
        def _(j=j, src=src):
            xpad_ref[j:j + 1, 1:W + 1, :] = x_ref[0, pl.ds(src, 1), :, :]

    for j in range(2):                       # bottom halo: x rows b+TH, b+TH+1
        src = b + TH + j

        @pl.when(src < H)
        def _(j=j, src=src):
            xpad_ref[TH + 2 + j:TH + 3 + j, 1:W + 1, :] = \
                x_ref[0, pl.ds(src, 1), :, :]

    # ---- stage 1: conv3x3 + BN + ReLU, h1 rows (b-1 .. b+TH) ---------------
    rows1 = TH + 2
    acc1 = jnp.zeros((rows1 * W, chid), f32)
    for kx in range(3):
        xs = xpad_ref[:, kx:kx + W, :]       # one sublane shift per kx tap
        for ky in range(3):
            patch = xs[ky:ky + rows1].reshape(rows1 * W, cin)
            acc1 = acc1 + jnp.dot(patch, w1_ref[ky, kx],
                                  preferred_element_type=f32)
    acc1 = jnp.maximum(acc1 + b1_ref[...], 0.0)

    # h1pad row j <-> h1 row (b - 1 + j); cols 0 / W+1 are conv2 zero padding.
    h1pad_ref[...] = jnp.zeros_like(h1pad_ref)
    h1pad_ref[:, 1:W + 1, :] = acc1.reshape(rows1, W, chid).astype(cdt)

    # h1 rows outside the image act as conv2 *zero padding* -> force to 0.
    @pl.when(b == 0)
    def _():
        h1pad_ref[0:1, :, :] = jnp.zeros((1, W + 2, chid), cdt)

    @pl.when(b + TH >= H)
    def _():
        h1pad_ref[TH + 1:TH + 2, :, :] = jnp.zeros((1, W + 2, chid), cdt)

    # ---- stage 2: conv3x3 + BN + ReLU, h2 rows (b .. b+TH-1) ---------------
    acc2 = jnp.zeros((TH * W, chid), f32)
    for kx in range(3):
        hs = h1pad_ref[:, kx:kx + W, :]
        for ky in range(3):
            patch = hs[ky:ky + TH].reshape(TH * W, chid)
            acc2 = acc2 + jnp.dot(patch, w2_ref[ky, kx],
                                  preferred_element_type=f32)
    h2v = jnp.maximum(acc2 + b2_ref[...], 0.0).astype(cdt)

    # ---- stage 3: ConvTranspose2d k=2 s=2 -----------------------------------
    # Lane dim packs (kw, cout); a=0 / a=1 sub-pixel row planes are written to
    # separate output sub-planes so the host-side un-interleave is a reshape.
    y0 = jnp.dot(h2v, wt0_ref[...], preferred_element_type=f32) + bt_ref[...]
    y1 = jnp.dot(h2v, wt1_ref[...], preferred_element_type=f32) + bt_ref[...]
    o_ref[:, :, 0:1, :, :] = y0.reshape(1, TH, 1, W, c2).astype(o_ref.dtype)
    o_ref[:, :, 1:2, :, :] = y1.reshape(1, TH, 1, W, c2).astype(o_ref.dtype)


# ---------------------------------------------------------------------------
# Host-side parameter prep (pure setup / glue).
# ---------------------------------------------------------------------------
def _fold_bn(w_oihw, gamma, beta, mean, var, eps=1e-5):
    s = gamma / jnp.sqrt(var + eps)
    w_hwio = (w_oihw * s[:, None, None, None]).transpose(2, 3, 1, 0)
    return w_hwio, beta - mean * s


def _pick_row_tile(H):
    # Prefer 8..32-row tiles that divide H and give >= 2 tiles (pipelining,
    # bounded VMEM on v7x); otherwise fall back to the largest divisor.
    for th in (32, 16, 8):
        if H % th == 0 and H // th >= 2:
            return th
    for th in (8, 4, 2, 1):
        if H % th == 0:
            return th
    return H


def bottom_block_forward_nhwc(x_nhwc, params, *, row_tile=None,
                              compute_dtype=jnp.bfloat16):
    """Fused BottomBlock forward, NHWC in -> NHWC out (f32)."""
    N, H, W, Cin = x_nhwc.shape
    Chid = params['w1'].shape[0]
    Cout = params['wt'].shape[1]
    c2 = 2 * Cout

    w1, b1 = _fold_bn(params['w1'], params['bn1_gamma'], params['bn1_beta'],
                      params['bn1_mean'], params['bn1_var'])
    w2, b2 = _fold_bn(params['w2'], params['bn2_gamma'], params['bn2_beta'],
                      params['bn2_mean'], params['bn2_var'])
    # ConvTranspose2d weight (in, out, kh, kw): split the kh(=a) sub-pixel
    # planes into two (Chid, 2*Cout) matrices with (kw, out) packed in lanes.
    wt = params['wt']
    wt0 = wt[:, :, 0, :].transpose(0, 2, 1).reshape(Chid, c2)
    wt1 = wt[:, :, 1, :].transpose(0, 2, 1).reshape(Chid, c2)
    bt2 = jnp.tile(params['bt'], 2).reshape(1, c2).astype(jnp.float32)

    TH = row_tile if row_tile is not None else _pick_row_tile(H)
    assert H % TH == 0, (H, TH)
    R = H // TH

    out5 = pl.pallas_call(
        _bottom_block_kernel,
        out_shape=jax.ShapeDtypeStruct((N, H, 2, W, c2), jnp.float32),
        grid_spec=pltpu.PrefetchScalarGridSpec(
            num_scalar_prefetch=0,
            grid=(N, R),
            in_specs=[
                # full image per batch element; block index ignores the row
                # tile -> fetched once per image, resident across row tiles.
                pl.BlockSpec((1, H, W, Cin), lambda n, r: (n, 0, 0, 0)),
                pl.BlockSpec((3, 3, Cin, Chid), lambda n, r: (0, 0, 0, 0)),
                pl.BlockSpec((1, Chid), lambda n, r: (0, 0)),
                pl.BlockSpec((3, 3, Chid, Chid), lambda n, r: (0, 0, 0, 0)),
                pl.BlockSpec((1, Chid), lambda n, r: (0, 0)),
                pl.BlockSpec((Chid, c2), lambda n, r: (0, 0)),
                pl.BlockSpec((Chid, c2), lambda n, r: (0, 0)),
                pl.BlockSpec((1, c2), lambda n, r: (0, 0)),
            ],
            out_specs=pl.BlockSpec((1, TH, 2, W, c2),
                                   lambda n, r: (n, r, 0, 0, 0)),
            scratch_shapes=[
                pltpu.VMEM((TH + 4, W + 2, Cin), compute_dtype),
                pltpu.VMEM((TH + 2, W + 2, Chid), compute_dtype),
            ],
        ),
        compiler_params=pltpu.CompilerParams(
            dimension_semantics=("parallel", "arbitrary"),
            vmem_limit_bytes=32 * 1024 * 1024,
        ),
    )(x_nhwc.astype(compute_dtype),
      w1.astype(compute_dtype), b1.reshape(1, Chid).astype(jnp.float32),
      w2.astype(compute_dtype), b2.reshape(1, Chid).astype(jnp.float32),
      wt0.astype(compute_dtype), wt1.astype(compute_dtype), bt2)

    # (N, H, 2, W, 2*Cout) -> (N, 2H, 2W, Cout): pure row-major reshape,
    # no transpose / data movement of the output.
    return out5.reshape(N, 2 * H, 2 * W, Cout)


def bottom_block_forward(x_nchw, params):
    """Public wrapper matching the PyTorch module: NCHW f32 in/out."""
    x = jnp.transpose(x_nchw, (0, 2, 3, 1))          # NCHW -> NHWC
    y = bottom_block_forward_nhwc(x, params)
    return jnp.transpose(y, (0, 3, 1, 2))            # NHWC -> NCHW


# ---------------------------------------------------------------------------
# Deterministic parameter construction (matches PyTorch module shapes).
# ---------------------------------------------------------------------------
def init_params(key, c_in):
    c_hid = 2 * c_in
    ks = jax.random.split(key, 12)
    return {
        'w1': 0.1 * jax.random.normal(ks[0], (c_hid, c_in, 3, 3), jnp.float32),
        'bn1_gamma': 1.0 + 0.1 * jax.random.normal(ks[1], (c_hid,), jnp.float32),
        'bn1_beta': 0.1 * jax.random.normal(ks[2], (c_hid,), jnp.float32),
        'bn1_mean': 0.1 * jax.random.normal(ks[3], (c_hid,), jnp.float32),
        'bn1_var': jax.random.uniform(ks[4], (c_hid,), jnp.float32, 0.5, 1.5),
        'w2': 0.1 * jax.random.normal(ks[5], (c_hid, c_hid, 3, 3), jnp.float32),
        'bn2_gamma': 1.0 + 0.1 * jax.random.normal(ks[6], (c_hid,), jnp.float32),
        'bn2_beta': 0.1 * jax.random.normal(ks[7], (c_hid,), jnp.float32),
        'bn2_mean': 0.1 * jax.random.normal(ks[8], (c_hid,), jnp.float32),
        'bn2_var': jax.random.uniform(ks[9], (c_hid,), jnp.float32, 0.5, 1.5),
        # ConvTranspose2d weight: (in_channels, out_channels, kH, kW)
        'wt': 0.1 * jax.random.normal(ks[10], (c_hid, c_in, 2, 2), jnp.float32),
        'bt': 0.1 * jax.random.normal(ks[11], (c_in,), jnp.float32),
    }


# ---------------------------------------------------------------------------
# Pure-JAX f32 reference (correctness check only).
# ---------------------------------------------------------------------------
def reference_forward(x_nchw, p, eps=1e-5):
    def conv_bn_relu(x, w, gamma, beta, mean, var):
        y = jax.lax.conv_general_dilated(
            x, w, (1, 1), ((1, 1), (1, 1)),
            dimension_numbers=('NCHW', 'OIHW', 'NCHW'))
        s = gamma / jnp.sqrt(var + eps)
        y = y * s[None, :, None, None] + (beta - mean * s)[None, :, None, None]
        return jnp.maximum(y, 0.0)

    h1 = conv_bn_relu(x_nchw, p['w1'], p['bn1_gamma'], p['bn1_beta'],
                      p['bn1_mean'], p['bn1_var'])
    h2 = conv_bn_relu(h1, p['w2'], p['bn2_gamma'], p['bn2_beta'],
                      p['bn2_mean'], p['bn2_var'])
    N, Chid, H, W = h2.shape
    Cout = p['wt'].shape[1]
    y = jnp.einsum('nchw,cdab->ndhawb', h2, p['wt'])
    y = y.reshape(N, Cout, 2 * H, 2 * W) + p['bt'][None, :, None, None]
    return y


if __name__ == "__main__":
    key = jax.random.PRNGKey(0)
    k_in, k_par = jax.random.split(key)
    N, C, H, W = 2, 4, 16, 16
    x = jax.random.normal(k_in, (N, C, H, W), jnp.float32)
    params = init_params(k_par, C)

    out = jax.block_until_ready(jax.jit(bottom_block_forward)(x, params))
    assert out.shape == (N, C, 2 * H, 2 * W), out.shape

    ref = reference_forward(x, params)
    err = float(jnp.max(jnp.abs(out - ref)))
    # bf16 matmul inputs with f32 accumulation -> loosened tolerance vs f32 ref.
    assert jnp.allclose(out, ref, atol=5e-2, rtol=5e-2), f"max abs err {err}"
    print("KERNEL_OK")
</pallas_src>

<mosaic_0001>
module attributes {stable_mosaic.version = 11 : i64} {
  func.func @_bottom_block_kernel(%arg0: i32, %arg1: i32, %arg2: memref<1x16x16x4xbf16, #tpu.memory_space<vmem>>, %arg3: memref<3x3x4x8xbf16, #tpu.memory_space<vmem>>, %arg4: memref<1x8xf32, #tpu.memory_space<vmem>>, %arg5: memref<3x3x8x8xbf16, #tpu.memory_space<vmem>>, %arg6: memref<1x8xf32, #tpu.memory_space<vmem>>, %arg7: memref<8x8xbf16, #tpu.memory_space<vmem>>, %arg8: memref<8x8xbf16, #tpu.memory_space<vmem>>, %arg9: memref<1x8xf32, #tpu.memory_space<vmem>>, %arg10: memref<1x8x2x16x8xf32, #tpu.memory_space<vmem>>, %arg11: memref<12x18x4xbf16, #tpu.memory_space<vmem>>, %arg12: memref<10x18x8xbf16, #tpu.memory_space<vmem>>) attributes {dimension_semantics = [#tpu.dimension_semantics<parallel>, #tpu.dimension_semantics<arbitrary>], iteration_bounds = array<i64: 2, 2>, scalar_prefetch = 0 : i64, scratch_operands = 2 : i64, tpu.core_type = #tpu.core_type<tc>, window_params = [{transform_indices = @transform_0, window_bounds = array<i64: 1, 16, 16, 4>}, {pipeline_mode = #tpu.pipeline_mode<synchronous>, transform_indices = @transform_1, window_bounds = array<i64: 3, 3, 4, 8>}, {pipeline_mode = #tpu.pipeline_mode<synchronous>, transform_indices = @transform_2, window_bounds = array<i64: 1, 8>}, {pipeline_mode = #tpu.pipeline_mode<synchronous>, transform_indices = @transform_3, window_bounds = array<i64: 3, 3, 8, 8>}, {pipeline_mode = #tpu.pipeline_mode<synchronous>, transform_indices = @transform_4, window_bounds = array<i64: 1, 8>}, {pipeline_mode = #tpu.pipeline_mode<synchronous>, transform_indices = @transform_5, window_bounds = array<i64: 8, 8>}, {pipeline_mode = #tpu.pipeline_mode<synchronous>, transform_indices = @transform_6, window_bounds = array<i64: 8, 8>}, {pipeline_mode = #tpu.pipeline_mode<synchronous>, transform_indices = @transform_7, window_bounds = array<i64: 1, 8>}, {transform_indices = @transform_8, window_bounds = array<i64: 1, 8, 2, 16, 8>}]} {
    %c8_i32 = arith.constant 8 : i32
    %0 = arith.muli %arg1, %c8_i32 : i32
    %1 = tpu.assume_multiple %0, 8 : i32
    %cst = arith.constant 0.000000e+00 : bf16
    %2 = vector.broadcast %cst : bf16 to vector<12x18x4xbf16>
    %c0 = arith.constant 0 : index
    %c0_0 = arith.constant 0 : index
    %c0_1 = arith.constant 0 : index
    %3 = vector.load %arg11[%c0, %c0_0, %c0_1] : memref<12x18x4xbf16, #tpu.memory_space<vmem>>, vector<12x18x4xbf16>
    tpu.vector_store %arg11[%c0, %c0_0, %c0_1], %2 {strides = array<i32>} : memref<12x18x4xbf16, #tpu.memory_space<vmem>>, vector<12x18x4xbf16>,
    %c0_2 = arith.constant 0 : index
    %4 = arith.index_cast %1 : i32 to index
    %c0_3 = arith.constant 0 : index
    %c0_4 = arith.constant 0 : index
    %5 = vector.load %arg2[%c0_2, %4, %c0_3, %c0_4] : memref<1x16x16x4xbf16, #tpu.memory_space<vmem>>, vector<1x8x16x4xbf16>
    %6 = vector.shape_cast %5 : vector<1x8x16x4xbf16> to vector<8x16x4xbf16>
    %c2 = arith.constant 2 : index
    %c1 = arith.constant 1 : index
    %c0_5 = arith.constant 0 : index
    %7 = vector.load %arg11[%c2, %c1, %c0_5] : memref<12x18x4xbf16, #tpu.memory_space<vmem>>, vector<8x16x4xbf16>
    tpu.vector_store %arg11[%c2, %c1, %c0_5], %6 {strides = array<i32>} : memref<12x18x4xbf16, #tpu.memory_space<vmem>>, vector<8x16x4xbf16>,
    %c2_i32 = arith.constant 2 : i32
    %8 = arith.subi %1, %c2_i32 : i32
    %c0_i32 = arith.constant 0 : i32
    %9 = arith.addi %8, %c0_i32 : i32
    %c0_i32_6 = arith.constant 0 : i32
    %10 = arith.cmpi sge, %9, %c0_i32_6 : i32
    %11 = arith.extui %10 : i1 to i32
    %c0_i32_7 = arith.constant 0 : i32
    %12 = arith.cmpi ne, %11, %c0_i32_7 : i32
    scf.if %12 {
      %c0_166 = arith.constant 0 : index
      %181 = arith.index_cast %9 : i32 to index
      %c0_167 = arith.constant 0 : index
      %c0_168 = arith.constant 0 : index
      %182 = vector.load %arg2[%c0_166, %181, %c0_167, %c0_168] : memref<1x16x16x4xbf16, #tpu.memory_space<vmem>>, vector<1x1x16x4xbf16>
      %183 = vector.shape_cast %182 : vector<1x1x16x4xbf16> to vector<1x16x4xbf16>
      %c0_169 = arith.constant 0 : index
      %c1_170 = arith.constant 1 : index
      %c0_171 = arith.constant 0 : index
      %184 = vector.load %arg11[%c0_169, %c1_170, %c0_171] : memref<12x18x4xbf16, #tpu.memory_space<vmem>>, vector<1x16x4xbf16>
      tpu.vector_store %arg11[%c0_169, %c1_170, %c0_171], %183 {strides = array<i32>} : memref<12x18x4xbf16, #tpu.memory_space<vmem>>, vector<1x16x4xbf16>,
    } else {
    }
    %c2_i32_8 = arith.constant 2 : i32
    %13 = arith.subi %1, %c2_i32_8 : i32
    %c1_i32 = arith.constant 1 : i32
    %14 = arith.addi %13, %c1_i32 : i32
    %c0_i32_9 = arith.constant 0 : i32
    %15 = arith.cmpi sge, %14, %c0_i32_9 : i32
    %16 = arith.extui %15 : i1 to i32
    %c0_i32_10 = arith.constant 0 : i32
    %17 = arith.cmpi ne, %16, %c0_i32_10 : i32
    scf.if %17 {
      %c0_166 = arith.constant 0 : index
      %181 = arith.index_cast %14 : i32 to index
      %c0_167 = arith.constant 0 : index
      %c0_168 = arith.constant 0 : index
      %182 = vector.load %arg2[%c0_166, %181, %c0_167, %c0_168] : memref<1x16x16x4xbf16, #tpu.memory_space<vmem>>, vector<1x1x16x4xbf16>
      %183 = vector.shape_cast %182 : vector<1x1x16x4xbf16> to vector<1x16x4xbf16>
      %c1_169 = arith.constant 1 : index
      %c1_170 = arith.constant 1 : index
      %c0_171 = arith.constant 0 : index
      %184 = vector.load %arg11[%c1_169, %c1_170, %c0_171] : memref<12x18x4xbf16, #tpu.memory_space<vmem>>, vector<1x16x4xbf16>
      tpu.vector_store %arg11[%c1_169, %c1_170, %c0_171], %183 {strides = array<i32>} : memref<12x18x4xbf16, #tpu.memory_space<vmem>>, vector<1x16x4xbf16>,
    } else {
    }
    %c8_i32_11 = arith.constant 8 : i32
    %18 = arith.addi %1, %c8_i32_11 : i32
    %c0_i32_12 = arith.constant 0 : i32
    %19 = arith.addi %18, %c0_i32_12 : i32
    %c16_i32 = arith.constant 16 : i32
    %20 = arith.cmpi slt, %19, %c16_i32 : i32
    %21 = arith.extui %20 : i1 to i32
    %c0_i32_13 = arith.constant 0 : i32
    %22 = arith.cmpi ne, %21, %c0_i32_13 : i32
    scf.if %22 {
      %c0_166 = arith.constant 0 : index
      %181 = arith.index_cast %19 : i32 to index
      %c0_167 = arith.constant 0 : index
      %c0_168 = arith.constant 0 : index
      %182 = vector.load %arg2[%c0_166, %181, %c0_167, %c0_168] : memref<1x16x16x4xbf16, #tpu.memory_space<vmem>>, vector<1x1x16x4xbf16>
      %183 = vector.shape_cast %182 : vector<1x1x16x4xbf16> to vector<1x16x4xbf16>
      %c10 = arith.constant 10 : index
      %c1_169 = arith.constant 1 : index
      %c0_170 = arith.constant 0 : index
      %184 = vector.load %arg11[%c10, %c1_169, %c0_170] : memref<12x18x4xbf16, #tpu.memory_space<vmem>>, vector<1x16x4xbf16>
      tpu.vector_store %arg11[%c10, %c1_169, %c0_170], %183 {strides = array<i32>} : memref<12x18x4xbf16, #tpu.memory_space<vmem>>, vector<1x16x4xbf16>,
    } else {
    }
    %c8_i32_14 = arith.constant 8 : i32
    %23 = arith.addi %1, %c8_i32_14 : i32
    %c1_i32_15 = arith.constant 1 : i32
    %24 = arith.addi %23, %c1_i32_15 : i32
    %c16_i32_16 = arith.constant 16 : i32
    %25 = arith.cmpi slt, %24, %c16_i32_16 : i32
    %26 = arith.extui %25 : i1 to i32
    %c0_i32_17 = arith.constant 0 : i32
    %27 = arith.cmpi ne, %26, %c0_i32_17 : i32
    scf.if %27 {
      %c0_166 = arith.constant 0 : index
      %181 = arith.index_cast %24 : i32 to index
      %c0_167 = arith.constant 0 : index
      %c0_168 = arith.constant 0 : index
      %182 = vector.load %arg2[%c0_166, %181, %c0_167, %c0_168] : memref<1x16x16x4xbf16, #tpu.memory_space<vmem>>, vector<1x1x16x4xbf16>
      %183 = vector.shape_cast %182 : vector<1x1x16x4xbf16> to vector<1x16x4xbf16>
      %c11 = arith.constant 11 : index
      %c1_169 = arith.constant 1 : index
      %c0_170 = arith.constant 0 : index
      %184 = vector.load %arg11[%c11, %c1_169, %c0_170] : memref<12x18x4xbf16, #tpu.memory_space<vmem>>, vector<1x16x4xbf16>
      tpu.vector_store %arg11[%c11, %c1_169, %c0_170], %183 {strides = array<i32>} : memref<12x18x4xbf16, #tpu.memory_space<vmem>>, vector<1x16x4xbf16>,
    } else {
    }
    %cst_18 = arith.constant 0.000000e+00 : f32
    %28 = vector.broadcast %cst_18 : f32 to vector<160x8xf32>
    %c0_19 = arith.constant 0 : index
    %c0_20 = arith.constant 0 : index
    %c0_21 = arith.constant 0 : index
    %29 = vector.load %arg11[%c0_19, %c0_20, %c0_21] : memref<12x18x4xbf16, #tpu.memory_space<vmem>>, vector<12x16x4xbf16>
    %30 = vector.extract_strided_slice %29 {offsets = [0, 0, 0], sizes = [10, 16, 4], strides = [1, 1, 1]} : vector<12x16x4xbf16> to vector<10x16x4xbf16>
    %31 = vector.shape_cast %30 : vector<10x16x4xbf16> to vector<160x4xbf16>
    %c0_22 = arith.constant 0 : index
    %c0_23 = arith.constant 0 : index
    %c0_24 = arith.constant 0 : index
    %c0_25 = arith.constant 0 : index
    %32 = vector.load %arg3[%c0_22, %c0_23, %c0_24, %c0_25] : memref<3x3x4x8xbf16, #tpu.memory_space<vmem>>, vector<1x1x4x8xbf16>
    %33 = vector.shape_cast %32 : vector<1x1x4x8xbf16> to vector<4x8xbf16>
    %cst_26 = arith.constant dense<0.000000e+00> : vector<160x8xf32>
    %34 = tpu.matmul %31, %33, %cst_26 {dimension_numbers = #tpu.dot_dimension_numbers<[1], [0], [0], [1], [0, 0, 1, 1], [], []>} : vector<160x4xbf16>, vector<4x8xbf16>, vector<160x8xf32> -> vector<160x8xf32>
    %35 = arith.addf %28, %34 : vector<160x8xf32>
    %36 = vector.extract_strided_slice %29 {offsets = [1, 0, 0], sizes = [10, 16, 4], strides = [1, 1, 1]} : vector<12x16x4xbf16> to vector<10x16x4xbf16>
    %37 = vector.shape_cast %36 : vector<10x16x4xbf16> to vector<160x4xbf16>
    %c1_27 = arith.constant 1 : index
    %c0_28 = arith.constant 0 : index
    %c0_29 = arith.constant 0 : index
    %c0_30 = arith.constant 0 : index
    %38 = vector.load %arg3[%c1_27, %c0_28, %c0_29, %c0_30] : memref<3x3x4x8xbf16, #tpu.memory_space<vmem>>, vector<1x1x4x8xbf16>
    %39 = vector.shape_cast %38 : vector<1x1x4x8xbf16> to vector<4x8xbf16>
    %cst_31 = arith.constant dense<0.000000e+00> : vector<160x8xf32>
    %40 = tpu.matmul %37, %39, %cst_31 {dimension_numbers = #tpu.dot_dimension_numbers<[1], [0], [0], [1], [0, 0, 1, 1], [], []>} : vector<160x4xbf16>, vector<4x8xbf16>, vector<160x8xf32> -> vector<160x8xf32>
    %41 = arith.addf %35, %40 : vector<160x8xf32>
    %42 = vector.extract_strided_slice %29 {offsets = [2, 0, 0], sizes = [10, 16, 4], strides = [1, 1, 1]} : vector<12x16x4xbf16> to vector<10x16x4xbf16>
    %43 = vector.shape_cast %42 : vector<10x16x4xbf16> to vector<160x4xbf16>
    %c2_32 = arith.constant 2 : index
    %c0_33 = arith.constant 0 : index
    %c0_34 = arith.constant 0 : index
    %c0_35 = arith.constant 0 : index
    %44 = vector.load %arg3[%c2_32, %c0_33, %c0_34, %c0_35] : memref<3x3x4x8xbf16, #tpu.memory_space<vmem>>, vector<1x1x4x8xbf16>
    %45 = vector.shape_cast %44 : vector<1x1x4x8xbf16> to vector<4x8xbf16>
    %cst_36 = arith.constant dense<0.000000e+00> : vector<160x8xf32>
    %46 = tpu.matmul %43, %45, %cst_36 {dimension_numbers = #tpu.dot_dimension_numbers<[1], [0], [0], [1], [0, 0, 1, 1], [], []>} : vector<160x4xbf16>, vector<4x8xbf16>, vector<160x8xf32> -> vector<160x8xf32>
    %47 = arith.addf %41, %46 : vector<160x8xf32>
    %c0_37 = arith.constant 0 : index
    %c1_38 = arith.constant 1 : index
    %c0_39 = arith.constant 0 : index
    %48 = vector.load %arg11[%c0_37, %c1_38, %c0_39] : memref<12x18x4xbf16, #tpu.memory_space<vmem>>, vector<12x16x4xbf16>
    %49 = vector.extract_strided_slice %48 {offsets = [0, 0, 0], sizes = [10, 16, 4], strides = [1, 1, 1]} : vector<12x16x4xbf16> to vector<10x16x4xbf16>
    %50 = vector.shape_cast %49 : vector<10x16x4xbf16> to vector<160x4xbf16>
    %c0_40 = arith.constant 0 : index
    %c1_41 = arith.constant 1 : index
    %c0_42 = arith.constant 0 : index
    %c0_43 = arith.constant 0 : index
    %51 = vector.load %arg3[%c0_40, %c1_41, %c0_42, %c0_43] : memref<3x3x4x8xbf16, #tpu.memory_space<vmem>>, vector<1x1x4x8xbf16>
    %52 = vector.shape_cast %51 : vector<1x1x4x8xbf16> to vector<4x8xbf16>
    %cst_44 = arith.constant dense<0.000000e+00> : vector<160x8xf32>
    %53 = tpu.matmul %50, %52, %cst_44 {dimension_numbers = #tpu.dot_dimension_numbers<[1], [0], [0], [1], [0, 0, 1, 1], [], []>} : vector<160x4xbf16>, vector<4x8xbf16>, vector<160x8xf32> -> vector<160x8xf32>
    %54 = arith.addf %47, %53 : vector<160x8xf32>
    %55 = vector.extract_strided_slice %48 {offsets = [1, 0, 0], sizes = [10, 16, 4], strides = [1, 1, 1]} : vector<12x16x4xbf16> to vector<10x16x4xbf16>
    %56 = vector.shape_cast %55 : vector<10x16x4xbf16> to vector<160x4xbf16>
    %c1_45 = arith.constant 1 : index
    %c1_46 = arith.constant 1 : index
    %c0_47 = arith.constant 0 : index
    %c0_48 = arith.constant 0 : index
    %57 = vector.load %arg3[%c1_45, %c1_46, %c0_47, %c0_48] : memref<3x3x4x8xbf16, #tpu.memory_space<vmem>>, vector<1x1x4x8xbf16>
    %58 = vector.shape_cast %57 : vector<1x1x4x8xbf16> to vector<4x8xbf16>
    %cst_49 = arith.constant dense<0.000000e+00> : vector<160x8xf32>
    %59 = tpu.matmul %56, %58, %cst_49 {dimension_numbers = #tpu.dot_dimension_numbers<[1], [0], [0], [1], [0, 0, 1, 1], [], []>} : vector<160x4xbf16>, vector<4x8xbf16>, vector<160x8xf32> -> vector<160x8xf32>
    %60 = arith.addf %54, %59 : vector<160x8xf32>
    %61 = vector.extract_strided_slice %48 {offsets = [2, 0, 0], sizes = [10, 16, 4], strides = [1, 1, 1]} : vector<12x16x4xbf16> to vector<10x16x4xbf16>
    %62 = vector.shape_cast %61 : vector<10x16x4xbf16> to vector<160x4xbf16>
    %c2_50 = arith.constant 2 : index
    %c1_51 = arith.constant 1 : index
    %c0_52 = arith.constant 0 : index
    %c0_53 = arith.constant 0 : index
    %63 = vector.load %arg3[%c2_50, %c1_51, %c0_52, %c0_53] : memref<3x3x4x8xbf16, #tpu.memory_space<vmem>>, vector<1x1x4x8xbf16>
    %64 = vector.shape_cast %63 : vector<1x1x4x8xbf16> to vector<4x8xbf16>
    %cst_54 = arith.constant dense<0.000000e+00> : vector<160x8xf32>
    %65 = tpu.matmul %62, %64, %cst_54 {dimension_numbers = #tpu.dot_dimension_numbers<[1], [0], [0], [1], [0, 0, 1, 1], [], []>} : vector<160x4xbf16>, vector<4x8xbf16>, vector<160x8xf32> -> vector<160x8xf32>
    %66 = arith.addf %60, %65 : vector<160x8xf32>
    %c0_55 = arith.constant 0 : index
    %c2_56 = arith.constant 2 : index
    %c0_57 = arith.constant 0 : index
    %67 = vector.load %arg11[%c0_55, %c2_56, %c0_57] : memref<12x18x4xbf16, #tpu.memory_space<vmem>>, vector<12x16x4xbf16>
    %68 = vector.extract_strided_slice %67 {offsets = [0, 0, 0], sizes = [10, 16, 4], strides = [1, 1, 1]} : vector<12x16x4xbf16> to vector<10x16x4xbf16>
    %69 = vector.shape_cast %68 : vector<10x16x4xbf16> to vector<160x4xbf16>
    %c0_58 = arith.constant 0 : index
    %c2_59 = arith.constant 2 : index
    %c0_60 = arith.constant 0 : index
    %c0_61 = arith.constant 0 : index
    %70 = vector.load %arg3[%c0_58, %c2_59, %c0_60, %c0_61] : memref<3x3x4x8xbf16, #tpu.memory_space<vmem>>, vector<1x1x4x8xbf16>
    %71 = vector.shape_cast %70 : vector<1x1x4x8xbf16> to vector<4x8xbf16>
    %cst_62 = arith.constant dense<0.000000e+00> : vector<160x8xf32>
    %72 = tpu.matmul %69, %71, %cst_62 {dimension_numbers = #tpu.dot_dimension_numbers<[1], [0], [0], [1], [0, 0, 1, 1], [], []>} : vector<160x4xbf16>, vector<4x8xbf16>, vector<160x8xf32> -> vector<160x8xf32>
    %73 = arith.addf %66, %72 : vector<160x8xf32>
    %74 = vector.extract_strided_slice %67 {offsets = [1, 0, 0], sizes = [10, 16, 4], strides = [1, 1, 1]} : vector<12x16x4xbf16> to vector<10x16x4xbf16>
    %75 = vector.shape_cast %74 : vector<10x16x4xbf16> to vector<160x4xbf16>
    %c1_63 = arith.constant 1 : index
    %c2_64 = arith.constant 2 : index
    %c0_65 = arith.constant 0 : index
    %c0_66 = arith.constant 0 : index
    %76 = vector.load %arg3[%c1_63, %c2_64, %c0_65, %c0_66] : memref<3x3x4x8xbf16, #tpu.memory_space<vmem>>, vector<1x1x4x8xbf16>
    %77 = vector.shape_cast %76 : vector<1x1x4x8xbf16> to vector<4x8xbf16>
    %cst_67 = arith.constant dense<0.000000e+00> : vector<160x8xf32>
    %78 = tpu.matmul %75, %77, %cst_67 {dimension_numbers = #tpu.dot_dimension_numbers<[1], [0], [0], [1], [0, 0, 1, 1], [], []>} : vector<160x4xbf16>, vector<4x8xbf16>, vector<160x8xf32> -> vector<160x8xf32>
    %79 = arith.addf %73, %78 : vector<160x8xf32>
    %80 = vector.extract_strided_slice %67 {offsets = [2, 0, 0], sizes = [10, 16, 4], strides = [1, 1, 1]} : vector<12x16x4xbf16> to vector<10x16x4xbf16>
    %81 = vector.shape_cast %80 : vector<10x16x4xbf16> to vector<160x4xbf16>
    %c2_68 = arith.constant 2 : index
    %c2_69 = arith.constant 2 : index
    %c0_70 = arith.constant 0 : index
    %c0_71 = arith.constant 0 : index
    %82 = vector.load %arg3[%c2_68, %c2_69, %c0_70, %c0_71] : memref<3x3x4x8xbf16, #tpu.memory_space<vmem>>, vector<1x1x4x8xbf16>
    %83 = vector.shape_cast %82 : vector<1x1x4x8xbf16> to vector<4x8xbf16>
    %cst_72 = arith.constant dense<0.000000e+00> : vector<160x8xf32>
    %84 = tpu.matmul %81, %83, %cst_72 {dimension_numbers = #tpu.dot_dimension_numbers<[1], [0], [0], [1], [0, 0, 1, 1], [], []>} : vector<160x4xbf16>, vector<4x8xbf16>, vector<160x8xf32> -> vector<160x8xf32>
    %85 = arith.addf %79, %84 : vector<160x8xf32>
    %c0_73 = arith.constant 0 : index
    %c0_74 = arith.constant 0 : index
    %86 = vector.load %arg4[%c0_73, %c0_74] : memref<1x8xf32, #tpu.memory_space<vmem>>, vector<1x8xf32>
    %87 = vector.broadcast %86 : vector<1x8xf32> to vector<160x8xf32>
    %88 = arith.addf %85, %87 : vector<160x8xf32>
    %cst_75 = arith.constant 0.000000e+00 : f32
    %89 = vector.broadcast %cst_75 : f32 to vector<160x8xf32>
    %90 = arith.maximumf %88, %89 : vector<160x8xf32>
    %cst_76 = arith.constant 0.000000e+00 : bf16
    %91 = vector.broadcast %cst_76 : bf16 to vector<10x18x8xbf16>
    %c0_77 = arith.constant 0 : index
    %c0_78 = arith.constant 0 : index
    %c0_79 = arith.constant 0 : index
    %92 = vector.load %arg12[%c0_77, %c0_78, %c0_79] : memref<10x18x8xbf16, #tpu.memory_space<vmem>>, vector<10x18x8xbf16>
    tpu.vector_store %arg12[%c0_77, %c0_78, %c0_79], %91 {strides = array<i32>} : memref<10x18x8xbf16, #tpu.memory_space<vmem>>, vector<10x18x8xbf16>,
    %93 = vector.shape_cast %90 : vector<160x8xf32> to vector<10x16x8xf32>
    %94 = arith.truncf %93 : vector<10x16x8xf32> to vector<10x16x8xbf16>
    %c0_80 = arith.constant 0 : index
    %c1_81 = arith.constant 1 : index
    %c0_82 = arith.constant 0 : index
    %95 = vector.load %arg12[%c0_80, %c1_81, %c0_82] : memref<10x18x8xbf16, #tpu.memory_space<vmem>>, vector<10x16x8xbf16>
    tpu.vector_store %arg12[%c0_80, %c1_81, %c0_82], %94 {strides = array<i32>} : memref<10x18x8xbf16, #tpu.memory_space<vmem>>, vector<10x16x8xbf16>,
    %c0_i32_83 = arith.constant 0 : i32
    %96 = arith.cmpi eq, %1, %c0_i32_83 : i32
    %97 = arith.extui %96 : i1 to i32
    %c0_i32_84 = arith.constant 0 : i32
    %98 = arith.cmpi ne, %97, %c0_i32_84 : i32
    scf.if %98 {
      %cst_166 = arith.constant 0.000000e+00 : bf16
      %181 = vector.broadcast %cst_166 : bf16 to vector<1x18x8xbf16>
      %c0_167 = arith.constant 0 : index
      %c0_168 = arith.constant 0 : index
      %c0_169 = arith.constant 0 : index
      %182 = vector.load %arg12[%c0_167, %c0_168, %c0_169] : memref<10x18x8xbf16, #tpu.memory_space<vmem>>, vector<1x18x8xbf16>
      tpu.vector_store %arg12[%c0_167, %c0_168, %c0_169], %181 {strides = array<i32>} : memref<10x18x8xbf16, #tpu.memory_space<vmem>>, vector<1x18x8xbf16>,
    } else {
    }
    %c8_i32_85 = arith.constant 8 : i32
    %99 = arith.addi %1, %c8_i32_85 : i32
    %c16_i32_86 = arith.constant 16 : i32
    %100 = arith.cmpi sge, %99, %c16_i32_86 : i32
    %101 = arith.extui %100 : i1 to i32
    %c0_i32_87 = arith.constant 0 : i32
    %102 = arith.cmpi ne, %101, %c0_i32_87 : i32
    scf.if %102 {
      %cst_166 = arith.constant 0.000000e+00 : bf16
      %181 = vector.broadcast %cst_166 : bf16 to vector<1x18x8xbf16>
      %c9 = arith.constant 9 : index
      %c0_167 = arith.constant 0 : index
      %c0_168 = arith.constant 0 : index
      %182 = vector.load %arg12[%c9, %c0_167, %c0_168] : memref<10x18x8xbf16, #tpu.memory_space<vmem>>, vector<1x18x8xbf16>
      tpu.vector_store %arg12[%c9, %c0_167, %c0_168], %181 {strides = array<i32>} : memref<10x18x8xbf16, #tpu.memory_space<vmem>>, vector<1x18x8xbf16>,
    } else {
    }
    %cst_88 = arith.constant 0.000000e+00 : f32
    %103 = vector.broadcast %cst_88 : f32 to vector<128x8xf32>
    %c0_89 = arith.constant 0 : index
    %c0_90 = arith.constant 0 : index
    %c0_91 = arith.constant 0 : index
    %104 = vector.load %arg12[%c0_89, %c0_90, %c0_91] : memref<10x18x8xbf16, #tpu.memory_space<vmem>>, vector<10x16x8xbf16>
    %105 = vector.extract_strided_slice %104 {offsets = [0, 0, 0], sizes = [8, 16, 8], strides = [1, 1, 1]} : vector<10x16x8xbf16> to vector<8x16x8xbf16>
    %106 = vector.shape_cast %105 : vector<8x16x8xbf16> to vector<128x8xbf16>
    %c0_92 = arith.constant 0 : index
    %c0_93 = arith.constant 0 : index
    %c0_94 = arith.constant 0 : index
    %c0_95 = arith.constant 0 : index
    %107 = vector.load %arg5[%c0_92, %c0_93, %c0_94, %c0_95] : memref<3x3x8x8xbf16, #tpu.memory_space<vmem>>, vector<1x1x8x8xbf16>
    %108 = vector.shape_cast %107 : vector<1x1x8x8xbf16> to vector<8x8xbf16>
    %cst_96 = arith.constant dense<0.000000e+00> : vector<128x8xf32>
    %109 = tpu.matmul %106, %108, %cst_96 {dimension_numbers = #tpu.dot_dimension_numbers<[1], [0], [0], [1], [0, 0, 1, 1], [], []>} : vector<128x8xbf16>, vector<8x8xbf16>, vector<128x8xf32> -> vector<128x8xf32>
    %110 = arith.addf %103, %109 : vector<128x8xf32>
    %111 = vector.extract_strided_slice %104 {offsets = [1, 0, 0], sizes = [8, 16, 8], strides = [1, 1, 1]} : vector<10x16x8xbf16> to vector<8x16x8xbf16>
    %112 = vector.shape_cast %111 : vector<8x16x8xbf16> to vector<128x8xbf16>
    %c1_97 = arith.constant 1 : index
    %c0_98 = arith.constant 0 : index
    %c0_99 = arith.constant 0 : index
    %c0_100 = arith.constant 0 : index
    %113 = vector.load %arg5[%c1_97, %c0_98, %c0_99, %c0_100] : memref<3x3x8x8xbf16, #tpu.memory_space<vmem>>, vector<1x1x8x8xbf16>
    %114 = vector.shape_cast %113 : vector<1x1x8x8xbf16> to vector<8x8xbf16>
    %cst_101 = arith.constant dense<0.000000e+00> : vector<128x8xf32>
    %115 = tpu.matmul %112, %114, %cst_101 {dimension_numbers = #tpu.dot_dimension_numbers<[1], [0], [0], [1], [0, 0, 1, 1], [], []>} : vector<128x8xbf16>, vector<8x8xbf16>, vector<128x8xf32> -> vector<128x8xf32>
    %116 = arith.addf %110, %115 : vector<128x8xf32>
    %117 = vector.extract_strided_slice %104 {offsets = [2, 0, 0], sizes = [8, 16, 8], strides = [1, 1, 1]} : vector<10x16x8xbf16> to vector<8x16x8xbf16>
    %118 = vector.shape_cast %117 : vector<8x16x8xbf16> to vector<128x8xbf16>
    %c2_102 = arith.constant 2 : index
    %c0_103 = arith.constant 0 : index
    %c0_104 = arith.constant 0 : index
    %c0_105 = arith.constant 0 : index
    %119 = vector.load %arg5[%c2_102, %c0_103, %c0_104, %c0_105] : memref<3x3x8x8xbf16, #tpu.memory_space<vmem>>, vector<1x1x8x8xbf16>
    %120 = vector.shape_cast %119 : vector<1x1x8x8xbf16> to vector<8x8xbf16>
    %cst_106 = arith.constant dense<0.000000e+00> : vector<128x8xf32>
    %121 = tpu.matmul %118, %120, %cst_106 {dimension_numbers = #tpu.dot_dimension_numbers<[1], [0], [0], [1], [0, 0, 1, 1], [], []>} : vector<128x8xbf16>, vector<8x8xbf16>, vector<128x8xf32> -> vector<128x8xf32>
    %122 = arith.addf %116, %121 : vector<128x8xf32>
    %c0_107 = arith.constant 0 : index
    %c1_108 = arith.constant 1 : index
    %c0_109 = arith.constant 0 : index
    %123 = vector.load %arg12[%c0_107, %c1_108, %c0_109] : memref<10x18x8xbf16, #tpu.memory_space<vmem>>, vector<10x16x8xbf16>
    %124 = vector.extract_strided_slice %123 {offsets = [0, 0, 0], sizes = [8, 16, 8], strides = [1, 1, 1]} : vector<10x16x8xbf16> to vector<8x16x8xbf16>
    %125 = vector.shape_cast %124 : vector<8x16x8xbf16> to vector<128x8xbf16>
    %c0_110 = arith.constant 0 : index
    %c1_111 = arith.constant 1 : index
    %c0_112 = arith.constant 0 : index
    %c0_113 = arith.constant 0 : index
    %126 = vector.load %arg5[%c0_110, %c1_111, %c0_112, %c0_113] : memref<3x3x8x8xbf16, #tpu.memory_space<vmem>>, vector<1x1x8x8xbf16>
    %127 = vector.shape_cast %126 : vector<1x1x8x8xbf16> to vector<8x8xbf16>
    %cst_114 = arith.constant dense<0.000000e+00> : vector<128x8xf32>
    %128 = tpu.matmul %125, %127, %cst_114 {dimension_numbers = #tpu.dot_dimension_numbers<[1], [0], [0], [1], [0, 0, 1, 1], [], []>} : vector<128x8xbf16>, vector<8x8xbf16>, vector<128x8xf32> -> vector<128x8xf32>
    %129 = arith.addf %122, %128 : vector<128x8xf32>
    %130 = vector.extract_strided_slice %123 {offsets = [1, 0, 0], sizes = [8, 16, 8], strides = [1, 1, 1]} : vector<10x16x8xbf16> to vector<8x16x8xbf16>
    %131 = vector.shape_cast %130 : vector<8x16x8xbf16> to vector<128x8xbf16>
    %c1_115 = arith.constant 1 : index
    %c1_116 = arith.constant 1 : index
    %c0_117 = arith.constant 0 : index
    %c0_118 = arith.constant 0 : index
    %132 = vector.load %arg5[%c1_115, %c1_116, %c0_117, %c0_118] : memref<3x3x8x8xbf16, #tpu.memory_space<vmem>>, vector<1x1x8x8xbf16>
    %133 = vector.shape_cast %132 : vector<1x1x8x8xbf16> to vector<8x8xbf16>
    %cst_119 = arith.constant dense<0.000000e+00> : vector<128x8xf32>
    %134 = tpu.matmul %131, %133, %cst_119 {dimension_numbers = #tpu.dot_dimension_numbers<[1], [0], [0], [1], [0, 0, 1, 1], [], []>} : vector<128x8xbf16>, vector<8x8xbf16>, vector<128x8xf32> -> vector<128x8xf32>
    %135 = arith.addf %129, %134 : vector<128x8xf32>
    %136 = vector.extract_strided_slice %123 {offsets = [2, 0, 0], sizes = [8, 16, 8], strides = [1, 1, 1]} : vector<10x16x8xbf16> to vector<8x16x8xbf16>
    %137 = vector.shape_cast %136 : vector<8x16x8xbf16> to vector<128x8xbf16>
    %c2_120 = arith.constant 2 : index
    %c1_121 = arith.constant 1 : index
    %c0_122 = arith.constant 0 : index
    %c0_123 = arith.constant 0 : index
    %138 = vector.load %arg5[%c2_120, %c1_121, %c0_122, %c0_123] : memref<3x3x8x8xbf16, #tpu.memory_space<vmem>>, vector<1x1x8x8xbf16>
    %139 = vector.shape_cast %138 : vector<1x1x8x8xbf16> to vector<8x8xbf16>
    %cst_124 = arith.constant dense<0.000000e+00> : vector<128x8xf32>
    %140 = tpu.matmul %137, %139, %cst_124 {dimension_numbers = #tpu.dot_dimension_numbers<[1], [0], [0], [1], [0, 0, 1, 1], [], []>} : vector<128x8xbf16>, vector<8x8xbf16>, vector<128x8xf32> -> vector<128x8xf32>
    %141 = arith.addf %135, %140 : vector<128x8xf32>
    %c0_125 = arith.constant 0 : index
    %c2_126 = arith.constant 2 : index
    %c0_127 = arith.constant 0 : index
    %142 = vector.load %arg12[%c0_125, %c2_126, %c0_127] : memref<10x18x8xbf16, #tpu.memory_space<vmem>>, vector<10x16x8xbf16>
    %143 = vector.extract_strided_slice %142 {offsets = [0, 0, 0], sizes = [8, 16, 8], strides = [1, 1, 1]} : vector<10x16x8xbf16> to vector<8x16x8xbf16>
    %144 = vector.shape_cast %143 : vector<8x16x8xbf16> to vector<128x8xbf16>
    %c0_128 = arith.constant 0 : index
    %c2_129 = arith.constant 2 : index
    %c0_130 = arith.constant 0 : index
    %c0_131 = arith.constant 0 : index
    %145 = vector.load %arg5[%c0_128, %c2_129, %c0_130, %c0_131] : memref<3x3x8x8xbf16, #tpu.memory_space<vmem>>, vector<1x1x8x8xbf16>
    %146 = vector.shape_cast %145 : vector<1x1x8x8xbf16> to vector<8x8xbf16>
    %cst_132 = arith.constant dense<0.000000e+00> : vector<128x8xf32>
    %147 = tpu.matmul %144, %146, %cst_132 {dimension_numbers = #tpu.dot_dimension_numbers<[1], [0], [0], [1], [0, 0, 1, 1], [], []>} : vector<128x8xbf16>, vector<8x8xbf16>, vector<128x8xf32> -> vector<128x8xf32>
    %148 = arith.addf %141, %147 : vector<128x8xf32>
    %149 = vector.extract_strided_slice %142 {offsets = [1, 0, 0], sizes = [8, 16, 8], strides = [1, 1, 1]} : vector<10x16x8xbf16> to vector<8x16x8xbf16>
    %150 = vector.shape_cast %149 : vector<8x16x8xbf16> to vector<128x8xbf16>
    %c1_133 = arith.constant 1 : index
    %c2_134 = arith.constant 2 : index
    %c0_135 = arith.constant 0 : index
    %c0_136 = arith.constant 0 : index
    %151 = vector.load %arg5[%c1_133, %c2_134, %c0_135, %c0_136] : memref<3x3x8x8xbf16, #tpu.memory_space<vmem>>, vector<1x1x8x8xbf16>
    %152 = vector.shape_cast %151 : vector<1x1x8x8xbf16> to vector<8x8xbf16>
    %cst_137 = arith.constant dense<0.000000e+00> : vector<128x8xf32>
    %153 = tpu.matmul %150, %152, %cst_137 {dimension_numbers = #tpu.dot_dimension_numbers<[1], [0], [0], [1], [0, 0, 1, 1], [], []>} : vector<128x8xbf16>, vector<8x8xbf16>, vector<128x8xf32> -> vector<128x8xf32>
    %154 = arith.addf %148, %153 : vector<128x8xf32>
    %155 = vector.extract_strided_slice %142 {offsets = [2, 0, 0], sizes = [8, 16, 8], strides = [1, 1, 1]} : vector<10x16x8xbf16> to vector<8x16x8xbf16>
    %156 = vector.shape_cast %155 : vector<8x16x8xbf16> to vector<128x8xbf16>
    %c2_138 = arith.constant 2 : index
    %c2_139 = arith.constant 2 : index
    %c0_140 = arith.constant 0 : index
    %c0_141 = arith.constant 0 : index
    %157 = vector.load %arg5[%c2_138, %c2_139, %c0_140, %c0_141] : memref<3x3x8x8xbf16, #tpu.memory_space<vmem>>, vector<1x1x8x8xbf16>
    %158 = vector.shape_cast %157 : vector<1x1x8x8xbf16> to vector<8x8xbf16>
    %cst_142 = arith.constant dense<0.000000e+00> : vector<128x8xf32>
    %159 = tpu.matmul %156, %158, %cst_142 {dimension_numbers = #tpu.dot_dimension_numbers<[1], [0], [0], [1], [0, 0, 1, 1], [], []>} : vector<128x8xbf16>, vector<8x8xbf16>, vector<128x8xf32> -> vector<128x8xf32>
    %160 = arith.addf %154, %159 : vector<128x8xf32>
    %c0_143 = arith.constant 0 : index
    %c0_144 = arith.constant 0 : index
    %161 = vector.load %arg6[%c0_143, %c0_144] : memref<1x8xf32, #tpu.memory_space<vmem>>, vector<1x8xf32>
    %162 = vector.broadcast %161 : vector<1x8xf32> to vector<128x8xf32>
    %163 = arith.addf %160, %162 : vector<128x8xf32>
    %cst_145 = arith.constant 0.000000e+00 : f32
    %164 = vector.broadcast %cst_145 : f32 to vector<128x8xf32>
    %165 = arith.maximumf %163, %164 : vector<128x8xf32>
    %166 = arith.truncf %165 : vector<128x8xf32> to vector<128x8xbf16>
    %c0_146 = arith.constant 0 : index
    %c0_147 = arith.constant 0 : index
    %167 = vector.load %arg7[%c0_146, %c0_147] : memref<8x8xbf16, #tpu.memory_space<vmem>>, vector<8x8xbf16>
    %cst_148 = arith.constant dense<0.000000e+00> : vector<128x8xf32>
    %168 = tpu.matmul %166, %167, %cst_148 {dimension_numbers = #tpu.dot_dimension_numbers<[1], [0], [0], [1], [0, 0, 1, 1], [], []>} : vector<128x8xbf16>, vector<8x8xbf16>, vector<128x8xf32> -> vector<128x8xf32>
    %c0_149 = arith.constant 0 : index
    %c0_150 = arith.constant 0 : index
    %169 = vector.load %arg9[%c0_149, %c0_150] : memref<1x8xf32, #tpu.memory_space<vmem>>, vector<1x8xf32>
    %170 = vector.broadcast %169 : vector<1x8xf32> to vector<128x8xf32>
    %171 = arith.addf %168, %170 : vector<128x8xf32>
    %c0_151 = arith.constant 0 : index
    %c0_152 = arith.constant 0 : index
    %172 = vector.load %arg8[%c0_151, %c0_152] : memref<8x8xbf16, #tpu.memory_space<vmem>>, vector<8x8xbf16>
    %cst_153 = arith.constant dense<0.000000e+00> : vector<128x8xf32>
    %173 = tpu.matmul %166, %172, %cst_153 {dimension_numbers = #tpu.dot_dimension_numbers<[1], [0], [0], [1], [0, 0, 1, 1], [], []>} : vector<128x8xbf16>, vector<8x8xbf16>, vector<128x8xf32> -> vector<128x8xf32>
    %c0_154 = arith.constant 0 : index
    %c0_155 = arith.constant 0 : index
    %174 = vector.load %arg9[%c0_154, %c0_155] : memref<1x8xf32, #tpu.memory_space<vmem>>, vector<1x8xf32>
    %175 = vector.broadcast %174 : vector<1x8xf32> to vector<128x8xf32>
    %176 = arith.addf %173, %175 : vector<128x8xf32>
    %177 = vector.shape_cast %171 : vector<128x8xf32> to vector<1x8x1x16x8xf32>
    %c0_156 = arith.constant 0 : index
    %c0_157 = arith.constant 0 : index
    %c0_158 = arith.constant 0 : index
    %c0_159 = arith.constant 0 : index
    %c0_160 = arith.constant 0 : index
    %178 = vector.load %arg10[%c0_156, %c0_157, %c0_158, %c0_159, %c0_160] : memref<1x8x2x16x8xf32, #tpu.memory_space<vmem>>, vector<1x8x1x16x8xf32>
    tpu.vector_store %arg10[%c0_156, %c0_157, %c0_158, %c0_159, %c0_160], %177 {strides = array<i32>} : memref<1x8x2x16x8xf32, #tpu.memory_space<vmem>>, vector<1x8x1x16x8xf32>,
    %179 = vector.shape_cast %176 : vector<128x8xf32> to vector<1x8x1x16x8xf32>
    %c0_161 = arith.constant 0 : index
    %c0_162 = arith.constant 0 : index
    %c1_163 = arith.constant 1 : index
    %c0_164 = arith.constant 0 : index
    %c0_165 = arith.constant 0 : index
    %180 = vector.load %arg10[%c0_161, %c0_162, %c1_163, %c0_164, %c0_165] : memref<1x8x2x16x8xf32, #tpu.memory_space<vmem>>, vector<1x8x1x16x8xf32>
    tpu.vector_store %arg10[%c0_161, %c0_162, %c1_163, %c0_164, %c0_165], %179 {strides = array<i32>} : memref<1x8x2x16x8xf32, #tpu.memory_space<vmem>>, vector<1x8x1x16x8xf32>,
    return
  }
  func.func @transform_0(%arg0: i32, %arg1: i32) -> (i32, i32, i32, i32) {
    %c0_i32 = arith.constant 0 : i32
    %c0_i32_0 = arith.constant 0 : i32
    %c0_i32_1 = arith.constant 0 : i32
    %c0_i32_2 = arith.constant 0 : i32
    return %arg0, %c0_i32, %c0_i32_0, %c0_i32_1 : i32, i32, i32, i32
  }
  func.func @transform_1(%arg0: i32, %arg1: i32) -> (i32, i32, i32, i32) {
    %c0_i32 = arith.constant 0 : i32
    %c0_i32_0 = arith.constant 0 : i32
    %c0_i32_1 = arith.constant 0 : i32
    %c0_i32_2 = arith.constant 0 : i32
    %c0_i32_3 = arith.constant 0 : i32
    return %c0_i32, %c0_i32_0, %c0_i32_1, %c0_i32_2 : i32, i32, i32, i32
  }
  func.func @transform_2(%arg0: i32, %arg1: i32) -> (i32, i32) {
    %c0_i32 = arith.constant 0 : i32
    %c0_i32_0 = arith.constant 0 : i32
    %c0_i32_1 = arith.constant 0 : i32
    return %c0_i32, %c0_i32_0 : i32, i32
  }
  func.func @transform_3(%arg0: i32, %arg1: i32) -> (i32, i32, i32, i32) {
    %c0_i32 = arith.constant 0 : i32
    %c0_i32_0 = arith.constant 0 : i32
    %c0_i32_1 = arith.constant 0 : i32
    %c0_i32_2 = arith.constant 0 : i32
    %c0_i32_3 = arith.constant 0 : i32
    return %c0_i32, %c0_i32_0, %c0_i32_1, %c0_i32_2 : i32, i32, i32, i32
  }
  func.func @transform_4(%arg0: i32, %arg1: i32) -> (i32, i32) {
    %c0_i32 = arith.constant 0 : i32
    %c0_i32_0 = arith.constant 0 : i32
    %c0_i32_1 = arith.constant 0 : i32
    return %c0_i32, %c0_i32_0 : i32, i32
  }
  func.func @transform_5(%arg0: i32, %arg1: i32) -> (i32, i32) {
    %c0_i32 = arith.constant 0 : i32
    %c0_i32_0 = arith.constant 0 : i32
    %c0_i32_1 = arith.constant 0 : i32
    return %c0_i32, %c0_i32_0 : i32, i32
  }
  func.func @transform_6(%arg0: i32, %arg1: i32) -> (i32, i32) {
    %c0_i32 = arith.constant 0 : i32
    %c0_i32_0 = arith.constant 0 : i32
    %c0_i32_1 = arith.constant 0 : i32
    return %c0_i32, %c0_i32_0 : i32, i32
  }
  func.func @transform_7(%arg0: i32, %arg1: i32) -> (i32, i32) {
    %c0_i32 = arith.constant 0 : i32
    %c0_i32_0 = arith.constant 0 : i32
    %c0_i32_1 = arith.constant 0 : i32
    return %c0_i32, %c0_i32_0 : i32, i32
  }
  func.func @transform_8(%arg0: i32, %arg1: i32) -> (i32, i32, i32, i32, i32) {
    %c0_i32 = arith.constant 0 : i32
    %c0_i32_0 = arith.constant 0 : i32
    %c0_i32_1 = arith.constant 0 : i32
    %c0_i32_2 = arith.constant 0 : i32
    return %arg0, %arg1, %c0_i32, %c0_i32_0, %c0_i32_1 : i32, i32, i32, i32, i32
  }
}

</mosaic_0001>

<bundles_post_ra>
// kernel: tile.8
= control target key start
LH: loop header
LB: loop body
LE: loop exit
PB: predicated region body
PF: predicated region fallthrough
CT: control target
= control target key end

     0   :  { %s22_s0 = inlined_call_operand.vmem [shape: f32[4], index: 0, kind: input, shape index: {}]   ;;  %s23_s1 = inlined_call_operand.vmem [shape: f32[2,4], index: 1, kind: output, shape index: {}]  }
   0x1   :  { %v4_v0 = vld [vmem:[%s22_s0] ss:$0 sm:$0xff] }
   0x2   :  { %5 = vst [vmem:[%s23_s1] sm:$0x3] %v4_v0 }

// kernel: tile.9
= control target key start
LH: loop header
LB: loop body
LE: loop exit
PB: predicated region body
PF: predicated region fallthrough
CT: control target
= control target key end

     0   :  { %vm8_vm0 = vcmask 31744   ;;  %vm14_vm1 = vcmask 64544   ;;  %s42_s0 = inlined_call_operand.vmem [shape: f32[2,4], index: 0, kind: input, shape index: {}]   ;;  %s43_s1 = inlined_call_operand.vmem [shape: f32[1,8], index: 1, kind: output, shape index: {}]  }
   0x1   :  { %v5_v0 = vld [vmem:[%s42_s0] sm:$0x3]  ;;  %s25_s0 = smov 4  }
   0x2   :  { %6 = vst [vmem:[#allocation1] sm:$0x3] %v5_v0 }
   0x9   :  { %v11_v1 = vld [vmem:[#allocation1 + $0x1] sm:$0x1]   ;;  %v7_v2 = vld [vmem:[#allocation1] sm:$0x1]  }
   0xa   :  { %12 = vrot.lane.b32.xlu0 %v11_v1, %s25_s0  ;;  %9 = vst.msk [vmem:[#allocation0] sm:$0x1] %vm8_vm0, %v7_v2  }
  0x7c   :  { %v13_v3 = vpop.permute.xlu0 %12  }
  0x7d   :  { %15 = vst.msk [vmem:[#allocation0] sm:$0x1] %vm14_vm1, %v13_v3  }
  0x84   :  { %v20_v4 = vld [vmem:[#allocation0] sm:$0x1] }
  0x85   :  { %23 = vst [vmem:[%s43_s1] sm:$0x1] %v20_v4 }

// kernel: bottom_block_forward.1
= control target key start
LH: loop header
LB: loop body
LE: loop exit
PB: predicated region body
PF: predicated region fallthrough
CT: control target
= control target key end

     0   :  { %s6325_s27 = smov 0   ;;  %s6327_s28 = smov 0   ;;  %s8415_s0 = inlined_call_operand.vmem [shape: bf16[2,16,16,4], index: 0, kind: input, shape index: {}]   ;;  %s8416_s1 = inlined_call_operand.vmem [shape: bf16[3,3,4,8], index: 1, kind: input, shape index: {}]   ;;  %s8417_s2 = inlined_call_operand.vmem [shape: f32[1,8], index: 2, kind: input, shape index: {}]   ;;  %s8418_s3 = inlined_call_operand.vmem [shape: bf16[3,3,8,8], index: 3, kind: input, shape index: {}]   ;;  %s8419_s4 = inlined_call_operand.vmem [shape: f32[1,8], index: 4, kind: input, shape index: {}]   ;;  %s8420_s5 = inlined_call_operand.vmem [shape: bf16[8,8], index: 5, kind: input, shape index: {}]   ;;  %s8421_s6 = inlined_call_operand.vmem [shape: bf16[8,8], index: 6, kind: input, shape index: {}]   ;;  %s8422_s7 = inlined_call_operand.vmem [shape: f32[1,8], index: 7, kind: input, shape index: {}]   ;;  %s8423_s8 = inlined_call_operand.vmem [shape: f32[2,16,2,16,8], index: 8, kind: output, shape index: {}]  }
   0x1   :  { %s6329_s29 = smov 0   ;;  %s6331_s30 = smov 0  }
   0x2   :  { %s6333_s9 = smov 0  }
   0x3 LB: > { %s27_s10 = sadd.s32 1, %s6267_s29  ;;  %s30_s11 = sadd.s32 1, %s6271_s30  ;;  %s6275_s9 = sphi %s6333_s9, %s18_s9   ;;  %s6271_s30 = sphi %s6331_s30, %s8531_s30   ;;  %s6267_s29 = sphi %s6329_s29, %s8530_s29   ;;  %s6263_s28 = sphi %s6327_s28, %s8529_s28   ;;  %s6259_s27 = sphi %s6325_s27, %s8528_s27  }
   0x4   : > { %p28_p0 = scmp.ge.s32.totalorder %s27_s10, 2  ;;  %p5177_p1 = scmp.ge.s32.totalorder %s6275_s9, 1 }
   0x5   : > { %p276_p2 = scmp.lt.s32.totalorder %s6275_s9, 5 }
   0x6   : > { %s8533_s10 = smov (%p28_p0, %s27_s10), 0  ;;  %s8535_s11 = smov (!%p28_p0, %s30_s11), %s6271_s30 }
   0x7   : > { %p277_p3 = pnand %p5177_p1, %p276_p2  ;;  %p32_p4 = scmp.ge.s32.totalorder %s8535_s11, 2 }
   0x9   : > { %s8537_s11 = smov (%p32_p4, %s8535_s11), 0  ;;  %280 = sbr.rel (%p277_p3) target bundleno = 1135 (0x46f), region = 52 }
   0xe   : > { %vm333_vm0 = vcmask 27648   ;;  %vm336_vm1 = vcmask 24576   ;;  %p315_p5 = scmp.lt.s32.totalorder %s6263_s28, 1  ;;  %s6361_s12 = sshll.u32 %s6259_s27, 3  ;;  %v6277_v0 = vmov 0   ;;  %v8432_v12 = vmov 0 }
   0xf   : > { %341 = vst.msk [vmem:[#allocation2 + $0x18] sm:$0xf] %vm333_vm0, %v6277_v0  ;;  %334 = vst.msk [vmem:[#allocation2] sm:$0xf] %vm333_vm0, %v6277_v0  ;;  %p323_p6 = scmp.lt.s32.totalorder %s6361_s12, 15  ;;  %s5533_s13 = sshll.u32 %s6259_s27, 6 }
  0x10   : > { %335 = vst.msk [vmem:[#allocation2 + $0x4] sm:$0xf] %vm333_vm0, %v6277_v0  ;;  %338 = vst.msk [vmem:[#allocation2 + $0xc] sm:$0xf] %vm333_vm0, %v6277_v0  ;;  %s8539_s28 = smov (!%p315_p5, %s6263_s28), 1  ;;  %s5187_s24 = sadd.s32 4294967294, %s6361_s12 }
  0x11   : > { %339 = vst.msk [vmem:[#allocation2 + $0x10] sm:$0xf] %vm333_vm0, %v6277_v0  ;;  %342 = vst.msk [vmem:[#allocation2 + $0x1c] sm:$0xf] %vm333_vm0, %v6277_v0  ;;  %s324_s14 = scalar_select %p323_p6, %s6361_s12, 15 }
  0x12   : > { %344 = vst.msk [vmem:[#allocation2 + $0x24] sm:$0xf] %vm333_vm0, %v6277_v0  ;;  %345 = vst.msk [vmem:[#allocation2 + $0x28] sm:$0xf] %vm333_vm0, %v6277_v0  ;;  %s5531_s15 = sshll.u32 %s8539_s28, 7  ;;  %s5182_s16 = sshll.u32 %s8539_s28, 6 }
  0x13   : > { %347 = vst.msk [vmem:[#allocation2 + $0x30] sm:$0xf] %vm333_vm0, %v6277_v0  ;;  %348 = vst.msk [vmem:[#allocation2 + $0x34] sm:$0xf] %vm333_vm0, %v6277_v0  ;;  %s6444_s19 = scalar_lea.vmem %s8415_s0, %s5531_s15  ;;  %s5181_s20 = sshll.u32 %s324_s14, 2 }
  0x14   : > { %350 = vst.msk [vmem:[#allocation2 + $0x3c] sm:$0xf] %vm333_vm0, %v6277_v0  ;;  %351 = vst.msk [vmem:[#allocation2 + $0x40] sm:$0xf] %vm333_vm0, %v6277_v0  ;;  %vm555_vm2 = vsmask.f32 7938  ;;  %s327_s21 = sadd.s32 %s5182_s16, %s5181_s20  ;;  %s6447_s22 = scalar_lea.vmem %s6444_s19, %s5533_s13 }
  0x15   : > { %353 = vst.msk [vmem:[#allocation2 + $0x48] sm:$0xf] %vm333_vm0, %v6277_v0  ;;  %354 = vst.msk [vmem:[#allocation2 + $0x4c] sm:$0xf] %vm333_vm0, %v6277_v0  ;;  %vm390_vm3 = vsmask.f32 256 }
  0x16   : > { %356 = vst.msk [vmem:[#allocation2 + $0x54] sm:$0xf] %vm333_vm0, %v6277_v0  ;;  %357 = vst.msk [vmem:[#allocation2 + $0x58] sm:$0xf] %vm333_vm0, %v6277_v0  ;;  %vm391_vm4 = vsmask.f32 4368 }
  0x17   : > { %359 = vst.msk [vmem:[#allocation2 + $0x60] sm:$0xf] %vm333_vm0, %v6277_v0  ;;  %360 = vst.msk [vmem:[#allocation2 + $0x64] sm:$0xf] %vm333_vm0, %v6277_v0  ;;  %s5183_s23 = sshll.u32 %s327_s21, 3  ;;  %p5188_p7 = scmp.lt.s32.totalorder %s5187_s24, 0 }
  0x18   : > { %362 = vst.msk [vmem:[#allocation2 + $0x6c] sm:$0xf] %vm333_vm0, %v6277_v0  ;;  %363 = vst.msk [vmem:[#allocation2 + $0x70] sm:$0xf] %vm333_vm0, %v6277_v0  ;;  %v374_v1 = vld [vmem:[%s6447_s22] sm:$0xf]  ;;  %s6455_s27 = scalar_lea.vmem %s8423_s8, %s5183_s23 }
  0x19   : > { %365 = vst.msk [vmem:[#allocation2 + $0x78] sm:$0xf] %vm333_vm0, %v6277_v0  ;;  %366 = vst.msk [vmem:[#allocation2 + $0x7c] sm:$0xf] %vm333_vm0, %v6277_v0  ;;  %v375_v2 = vld [vmem:[%s6447_s22 + $0x4] sm:$0xf] }
  0x1a   : > { %368 = vst.msk [vmem:[#allocation2 + $0x84] sm:$0xf] %vm333_vm0, %v6277_v0  ;;  %369 = vst.msk [vmem:[#allocation2 + $0x88] sm:$0xf] %vm333_vm0, %v6277_v0  ;;  %v394_v3 = vshrl.u32 %v374_v1, 16  ;;  %v397_v4 = vshll.u32 %v374_v1, 16 }
  0x1b   : > { %343 = vst.msk [vmem:[#allocation2 + $0x20] sm:$0x1] %vm336_vm1, %v6277_v0  ;;  %337 = vst.msk [vmem:[#allocation2 + $0x8] sm:$0x1] %vm336_vm1, %v6277_v0  ;;  %v402_v6 = vshrl.u32 %v375_v2, 16  ;;  %v405_v7 = vshll.u32 %v375_v2, 16 }
  0x1c   : > { %340 = vst.msk [vmem:[#allocation2 + $0x14] sm:$0x1] %vm336_vm1, %v6277_v0  ;;  %346 = vst.msk [vmem:[#allocation2 + $0x2c] sm:$0x1] %vm336_vm1, %v6277_v0  ;;  %v557_v8 = vld [vmem:[#allocation2 + $0x18] sm:$0xf] }
  0x1d   : > { %349 = vst.msk [vmem:[#allocation2 + $0x38] sm:$0x1] %vm336_vm1, %v6277_v0  ;;  %352 = vst.msk [vmem:[#allocation2 + $0x44] sm:$0x1] %vm336_vm1, %v6277_v0  ;;  %v376_v10 = vld [vmem:[%s6447_s22 + $0x8] sm:$0xf] }
  0x1e   : > { %355 = vst.msk [vmem:[#allocation2 + $0x50] sm:$0x1] %vm336_vm1, %v6277_v0  ;;  %358 = vst.msk [vmem:[#allocation2 + $0x5c] sm:$0x1] %vm336_vm1, %v6277_v0  ;;  %v396_v11 = vrot.slane %v394_v3, 7  ;;  %v404_v13 = vrot.slane %v402_v6, 7 }
  0x1f   : > { %361 = vst.msk [vmem:[#allocation2 + $0x68] sm:$0x1] %vm336_vm1, %v6277_v0  ;;  %364 = vst.msk [vmem:[#allocation2 + $0x74] sm:$0x1] %vm336_vm1, %v6277_v0  ;;  %v411_v14 = vshrl.u32 %v376_v10, 16  ;;  %v414_v17 = vshll.u32 %v376_v10, 16 }
  0x20   : > { %367 = vst.msk [vmem:[#allocation2 + $0x80] sm:$0x1] %vm336_vm1, %v6277_v0  ;;  %370 = vst.msk [vmem:[#allocation2 + $0x8c] sm:$0x1] %vm336_vm1, %v6277_v0  ;;  %v377_v15 = vld [vmem:[%s6447_s22 + $0xc] sm:$0xf]  ;;  %v399_v21 = vor.u32 %v397_v4, %v396_v11  ;;  %v407_v23 = vor.u32 %v405_v7, %v404_v13 }
  0x21   : > { %vm6459_vm5 = vmand %vm333_vm0, %vm555_vm2  ;;  %v419_v18 = vshrl.u32 %v377_v15, 16  ;;  %v422_v19 = vshll.u32 %v377_v15, 16  ;;  %v378_v20 = vld [vmem:[%s6447_s22 + $0x10] sm:$0xf]  ;;  %v400_v22 = vrot.slane %v396_v11, 4  ;;  %v409_v24 = vrot.slane %v404_v13, 4 }
  0x22   : > { %v563_v9 = vld [vmem:[#allocation2 + $0x20] sm:$0x1]  ;;  %vm6466_vm6 = vmor %vm390_vm3, %vm391_vm4  ;;  %v379_v25 = vld [vmem:[%s6447_s22 + $0x14] sm:$0xf]  ;;  %v413_v26 = vrot.slane %v411_v14, 7  ;;  %v428_v29 = vshrl.u32 %v378_v20, 16  ;;  %v558_v31 = vsel %vm6459_vm5, %v399_v21, %v557_v8 }
  0x23   : > { %v8433_v12 = vsel %vm6466_vm6, 4294967295, %v8432_v12  ;;  %vm6473_vm7 = vmand %vm336_vm1, %vm390_vm3  ;;  %v566_v27 = vld [vmem:[#allocation2 + $0x24] sm:$0xf]  ;;  %v421_v28 = vrot.slane %v419_v18, 7  ;;  %v431_v30 = vshll.u32 %v378_v20, 16  ;;  %v408_v32 = vsel %vm6466_vm6, %v400_v22, %v407_v23  ;;  %s5534_s28 = sshll.u32 (!%p5188_p7), %s5187_s24, 3 }
  0x24   : > { %8434 = vst [vmem:[#allocation4_spill] sm:$0xff] %v8433_v12  ;;  %v564_v33 = vsel %vm6473_vm7, %v409_v24, %v563_v9  ;;  %v570_v34 = vld [vmem:[#allocation2 + $0x2c] sm:$0x1]  ;;  %v436_v35 = vshrl.u32 %v379_v25, 16  ;;  %v380_v36 = vld [vmem:[%s6447_s22 + $0x18] sm:$0xf]  ;;  %v416_v37 = vor.u32 %v414_v17, %v413_v26  ;;  %s622_s13 = scalar_lea.vmem (!%p5188_p7), %s6444_s19, %s5534_s28 }
  0x25   : > { %559 = vst [vmem:[#allocation2 + $0x18] sm:$0xf] %v558_v31  ;;  %560 = vst.msk [vmem:[#allocation2 + $0x1c] sm:$0xf] %vm333_vm0, %v408_v32  ;;  %v417_v38 = vrot.slane %v413_v26, 4  ;;  %v424_v39 = vor.u32 %v422_v19, %v421_v28  ;;  %v426_v40 = vrot.slane %v421_v28, 4 }
  0x26   : > { %565 = vst [vmem:[#allocation2 + $0x20] sm:$0x1] %v564_v33  ;;  %v381_v41 = vld [vmem:[%s6447_s22 + $0x1c] sm:$0xf]  ;;  %v430_v42 = vrot.slane %v428_v29, 7  ;;  %v438_v43 = vrot.slane %v436_v35, 7  ;;  %v567_v47 = vsel %vm6459_vm5, %v416_v37, %v566_v27 }
  0x27   : > { %v439_v44 = vshll.u32 %v379_v25, 16  ;;  %v445_v45 = vshrl.u32 %v380_v36, 16  ;;  %v382_v46 = vld [vmem:[%s6447_s22 + $0x20] sm:$0xf]  ;;  %v425_v48 = vsel %vm6466_vm6, %v417_v38, %v424_v39  ;;  %v571_v49 = vsel %vm6473_vm7, %v426_v40, %v570_v34  ;;  %v573_v50 = vld [vmem:[#allocation2 + $0x30] sm:$0xf] }
  0x28   : > { %v577_v51 = vld [vmem:[#allocation2 + $0x38] sm:$0x1]  ;;  %v448_v52 = vshll.u32 %v380_v36, 16  ;;  %568 = vst [vmem:[#allocation2 + $0x24] sm:$0xf] %v567_v47  ;;  %v433_v53 = vor.u32 %v431_v30, %v430_v42  ;;  %v434_v54 = vrot.slane %v430_v42, 4 }
  0x29   : > { %569 = vst.msk [vmem:[#allocation2 + $0x28] sm:$0xf] %vm333_vm0, %v425_v48  ;;  %572 = vst [vmem:[#allocation2 + $0x2c] sm:$0x1] %v571_v49  ;;  %v441_v55 = vor.u32 %v439_v44, %v438_v43  ;;  %v443_v56 = vrot.slane %v438_v43, 4  ;;  %v447_v58 = vrot.slane %v445_v45, 7 }
  0x2a   : > { %v383_v57 = vld [vmem:[%s6447_s22 + $0x24] sm:$0xf]  ;;  %v453_v59 = vshrl.u32 %v381_v41, 16  ;;  %v456_v60 = vshll.u32 %v381_v41, 16  ;;  %v462_v61 = vshrl.u32 %v382_v46, 16  ;;  %v574_v63 = vsel %vm6459_vm5, %v433_v53, %v573_v50 }
  0x2b   : > { %v384_v62 = vld [vmem:[%s6447_s22 + $0x28] sm:$0xf]  ;;  %v442_v1 = vsel %vm6466_vm6, %v434_v54, %v441_v55  ;;  %v578_v2 = vsel %vm6473_vm7, %v443_v56, %v577_v51  ;;  %v580_v3 = vld [vmem:[#allocation2 + $0x3c] sm:$0xf]  ;;  %v584_v4 = vld [vmem:[#allocation2 + $0x44] sm:$0x1]  ;;  %v450_v7 = vor.u32 %v448_v52, %v447_v58 }
  0x2c   : > { %v465_v6 = vshll.u32 %v382_v46, 16  ;;  %575 = vst [vmem:[#allocation2 + $0x30] sm:$0xf] %v574_v63  ;;  %576 = vst.msk [vmem:[#allocation2 + $0x34] sm:$0xf] %vm333_vm0, %v442_v1  ;;  %v451_v8 = vrot.slane %v447_v58, 4 }
  0x2d   : > { %579 = vst [vmem:[#allocation2 + $0x38] sm:$0x1] %v578_v2  ;;  %v455_v9 = vrot.slane %v453_v59, 7  ;;  %v464_v10 = vrot.slane %v462_v61, 7  ;;  %v385_v11 = vld [vmem:[%s6447_s22 + $0x2c] sm:$0xf]  ;;  %v581_v19 = vsel %vm6459_vm5, %v450_v7, %v580_v3 }
  0x2e   : > { %v587_v13 = vld [vmem:[#allocation2 + $0x48] sm:$0xf]  ;;  %v470_v14 = vshrl.u32 %v383_v57, 16  ;;  %v473_v15 = vshll.u32 %v383_v57, 16  ;;  %v479_v17 = vshrl.u32 %v384_v62, 16  ;;  %v482_v18 = vshll.u32 %v384_v62, 16 }
  0x2f   : > { %v458_v20 = vor.u32 %v456_v60, %v455_v9  ;;  %v460_v21 = vrot.slane %v455_v9, 4  ;;  %v467_v22 = vor.u32 %v465_v6, %v464_v10  ;;  %v386_v23 = vld [vmem:[%s6447_s22 + $0x30] sm:$0xf]  ;;  %582 = vst [vmem:[#allocation2 + $0x3c] sm:$0xf] %v581_v19  ;;  %v468_v24 = vrot.slane %v464_v10, 4 }
  0x30   : > { %v472_v25 = vrot.slane %v470_v14, 7  ;;  %v481_v26 = vrot.slane %v479_v17, 7  ;;  %v487_v27 = vshrl.u32 %v385_v11, 16  ;;  %v387_v28 = vld [vmem:[%s6447_s22 + $0x34] sm:$0xf]  ;;  %v490_v34 = vshll.u32 %v385_v11, 16 }
  0x31   : > { %v459_v29 = vsel %vm6466_vm6, %v451_v8, %v458_v20  ;;  %v585_v30 = vsel %vm6473_vm7, %v460_v21, %v584_v4  ;;  %v588_v31 = vsel %vm6459_vm5, %v467_v22, %v587_v13  ;;  %v591_v32 = vld [vmem:[#allocation2 + $0x50] sm:$0x1]  ;;  %v594_v33 = vld [vmem:[#allocation2 + $0x54] sm:$0xf]  ;;  %v388_v39 = vld [vmem:[%s6447_s22 + $0x38] sm:$0xf] }
  0x32   : > { %583 = vst.msk [vmem:[#allocation2 + $0x40] sm:$0xf] %vm333_vm0, %v459_v29  ;;  %586 = vst [vmem:[#allocation2 + $0x44] sm:$0x1] %v585_v30  ;;  %v475_v35 = vor.u32 %v473_v15, %v472_v25  ;;  %v477_v36 = vrot.slane %v472_v25, 4  ;;  %v484_v37 = vor.u32 %v482_v18, %v481_v26  ;;  %v485_v38 = vrot.slane %v481_v26, 4 }
  0x33   : > { %589 = vst [vmem:[#allocation2 + $0x48] sm:$0xf] %v588_v31  ;;  %v489_v40 = vrot.slane %v487_v27, 7  ;;  %v496_v41 = vshrl.u32 %v386_v23, 16  ;;  %v499_v42 = vshll.u32 %v386_v23, 16  ;;  %v504_v43 = vshrl.u32 %v387_v28, 16 }
  0x34   : > { %v389_v44 = vld [vmem:[%s6447_s22 + $0x3c] sm:$0xf]  ;;  %v476_v45 = vsel %vm6466_vm6, %v468_v24, %v475_v35  ;;  %v592_v46 = vsel %vm6473_vm7, %v477_v36, %v591_v32  ;;  %v595_v47 = vsel %vm6459_vm5, %v484_v37, %v594_v33  ;;  %v507_v49 = vshll.u32 %v387_v28, 16  ;;  %v601_v54 = vld [vmem:[#allocation2 + $0x60] sm:$0xf] }
  0x35   : > { %v598_v48 = vld [vmem:[#allocation2 + $0x5c] sm:$0x1]  ;;  %590 = vst.msk [vmem:[#allocation2 + $0x4c] sm:$0xf] %vm333_vm0, %v476_v45  ;;  %593 = vst [vmem:[#allocation2 + $0x50] sm:$0x1] %v592_v46  ;;  %v492_v50 = vor.u32 %v490_v34, %v489_v40 }
  0x36   : > { %596 = vst [vmem:[#allocation2 + $0x54] sm:$0xf] %v595_v47  ;;  %v494_v51 = vrot.slane %v489_v40, 4  ;;  %v498_v52 = vrot.slane %v496_v41, 7  ;;  %v506_v53 = vrot.slane %v504_v43, 7  ;;  %v513_v55 = vshrl.u32 %v388_v39, 16 }
  0x37   : > { %v516_v56 = vshll.u32 %v388_v39, 16  ;;  %v521_v57 = vshrl.u32 %v389_v44, 16  ;;  %v524_v58 = vshll.u32 %v389_v44, 16  ;;  %v493_v59 = vsel %vm6466_vm6, %v485_v38, %v492_v50  ;;  %v605_v63 = vld [vmem:[#allocation2 + $0x68] sm:$0x1] }
  0x38   : > { %v599_v60 = vsel %vm6473_vm7, %v494_v51, %v598_v48  ;;  %v501_v61 = vor.u32 %v499_v42, %v498_v52  ;;  %v502_v62 = vrot.slane %v498_v52, 4  ;;  %597 = vst.msk [vmem:[#allocation2 + $0x58] sm:$0xf] %vm333_vm0, %v493_v59  ;;  %v509_v1 = vor.u32 %v507_v49, %v506_v53  ;;  %v608_v7 = vld [vmem:[#allocation2 + $0x6c] sm:$0xf] }
  0x39   : > { %600 = vst [vmem:[#allocation2 + $0x5c] sm:$0x1] %v599_v60  ;;  %v511_v2 = vrot.slane %v506_v53, 4  ;;  %v515_v3 = vrot.slane %v513_v55, 7  ;;  %v523_v4 = vrot.slane %v521_v57, 7 }
  0x3a   : > { %v602_v6 = vsel %vm6459_vm5, %v501_v61, %v601_v54  ;;  %v510_v8 = vsel %vm6466_vm6, %v502_v62, %v509_v1  ;;  %v612_v13 = vld [vmem:[#allocation2 + $0x74] sm:$0x1] }
  0x3b   : > { %603 = vst [vmem:[#allocation2 + $0x60] sm:$0xf] %v602_v6  ;;  %v606_v9 = vsel %vm6473_vm7, %v511_v2, %v605_v63  ;;  %v518_v10 = vor.u32 %v516_v56, %v515_v3  ;;  %v519_v11 = vrot.slane %v515_v3, 4  ;;  %604 = vst.msk [vmem:[#allocation2 + $0x64] sm:$0xf] %vm333_vm0, %v510_v8  ;;  %v526_v14 = vor.u32 %v524_v58, %v523_v4  ;;  %619 = sbr.rel (%p5188_p7) target bundleno = 74 (0x4a), region = 56 }
  0x3c   : > { %607 = vst [vmem:[#allocation2 + $0x68] sm:$0x1] %v606_v9  ;;  %v528_v15 = vrot.slane %v523_v4, 4 }
  0x3d   : > { %v609_v17 = vsel %vm6459_vm5, %v518_v10, %v608_v7  ;;  %v527_v18 = vsel %vm6466_vm6, %v519_v11, %v526_v14 }
  0x3e   : > { %610 = vst [vmem:[#allocation2 + $0x6c] sm:$0xf] %v609_v17  ;;  %v613_v19 = vsel %vm6473_vm7, %v528_v15, %v612_v13  ;;  %611 = vst.msk [vmem:[#allocation2 + $0x70] sm:$0xf] %vm333_vm0, %v527_v18 }
  0x3f   : > { %614 = vst [vmem:[#allocation2 + $0x74] sm:$0x1] %v613_v19 }
  0x40   : > { %v623_v20 = vld [vmem:[%s622_s13] sm:$0xf]  ;;  %v624_v21 = vld [vmem:[%s622_s13 + $0x4] sm:$0xf]  ;;  %v649_v29 = vld [vmem:[#allocation2 + $0x8] sm:$0x1] }
  0x41   : > { %v626_v22 = vshrl.u32 %v623_v20, 16  ;;  %v629_v23 = vshll.u32 %v623_v20, 16  ;;  %v634_v24 = vshrl.u32 %v624_v21, 16  ;;  %v637_v25 = vshll.u32 %v624_v21, 16  ;;  %v645_v28 = vld [vmem:[#allocation2] sm:$0xf] }
  0x43   : > { %v628_v26 = vrot.slane %v626_v22, 7  ;;  %v636_v27 = vrot.slane %v634_v24, 7 }
  0x45   : > { %v631_v30 = vor.u32 %v629_v23, %v628_v26  ;;  %v632_v31 = vrot.slane %v628_v26, 4  ;;  %v639_v32 = vor.u32 %v637_v25, %v636_v27  ;;  %v641_v33 = vrot.slane %v636_v27, 4 }
  0x47   : > { %v646_v34 = vsel %vm6459_vm5, %v631_v30, %v645_v28  ;;  %v640_v35 = vsel %vm6466_vm6, %v632_v31, %v639_v32  ;;  %v650_v36 = vsel %vm6473_vm7, %v641_v33, %v649_v29 }
  0x48   : > { %647 = vst [vmem:[#allocation2] sm:$0xf] %v646_v34  ;;  %648 = vst.msk [vmem:[#allocation2 + $0x4] sm:$0xf] %vm333_vm0, %v640_v35 }
  0x49   : > { %651 = vst [vmem:[#allocation2 + $0x8] sm:$0x1] %v650_v36 }
  0x4a PF: > { %s652_s14 = sadd.s32 4294967295, %s6361_s12 }
  0x4b   : > { %p5191_p8 = scmp.lt.s32.totalorder %s652_s14, 0 }
  0x4d   : > { %656 = sbr.rel (%p5191_p8) target bundleno = 92 (0x5c), region = 60 }
  0x52   : > { %v5194_v37 = vld [vmem:[%s6447_s22 - $0x8] sm:$0xf]  ;;  %v5195_v38 = vld [vmem:[%s6447_s22 - $0x4] sm:$0xf]  ;;  %v683_v45 = vld [vmem:[#allocation2 + $0xc] sm:$0xf] }
  0x53   : > { %v663_v39 = vshrl.u32 %v5194_v37, 16  ;;  %v666_v40 = vshll.u32 %v5194_v37, 16  ;;  %v671_v41 = vshrl.u32 %v5195_v38, 16  ;;  %v674_v42 = vshll.u32 %v5195_v38, 16  ;;  %v687_v46 = vld [vmem:[#allocation2 + $0x14] sm:$0x1] }
  0x55   : > { %v665_v43 = vrot.slane %v663_v39, 7  ;;  %v673_v44 = vrot.slane %v671_v41, 7 }
  0x57   : > { %v668_v47 = vor.u32 %v666_v40, %v665_v43  ;;  %v669_v48 = vrot.slane %v665_v43, 4  ;;  %v676_v49 = vor.u32 %v674_v42, %v673_v44  ;;  %v678_v50 = vrot.slane %v673_v44, 4 }
  0x59   : > { %v684_v51 = vsel %vm6459_vm5, %v668_v47, %v683_v45  ;;  %v677_v52 = vsel %vm6466_vm6, %v669_v48, %v676_v49  ;;  %v688_v53 = vsel %vm6473_vm7, %v678_v50, %v687_v46 }
  0x5a   : > { %685 = vst [vmem:[#allocation2 + $0xc] sm:$0xf] %v684_v51  ;;  %686 = vst.msk [vmem:[#allocation2 + $0x10] sm:$0xf] %vm333_vm0, %v677_v52 }
  0x5b   : > { %689 = vst [vmem:[#allocation2 + $0x14] sm:$0x1] %v688_v53 }
  0x5c PF: > { %s690_s15 = sadd.s32 8, %s6361_s12 }
  0x5d   : > { %p5196_p9 = scmp.ge.s32.totalorder %s690_s15, 16 }
  0x5f   : > { %694 = sbr.rel (%p5196_p9) target bundleno = 110 (0x6e), region = 64 }
  0x64   : > { %v5199_v54 = vld [vmem:[%s6447_s22 + $0x40] sm:$0xf]  ;;  %v5200_v55 = vld [vmem:[%s6447_s22 + $0x44] sm:$0xf]  ;;  %v721_v62 = vld [vmem:[#allocation2 + $0x78] sm:$0xf] }
  0x65   : > { %v701_v56 = vshrl.u32 %v5199_v54, 16  ;;  %v704_v57 = vshll.u32 %v5199_v54, 16  ;;  %v709_v58 = vshrl.u32 %v5200_v55, 16  ;;  %v712_v59 = vshll.u32 %v5200_v55, 16  ;;  %v725_v63 = vld [vmem:[#allocation2 + $0x80] sm:$0x1] }
  0x67   : > { %v703_v60 = vrot.slane %v701_v56, 7  ;;  %v711_v61 = vrot.slane %v709_v58, 7 }
  0x69   : > { %v706_v1 = vor.u32 %v704_v57, %v703_v60  ;;  %v707_v2 = vrot.slane %v703_v60, 4  ;;  %v714_v3 = vor.u32 %v712_v59, %v711_v61  ;;  %v716_v4 = vrot.slane %v711_v61, 4 }
  0x6b   : > { %v722_v6 = vsel %vm6459_vm5, %v706_v1, %v721_v62  ;;  %v715_v7 = vsel %vm6466_vm6, %v707_v2, %v714_v3  ;;  %v726_v8 = vsel %vm6473_vm7, %v716_v4, %v725_v63 }
  0x6c   : > { %723 = vst [vmem:[#allocation2 + $0x78] sm:$0xf] %v722_v6  ;;  %724 = vst.msk [vmem:[#allocation2 + $0x7c] sm:$0xf] %vm333_vm0, %v715_v7 }
  0x6d   : > { %727 = vst [vmem:[#allocation2 + $0x80] sm:$0x1] %v726_v8 }
  0x6e PF: > { %s728_s16 = sadd.s32 9, %s6361_s12 }
  0x6f   : > { %p5201_p10 = scmp.ge.s32.totalorder %s728_s16, 16 }
  0x71   : > { %732 = sbr.rel (%p5201_p10) target bundleno = 128 (0x80), region = 68 }
  0x76   : > { %v5204_v9 = vld [vmem:[%s6447_s22 + $0x48] sm:$0xf]  ;;  %v5205_v10 = vld [vmem:[%s6447_s22 + $0x4c] sm:$0xf]  ;;  %v759_v19 = vld [vmem:[#allocation2 + $0x84] sm:$0xf] }
  0x77   : > { %v739_v11 = vshrl.u32 %v5204_v9, 16  ;;  %v742_v13 = vshll.u32 %v5204_v9, 16  ;;  %v747_v14 = vshrl.u32 %v5205_v10, 16  ;;  %v750_v15 = vshll.u32 %v5205_v10, 16  ;;  %v763_v20 = vld [vmem:[#allocation2 + $0x8c] sm:$0x1] }
  0x79   : > { %v741_v17 = vrot.slane %v739_v11, 7  ;;  %v749_v18 = vrot.slane %v747_v14, 7 }
  0x7b   : > { %v744_v21 = vor.u32 %v742_v13, %v741_v17  ;;  %v745_v22 = vrot.slane %v741_v17, 4  ;;  %v752_v23 = vor.u32 %v750_v15, %v749_v18  ;;  %v754_v24 = vrot.slane %v749_v18, 4 }
  0x7d   : > { %v760_v25 = vsel %vm6459_vm5, %v744_v21, %v759_v19  ;;  %v753_v26 = vsel %vm6466_vm6, %v745_v22, %v752_v23  ;;  %v764_v27 = vsel %vm6473_vm7, %v754_v24, %v763_v20 }
  0x7e   : > { %761 = vst [vmem:[#allocation2 + $0x84] sm:$0xf] %v760_v25  ;;  %762 = vst.msk [vmem:[#allocation2 + $0x88] sm:$0xf] %vm333_vm0, %v753_v26 }
  0x7f   : > { %765 = vst [vmem:[#allocation2 + $0x8c] sm:$0x1] %v764_v27 }
  0x80 PF: > { %v5206_v28 = vld [vmem:[%s8416_s1 + $0x6] sm:$0x3]  ;;  %vm874_vm8 = vcmask 1041408   ;;  %v790_v5 = vld [vmem:[%s8416_s1] sm:$0x3]  ;;  %v6215_v29 = vld [vmem:[#allocation2 + $0xc] sm:$0xff]  }
  0x81   : > { %6152 = vmatprep.subr.msk.bf16.mxu0 %vm874_vm8, %v5206_v28  ;;  %6153 = vmatprep.subr.msk.bf16.mxu1 %vm874_vm8, %v790_v5  ;;  %v876_v16 = vsel %vm874_vm8, %v5206_v28, 0  ;;  %v1000_v30 = vsel %vm874_vm8, %v790_v5, 0  ;;  %vm843_vm9 = vcmask 31744   ;;  %v6216_v31 = vld [vmem:[#allocation2] sm:$0xff]   ;;  %v6600_v32 = vld [vmem:[#allocation2 + $0x18] sm:$0xff]   ;;  %v6617_v36 = vld [vmem:[#allocation2 + $0x30] sm:$0xff]  }
  0x82   : > { %5757 = vmatpush3.bf16.msra.mxu0 %v876_v16  ;;  %5779 = vmatpush3.bf16.msra.mxu1 %v1000_v30  ;;  %v5238_v33 = vld [vmem:[%s8416_s1 + $0xc] sm:$0x3]  ;;  %v6610_v35 = vld [vmem:[#allocation2 + $0x24] sm:$0xff]   ;;  %v6619_v37 = vld [vmem:[#allocation2 + $0x3c] sm:$0xff]   ;;  %vm1297_vm10 = vsmask.f32 3328 }
  0x83   : > { %5758 = vmatprep.mubr.msk.bf16.mxu0 %vm843_vm9, %v6215_v29  ;;  %5780 = vmatprep.mubr.msk.bf16.mxu1 %vm843_vm9, %v6216_v31  ;;  %v1126_v34 = vsel %vm874_vm8, %v5238_v33, 0  ;;  %v5250_v38 = vld [vmem:[%s8416_s1 + $0x2] sm:$0x3]  ;;  %v6627_v39 = vld [vmem:[%s8416_s1 + $0x8] sm:$0x3]  ;;  %v6649_v50 = vld [vmem:[#allocation2 + $0x54] sm:$0xff]  }
  0x84   : > { %6154 = vmatprep.subr.msk.bf16.mxu0 %vm874_vm8, %v5238_v33  ;;  %v1603_v40 = vsel %vm874_vm8, %v5250_v38, 0  ;;  %v1261_v41 = vld [vmem:[#allocation2] sm:$0xf]  ;;  %v6634_v42 = vld [vmem:[#allocation2 + $0x4] sm:$0xf]  ;;  %6155 = vmatprep.subr.msk.bf16.mxu1 %vm874_vm8, %v5250_v38  ;;  %v6647_v49 = vld [vmem:[#allocation2 + $0x48] sm:$0xff]  }
  0x85   : > { %5759 = vmatmul.mubr.msk.bf16.vlgmr.msra.gmra.mxu0 %vm843_vm9, %v6600_v32  ;;  %5781 = vmatmul.mubr.msk.bf16.vlgmr.msra.gmra.mxu1 %vm843_vm9, %v6215_v29  ;;  %v6640_v43 = vld [vmem:[#allocation2 + $0x8] sm:$0x1]  ;;  %v1301_v44 = vshrl.u32 %v1261_v41, 16  ;;  %v1304_v45 = vshll.u32 %v1261_v41, 16  ;;  %v1310_v46 = vshll.u32 %v6634_v42, 16  ;;  %v1314_v47 = vshrl.u32 %v6634_v42, 16 }
  0x86   : > { %5784 = vmatprep.mubr.msk.bf16.mxu1 %vm843_vm9, %v6600_v32  ;;  %5801 = vmatpush3.bf16.msra.mxu0 %v1126_v34  ;;  %v1264_v48 = vld [vmem:[#allocation2 + $0xc] sm:$0xf]  ;;  %v1320_v51 = vshll.u32 %v6640_v43, 16  ;;  %v6652_v52 = vld [vmem:[#allocation2 + $0x10] sm:$0xf]  ;;  %v8437_v11 = vmov 0 }
  0x87   : > { %5762 = vmatprep.mubr.msk.bf16.mxu0 %vm843_vm9, %v6610_v35  ;;  %6156 = vmatprep.subr.msk.bf16.mxu0 %vm874_vm8, %v6627_v39  ;;  %v1325_v53 = vshrl.u32 %v1264_v48, 16  ;;  %v1303_v54 = vrot.slane %v1301_v44, 4  ;;  %v1306_v55 = vrot.slane %v1304_v45, 5  ;;  %v1312_v56 = vrot.slane %v1310_v46, 5  ;;  %v1267_v58 = vld [vmem:[#allocation2 + $0x18] sm:$0xf] }
  0x88   : > { %5823 = vmatpush3.bf16.msra.mxu1 %v1603_v40  ;;  %v1316_v57 = vrot.slane %v1314_v47, 4  ;;  %vm1298_vm11 = vsmask.f32 7440  ;;  %v1328_v59 = vshll.u32 %v1264_v48, 16  ;;  %v1334_v60 = vshll.u32 %v6652_v52, 16  ;;  %v6681_v23 = vld [vmem:[#allocation2 + $0x60] sm:$0xff]  }
  0x89   : > { %v1307_v61 = vor.u32 %v1306_v55, %v1303_v54  ;;  %v6655_v63 = vld [vmem:[#allocation2 + $0x14] sm:$0x1]  ;;  %v1338_v1 = vshrl.u32 %v6652_v52, 16  ;;  %v6658_v2 = vld [vmem:[#allocation2 + $0x1c] sm:$0xf]  ;;  %v1322_v3 = vrot.slane %v1320_v51, 5  ;;  %vm6670_vm12 = vmor %vm1297_vm10, %vm1298_vm11 }
  0x8a   : > { %v1317_v62 = vor.u32 %v1316_v57, %v1312_v56  ;;  %v1349_v4 = vshrl.u32 %v1267_v58, 16  ;;  %v1352_v6 = vshll.u32 %v1267_v58, 16  ;;  %v1327_v9 = vrot.slane %v1325_v53, 4  ;;  %v1270_v21 = vld [vmem:[#allocation2 + $0x24] sm:$0xf]  ;;  %v6689_v5 = vld [vmem:[#allocation2 + $0x6c] sm:$0xff]  }
  0x8b   : > { %v1308_v7 = vrot.slane %v1307_v61, 4  ;;  %v1330_v10 = vrot.slane %v1328_v59, 5  ;;  %v8438_v11 = vsel %vm6670_vm12, 4294967295, %v8437_v11  ;;  %v6674_v13 = vrot.slane %v1334_v60, 5  ;;  %v6687_v27 = vld [vmem:[#allocation2 + $0x20] sm:$0x1] }
  0x8c   : > { %v1318_v8 = vrot.slane %v1317_v62, 4  ;;  %8439 = vst [vmem:[#allocation5_spill] sm:$0xff] %v8438_v11  ;;  %v1344_v14 = vshll.u32 %v6655_v63, 16  ;;  %v1358_v15 = vshll.u32 %v6658_v2, 16  ;;  %v1340_v17 = vrot.slane %v1338_v1, 4  ;;  %p5373_p11 = scmp.ne.s32.totalorder %s6361_s12, 0 }
  0x8d   : > { %5763 = vmatmul.mubr.msk.bf16.gmra.mxu0 %vm843_vm9, %v6617_v36  ;;  %5785 = vmatmul.mubr.msk.bf16.gmra.mxu1 %vm843_vm9, %v6610_v35  ;;  %v1351_v18 = vrot.slane %v1349_v4, 4  ;;  %v1354_v19 = vrot.slane %v1352_v6, 5  ;;  %v1362_v20 = vshrl.u32 %v6658_v2, 16  ;;  %v1313_v24 = vsel %vm6670_vm12, %v1308_v7, %v1312_v56  ;;  %v6691_v29 = vld [vmem:[#allocation2 + $0x28] sm:$0xf] }
  0x8e   : > { %5766 = vmatprep.mubr.msk.bf16.mxu0 %vm843_vm9, %v6619_v37  ;;  %5788 = vmatprep.mubr.msk.bf16.mxu1 %vm843_vm9, %v6617_v36  ;;  %v6679_v22 = vrot.slane %v1358_v15, 5  ;;  %v1323_v25 = vsel %vm6670_vm12, %v1318_v8, %v1322_v3  ;;  %v1331_v26 = vor.u32 %v1330_v10, %v1327_v9  ;;  %v1373_v16 = vshrl.u32 %v1270_v21, 16  ;;  %v1273_v34 = vld [vmem:[#allocation2 + $0x30] sm:$0xf]  ;;  %v6696_v38 = vld [vmem:[#allocation2 + $0x34] sm:$0xf] }
  0x8f   : > { %v1364_v28 = vrot.slane %v1362_v20, 4  ;;  %v1341_v30 = vor.u32 %v1340_v17, %v6674_v13  ;;  %v6694_v31 = vrot.slane %v1344_v14, 5  ;;  %v1355_v33 = vor.u32 %v1354_v19, %v1351_v18  ;;  %v6700_v45 = vld [vmem:[#allocation2 + $0x2c] sm:$0x1]  ;;  %v6710_v54 = vld [vmem:[#allocation2 + $0x38] sm:$0x1] }
  0x90   : > { %v5251_v40 = vcombine.low %v1313_v24, %v1323_v25  ;;  %v1368_v44 = vshll.u32 %v6687_v27, 16  ;;  %v1376_v46 = vshll.u32 %v1270_v21, 16  ;;  %v6706_v47 = vrot.slane %v1331_v26, 4  ;;  %v1276_v55 = vld [vmem:[#allocation2 + $0x3c] sm:$0xf] }
  0x91   : > { %v1365_v41 = vor.u32 %v1364_v28, %v6679_v22  ;;  %v1375_v48 = vrot.slane %v1373_v16, 4  ;;  %v1382_v51 = vshll.u32 %v6691_v29, 16  ;;  %v1386_v53 = vshrl.u32 %v6691_v29, 16  ;;  %v6719_v8 = vld [vmem:[#allocation2 + $0x40] sm:$0xf]  ;;  %v6721_v9 = vld [vmem:[#allocation2 + $0x78] sm:$0xff]  }
  0x92   : > { %v1378_v56 = vrot.slane %v1376_v46, 5  ;;  %v1397_v57 = vshrl.u32 %v1273_v34, 16  ;;  %v1400_v58 = vshll.u32 %v1273_v34, 16  ;;  %v1406_v59 = vshll.u32 %v6696_v38, 16  ;;  %v1279_v34 = vld [vmem:[#allocation2 + $0x48] sm:$0xf] }
  0x93   : > { %v1342_v60 = vrot.slane %v1341_v30, 4  ;;  %v1356_v61 = vrot.slane %v1355_v33, 4  ;;  %v6717_v62 = vrot.slane %v1382_v51, 5  ;;  %v1388_v1 = vrot.slane %v1386_v53, 4 }
  0x94   : > { %v1366_v3 = vrot.slane %v1365_v41, 4  ;;  %v1370_v4 = vrot.slane %v1368_v44, 5  ;;  %v1399_v6 = vrot.slane %v1397_v57, 4  ;;  %v1402_v7 = vrot.slane %v1400_v58, 5  ;;  %v6742_v41 = vld [vmem:[#allocation2 + $0x4c] sm:$0xf] }
  0x95   : > { %5767 = vmatmul.mubr.msk.bf16.gmra.mxu0 %vm843_vm9, %v6647_v49  ;;  %5789 = vmatmul.mubr.msk.bf16.gmra.mxu1 %vm843_vm9, %v6619_v37  ;;  %v1379_v10 = vor.u32 %v1378_v56, %v1375_v48  ;;  %v1392_v14 = vshll.u32 %v6700_v45, 16  ;;  %v6724_v15 = vrot.slane %v1406_v59, 5  ;;  %v1410_v17 = vshrl.u32 %v6696_v38, 16 }
  0x96   : > { %5770 = vmatprep.mubr.msk.bf16.mxu0 %vm843_vm9, %v6649_v50  ;;  %5792 = vmatprep.mubr.msk.bf16.mxu1 %vm843_vm9, %v6647_v49  ;;  %v1389_v18 = vor.u32 %v1388_v1, %v6717_v62  ;;  %v1403_v19 = vor.u32 %v1402_v7, %v1399_v6  ;;  %v1416_v20 = vshll.u32 %v6710_v54, 16  ;;  %v1421_v21 = vshrl.u32 %v1276_v55, 16  ;;  %v6770_v7 = vld [vmem:[#allocation2 + $0x50] sm:$0x1] }
  0x97   : > { %v1412_v24 = vrot.slane %v1410_v17, 4  ;;  %v1424_v25 = vshll.u32 %v1276_v55, 16  ;;  %v1430_v26 = vshll.u32 %v6719_v8, 16  ;;  %v1337_v28 = vsel %vm6670_vm12, %v6706_v47, %v6674_v13  ;;  %v1282_v17 = vld [vmem:[#allocation2 + $0x54] sm:$0xf] }
  0x98   : > { %v1347_v16 = vsel %vm6670_vm12, %v1342_v60, %v6694_v31  ;;  %v1361_v30 = vsel %vm6670_vm12, %v1356_v61, %v6679_v22  ;;  %v1371_v33 = vsel %vm6670_vm12, %v1366_v3, %v1370_v4  ;;  %v1380_v13 = vrot.slane %v1379_v10, 4  ;;  %v6753_v22 = vld [vmem:[%s8416_s1 + $0xe] sm:$0x3]  ;;  %v6762_v60 = vld [vmem:[#allocation2 + $0x44] sm:$0x1] }
  0x99   : > { %v1394_v44 = vrot.slane %v1392_v14, 5  ;;  %v1413_v31 = vor.u32 %v1412_v24, %v6724_v15  ;;  %v1434_v46 = vshrl.u32 %v6719_v8, 16  ;;  %v1390_v47 = vrot.slane %v1389_v18, 4  ;;  %6157 = vmatprep.subr.msk.bf16.mxu1 %vm874_vm8, %v6753_v22 }
  0x9a   : > { %v1404_v48 = vrot.slane %v1403_v19, 4  ;;  %v1418_v51 = vrot.slane %v1416_v20, 5  ;;  %v1423_v53 = vrot.slane %v1421_v21, 4  ;;  %v1426_v55 = vrot.slane %v1424_v25, 5 }
  0x9b   : > { %v6758_v56 = vrot.slane %v1430_v26, 5  ;;  %v1445_v57 = vshrl.u32 %v1279_v34, 16  ;;  %v1448_v58 = vshll.u32 %v1279_v34, 16  ;;  %v1414_v59 = vrot.slane %v1413_v31, 4 }
  0x9c   : > { %v1436_v61 = vrot.slane %v1434_v46, 4  ;;  %v1771_v1 = vsel %vm874_vm8, %v6627_v39, 0  ;;  %v6768_v3 = vcombine.low %v1337_v28, %v1347_v16  ;;  %v6774_v18 = vcombine.low %v1361_v30, %v1371_v33  ;;  %v6780_v39 = vld [vmem:[#allocation2 + $0x58] sm:$0xf]  ;;  %v1285_v16 = vld [vmem:[#allocation2 + $0x60] sm:$0xf] }
  0x9d   : > { %5771 = vmatmul.mubr.msk.bf16.gmra.mxu0 %vm843_vm9, %v6681_v23  ;;  %5793 = vmatmul.mubr.msk.bf16.gmra.mxu1 %vm843_vm9, %v6649_v50  ;;  %v1447_v4 = vrot.slane %v1445_v57, 4  ;;  %v1450_v6 = vrot.slane %v1448_v58, 5  ;;  %v1385_v19 = vsel %vm6670_vm12, %v1380_v13, %v6717_v62  ;;  %v1427_v20 = vor.u32 %v1426_v55, %v1423_v53  ;;  %v6793_v62 = vld [vmem:[%s8416_s1 + $0x4] sm:$0x3]  ;;  %v1288_v58 = vld [vmem:[#allocation2 + $0x6c] sm:$0xf] }
  0x9e   : > { %5774 = vmatprep.mubr.msk.bf16.mxu0 %vm843_vm9, %v6689_v5  ;;  %5796 = vmatprep.mubr.msk.bf16.mxu1 %vm843_vm9, %v6681_v23  ;;  %v1440_v21 = vshll.u32 %v6762_v60, 16  ;;  %v1395_v24 = vsel %vm6670_vm12, %v1390_v47, %v1394_v44  ;;  %v1409_v25 = vsel %vm6670_vm12, %v1404_v48, %v6724_v15  ;;  %v1419_v26 = vsel %vm6670_vm12, %v1414_v59, %v1418_v51  ;;  %v6801_v13 = vld [vmem:[#allocation2 + $0x64] sm:$0xf] }
  0x9f   : > { %v1437_v28 = vor.u32 %v1436_v61, %v6758_v56  ;;  %v1451_v30 = vor.u32 %v1450_v6, %v1447_v4  ;;  %v1464_v33 = vshll.u32 %v6770_v7, 16  ;;  %v1469_v34 = vshrl.u32 %v1282_v17, 16  ;;  %v6818_v4 = vld [vmem:[#allocation2 + $0x5c] sm:$0x1] }
  0xa0   : > { %v1472_v44 = vshll.u32 %v1282_v17, 16  ;;  %v1478_v31 = vshll.u32 %v6780_v39, 16  ;;  %v6809_v46 = vcombine.low %v1385_v19, %v1395_v24  ;;  %v1428_v47 = vrot.slane %v1427_v20, 4  ;;  %v6823_v20 = vld [vmem:[#allocation2 + $0x68] sm:$0x1] }
  0xa1   : > { %v1442_v48 = vrot.slane %v1440_v21, 5  ;;  %v1493_v51 = vshrl.u32 %v1285_v16, 16  ;;  %v6813_v53 = vcombine.low %v1409_v25, %v1419_v26  ;;  %v1438_v55 = vrot.slane %v1437_v28, 4 }
  0xa2   : > { %v1502_v57 = vshll.u32 %v6801_v13, 16  ;;  %v1452_v59 = vrot.slane %v1451_v30, 4  ;;  %v1474_v6 = vrot.slane %v1472_v44, 5  ;;  %v1506_v19 = vshrl.u32 %v6801_v13, 16 }
  0xa3   : > { %v1495_v21 = vrot.slane %v1493_v51, 4  ;;  %v1517_v28 = vshrl.u32 %v1288_v58, 16  ;;  %v1488_v44 = vshll.u32 %v6818_v4, 16  ;;  %v1939_v51 = vsel %vm874_vm8, %v6753_v22, 0 }
  0xa4   : > { %v1504_v25 = vrot.slane %v1502_v57, 5  ;;  %v1508_v26 = vrot.slane %v1506_v19, 4  ;;  %vm2116_vm13 = vcmask 1042432   ;;  %vm2117_vm14 = vcmask 1046532  }
  0xa5   : > { %5775 = vmatmul.mubr.msk.bf16.gmra.mxu0 %vm843_vm9, %v6721_v9  ;;  %5797 = vmatmul.mubr.msk.bf16.gmra.mxu1 %vm843_vm9, %v6689_v5  ;;  %vm6882_vm15 = vmor %vm2116_vm13, %vm2117_vm14  ;;  %vm2742_vm0 = vcmask 60416   ;;  %vm2745_vm1 = vcmask 57344  }
  0xa6   : > { %5802 = vmatprep.mubr.msk.bf16.mxu0 %vm843_vm9, %v6600_v32  ;;  %5824 = vmatprep.mubr.msk.bf16.mxu1 %vm843_vm9, %v5251_v40  ;;  %v1454_v32 = vshll.u32 %v6742_v41, 16  ;;  %v1458_v40 = vshrl.u32 %v6742_v41, 16  ;;  %2747 = vst.msk [vmem:[#allocation3 + $0xc] sm:$0xf] %vm2742_vm0, %v6277_v0  ;;  %2743 = vst.msk [vmem:[#allocation3] sm:$0xf] %vm2742_vm0, %v6277_v0 }
  0xa7   : > { %2744 = vst.msk [vmem:[#allocation3 + $0x4] sm:$0xf] %vm2742_vm0, %v6277_v0  ;;  %2748 = vst.msk [vmem:[#allocation3 + $0x10] sm:$0xf] %vm2742_vm0, %v6277_v0 }
  0xa8   : > { %v6772_v10 = vrot.slane %v1454_v32, 5  ;;  %v1460_v14 = vrot.slane %v1458_v40, 4  ;;  %v1466_v32 = vrot.slane %v1464_v33, 5  ;;  %v1471_v40 = vrot.slane %v1469_v34, 4  ;;  %2750 = vst.msk [vmem:[#allocation3 + $0x18] sm:$0xf] %vm2742_vm0, %v6277_v0  ;;  %vm7490_vm4 = vmand %vm2742_vm0, %vm555_vm2 }
  0xa9   : > { %v1443_v33 = vsel %vm6670_vm12, %v1438_v55, %v1442_v48  ;;  %v1509_v48 = vor.u32 %v1508_v26, %v1504_v25  ;;  %v1519_v55 = vrot.slane %v1517_v28, 4  ;;  %2751 = vst.msk [vmem:[#allocation3 + $0x1c] sm:$0xf] %vm2742_vm0, %v6277_v0  ;;  %2753 = vst.msk [vmem:[#allocation3 + $0x24] sm:$0xf] %vm2742_vm0, %v6277_v0 }
  0xaa   : > { %v1461_v15 = vor.u32 %v1460_v14, %v6772_v10  ;;  %v6820_v14 = vrot.slane %v1478_v31, 5  ;;  %v1457_v34 = vsel %vm6670_vm12, %v1452_v59, %v6772_v10  ;;  %v1475_v31 = vor.u32 %v1474_v6, %v1471_v40  ;;  %v6850_v10 = vld [vmem:[%s8416_s1 + $0xa] sm:$0x3]  ;;  %v6857_v59 = vld [vmem:[#allocation2 + $0x74] sm:$0x1]  ;;  %vm7500_vm2 = vmand %vm2745_vm1, %vm390_vm3 }
  0xab   : > { %v1536_v28 = vshll.u32 %v6857_v59, 16  ;;  %2754 = vst.msk [vmem:[#allocation3 + $0x28] sm:$0xf] %vm2742_vm0, %v6277_v0  ;;  %2756 = vst.msk [vmem:[#allocation3 + $0x30] sm:$0xf] %vm2742_vm0, %v6277_v0 }
  0xac   : > { %v1462_v61 = vrot.slane %v1461_v15, 4  ;;  %v1433_v15 = vsel %vm6670_vm12, %v1428_v47, %v6758_v56  ;;  %v1476_v40 = vrot.slane %v1475_v31, 4  ;;  %v8440_v31 = vmov 0  ;;  %2757 = vst.msk [vmem:[#allocation3 + $0x34] sm:$0xf] %vm2742_vm0, %v6277_v0 }
  0xad   : > { %5803 = vmatmul.mubr.msk.bf16.vlgmr.msra.gmra.mxu0 %vm843_vm9, %v6610_v35  ;;  %5825 = vmatmul.mubr.msk.bf16.vlgmr.msra.gmra.mxu1 %vm843_vm9, %v6768_v3  ;;  %v1482_v35 = vshrl.u32 %v6780_v39, 16  ;;  %v8441_v31 = vsel %vm6882_vm15, 4294967295, %v8440_v31  ;;  %2759 = vst.msk [vmem:[#allocation3 + $0x3c] sm:$0xf] %vm2742_vm0, %v6277_v0  ;;  %2760 = vst.msk [vmem:[#allocation3 + $0x40] sm:$0xf] %vm2742_vm0, %v6277_v0 }
  0xae   : > { %5845 = vmatpush3.bf16.msra.mxu0 %v1771_v1  ;;  %5806 = vmatprep.mubr.msk.bf16.mxu0 %vm843_vm9, %v6617_v36  ;;  %v1496_v36 = vshll.u32 %v1285_v16, 16  ;;  %v6816_v1 = vld [vmem:[#allocation2 + $0x70] sm:$0xf]  ;;  %v1520_v16 = vshll.u32 %v1288_v58, 16  ;;  %v6855_v58 = vcombine.low %v1433_v15, %v1443_v33  ;;  %v2074_v15 = vld [vmem:[#allocation2] sm:$0xe] }
  0xaf   : > { %5828 = vmatprep.mubr.msk.bf16.mxu1 %vm843_vm9, %v6774_v18  ;;  %6158 = vmatprep.subr.msk.bf16.mxu0 %vm874_vm8, %v6793_v62  ;;  %v1484_v17 = vrot.slane %v1482_v35, 4  ;;  %v1526_v30 = vshll.u32 %v6816_v1, 16  ;;  %v1512_v35 = vshll.u32 %v6823_v20, 16  ;;  %8442 = vst [vmem:[#allocation6_spill] sm:$0xff] %v8441_v31  ;;  %2762 = vst.msk [vmem:[#allocation3 + $0x48] sm:$0xf] %vm2742_vm0, %v6277_v0 }
  0xb0   : > { %v1498_v24 = vrot.slane %v1496_v36, 5  ;;  %v1522_v36 = vrot.slane %v1520_v16, 5  ;;  %5867 = vmatpush3.bf16.msra.mxu1 %v1939_v51  ;;  %v1481_v16 = vsel %vm6670_vm12, %v1476_v40, %v6820_v14  ;;  %v2128_v40 = vrot.slane %v6652_v52, 5  ;;  %2763 = vst.msk [vmem:[#allocation3 + $0x4c] sm:$0xf] %vm2742_vm0, %v6277_v0 }
  0xb1   : > { %v1485_v56 = vor.u32 %v1484_v17, %v6820_v14  ;;  %v1528_v57 = vrot.slane %v1526_v30, 5  ;;  %6159 = vmatprep.subr.msk.bf16.mxu1 %vm874_vm8, %v6850_v10  ;;  %v1490_v17 = vrot.slane %v1488_v44, 5  ;;  %v1514_v22 = vrot.slane %v1512_v35, 5  ;;  %2765 = vst.msk [vmem:[#allocation3 + $0x54] sm:$0xf] %vm2742_vm0, %v6277_v0 }
  0xb2   : > { %v1499_v47 = vor.u32 %v1498_v24, %v1495_v21  ;;  %v1510_v21 = vrot.slane %v1509_v48, 4  ;;  %v1523_v24 = vor.u32 %v1522_v36, %v1519_v55  ;;  %v2121_v35 = vrot.slane %v6634_v42, 5  ;;  %2766 = vst.msk [vmem:[#allocation3 + $0x58] sm:$0xf] %vm2742_vm0, %v6277_v0  ;;  %2768 = vst.msk [vmem:[#allocation3 + $0x60] sm:$0xf] %vm2742_vm0, %v6277_v0 }
  0xb3   : > { %v1486_v6 = vrot.slane %v1485_v56, 4  ;;  %v5295_v56 = vrot.slane %v2074_v15, 9  ;;  %v6226_v15 = vld [vmem:[#allocation2 + $0x84] sm:$0xff]   ;;  %2769 = vst.msk [vmem:[#allocation3 + $0x64] sm:$0xf] %vm2742_vm0, %v6277_v0 }
  0xb4   : > { %v1500_v19 = vrot.slane %v1499_v47, 4  ;;  %v2075_v47 = vld [vmem:[#allocation2 + $0xc] sm:$0xe]  ;;  %v2123_v55 = vrot.slane %v2121_v35, 4  ;;  %2771 = vst.msk [vmem:[#allocation3 + $0x6c] sm:$0xf] %vm2742_vm0, %v6277_v0 }
  0xb5   : > { %5807 = vmatmul.mubr.msk.bf16.gmra.mxu0 %vm843_vm9, %v6619_v37  ;;  %5829 = vmatmul.mubr.msk.bf16.gmra.mxu1 %vm843_vm9, %v6809_v46  ;;  %v1467_v37 = vsel %vm6670_vm12, %v1462_v61, %v1466_v32  ;;  %v1491_v30 = vsel %vm6670_vm12, %v1486_v6, %v1490_v17  ;;  %v6895_v51 = vsel %vm6882_vm15, %v5295_v56, %v2121_v35  ;;  %v5296_v42 = vrot.slane %v2075_v47, 9  ;;  %v2076_v6 = vld [vmem:[#allocation2 + $0x18] sm:$0xe]  ;;  %v2077_v17 = vld [vmem:[#allocation2 + $0x24] sm:$0xe] }
  0xb6   : > { %5810 = vmatprep.mubr.msk.bf16.mxu0 %vm843_vm9, %v6647_v49  ;;  %5832 = vmatprep.mubr.msk.bf16.mxu1 %vm843_vm9, %v6813_v53  ;;  %v1530_v49 = vshrl.u32 %v6816_v1, 16  ;;  %v6861_v32 = vcombine.low %v1457_v34, %v1467_v37  ;;  %v1505_v33 = vsel %vm6670_vm12, %v1500_v19, %v1504_v25  ;;  %v1515_v34 = vsel %vm6670_vm12, %v1510_v21, %v1514_v22 }
  0xb7   : > { %v1538_v37 = vrot.slane %v1536_v28, 5  ;;  %v6886_v14 = vcombine.low %v1481_v16, %v1491_v30  ;;  %v2124_v25 = vrot.slane %v6640_v43, 5  ;;  %v2130_v19 = vrot.slane %v2128_v40, 4  ;;  %2772 = vst.msk [vmem:[#allocation3 + $0x70] sm:$0xf] %vm2742_vm0, %v6277_v0 }
  0xb8   : > { %v1532_v61 = vrot.slane %v1530_v49, 4  ;;  %v2138_v49 = vrot.slane %v6687_v27, 5  ;;  %v2131_v27 = vrot.slane %v6655_v63, 5  ;;  %v5297_v22 = vrot.slane %v2076_v6, 9  ;;  %2749 = vst.msk [vmem:[#allocation3 + $0x14] sm:$0x1] %vm2745_vm1, %v6277_v0 }
  0xb9   : > { %v6908_v43 = vsel %vm6882_vm15, %v2123_v55, %v2124_v25  ;;  %v2142_v28 = vrot.slane %v6691_v29, 5  ;;  %v2145_v16 = vrot.slane %v6700_v45, 5  ;;  %v2163_v55 = vrot.slane %v6742_v41, 5  ;;  %2746 = vst.msk [vmem:[#allocation3 + $0x8] sm:$0x1] %vm2745_vm1, %v6277_v0 }
  0xba   : > { %v1533_v26 = vor.u32 %v1532_v61, %v1528_v57  ;;  %v5306_v52 = vcombine.low %v6895_v51, %v6908_v43  ;;  %v2084_v43 = vld [vmem:[#allocation2 + $0x78] sm:$0xe]  ;;  %2752 = vst.msk [vmem:[#allocation3 + $0x20] sm:$0x1] %vm2745_vm1, %v6277_v0  ;;  %2755 = vst.msk [vmem:[#allocation3 + $0x2c] sm:$0x1] %vm2745_vm1, %v6277_v0 }
  0xbb   : > { %v2144_v29 = vrot.slane %v2142_v28, 4  ;;  %v2165_v6 = vrot.slane %v2163_v55, 4  ;;  %2758 = vst.msk [vmem:[#allocation3 + $0x38] sm:$0x1] %vm2745_vm1, %v6277_v0  ;;  %2761 = vst.msk [vmem:[#allocation3 + $0x44] sm:$0x1] %vm2745_vm1, %v6277_v0 }
  0xbc   : > { %v1534_v44 = vrot.slane %v1533_v26, 4  ;;  %v2079_v26 = vld [vmem:[#allocation2 + $0x3c] sm:$0xe]  ;;  %2764 = vst.msk [vmem:[#allocation3 + $0x50] sm:$0x1] %vm2745_vm1, %v6277_v0 }
  0xbd   : > { %5811 = vmatmul.mubr.msk.bf16.gmra.mxu0 %vm843_vm9, %v6649_v50  ;;  %5833 = vmatmul.mubr.msk.bf16.gmra.mxu1 %vm843_vm9, %v6855_v58  ;;  %v2135_v50 = vrot.slane %v6658_v2, 5  ;;  %v6889_v2 = vcombine.low %v1505_v33, %v1515_v34  ;;  %v5300_v47 = vrot.slane %v2079_v26, 9  ;;  %v2180_v26 = vrot.slane %v6823_v20, 5  ;;  %v1291_v20 = vld [vmem:[#allocation2 + $0x78] sm:$0xf] }
  0xbe   : > { %5814 = vmatprep.mubr.msk.bf16.mxu0 %vm843_vm9, %v6681_v23  ;;  %5836 = vmatprep.mubr.msk.bf16.mxu1 %vm843_vm9, %v6861_v32  ;;  %v1524_v23 = vrot.slane %v1523_v24, 4  ;;  %v1539_v61 = vsel %vm6670_vm12, %v1534_v44, %v1538_v37  ;;  %v5298_v24 = vrot.slane %v2077_v17, 9  ;;  %v2152_v44 = vrot.slane %v6710_v54, 5  ;;  %v2080_v37 = vld [vmem:[#allocation2 + $0x48] sm:$0xe] }
  0xbf   : > { %v2137_v48 = vrot.slane %v2135_v50, 4  ;;  %v2136_v34 = vsel %vm6882_vm15, %v5297_v22, %v2135_v50  ;;  %v2159_v50 = vrot.slane %v6762_v60, 5  ;;  %v5301_v54 = vrot.slane %v2080_v37, 9  ;;  %2767 = vst.msk [vmem:[#allocation3 + $0x5c] sm:$0x1] %vm2745_vm1, %v6277_v0 }
  0xc0   : > { %v1529_v36 = vsel %vm6670_vm12, %v1524_v23, %v1528_v57  ;;  %v2078_v57 = vld [vmem:[#allocation2 + $0x30] sm:$0xe]  ;;  %v2149_v23 = vrot.slane %v6696_v38, 5  ;;  %v2143_v35 = vsel %vm6882_vm15, %v5298_v24, %v2142_v28  ;;  %v2146_v38 = vsel %vm6882_vm15, %v2144_v29, %v2145_v16  ;;  %v1295_v29 = vld [vmem:[#allocation2 + $0x88] sm:$0xf] }
  0xc1   : > { %v6919_v21 = vcombine.low %v1529_v36, %v1539_v61  ;;  %v2139_v63 = vsel %vm6882_vm15, %v2137_v48, %v2138_v49  ;;  %v5299_v30 = vrot.slane %v2078_v57, 9  ;;  %v2156_v48 = vrot.slane %v6719_v8, 5  ;;  %v2081_v49 = vld [vmem:[#allocation2 + $0x54] sm:$0xe]  ;;  %v2082_v61 = vld [vmem:[#allocation2 + $0x60] sm:$0xe] }
  0xc2   : > { %v6933_v56 = vcombine.low %v2136_v34, %v2139_v63  ;;  %v2151_v25 = vrot.slane %v2149_v23, 4  ;;  %v2166_v36 = vrot.slane %v6770_v7, 5  ;;  %v2164_v7 = vsel %vm6882_vm15, %v5301_v54, %v2163_v55  ;;  %2770 = vst.msk [vmem:[#allocation3 + $0x68] sm:$0x1] %vm2745_vm1, %v6277_v0  ;;  %2773 = vst.msk [vmem:[#allocation3 + $0x74] sm:$0x1] %vm2745_vm1, %v6277_v0 }
  0xc3   : > { %v2150_v45 = vsel %vm6882_vm15, %v5299_v30, %v2149_v23  ;;  %v2157_v60 = vsel %vm6882_vm15, %v5300_v47, %v2156_v48  ;;  %v5302_v17 = vrot.slane %v2081_v49, 9  ;;  %v5303_v22 = vrot.slane %v2082_v61, 9  ;;  %v2085_v23 = vld [vmem:[#allocation2 + $0x84] sm:$0xe] }
  0xc4   : > { %v2153_v8 = vsel %vm6882_vm15, %v2151_v25, %v2152_v44  ;;  %v2167_v63 = vsel %vm6882_vm15, %v2165_v6, %v2166_v36  ;;  %v2177_v24 = vrot.slane %v6801_v13, 5  ;;  %v2187_v34 = vrot.slane %v6857_v59, 5 }
  0xc5   : > { %5815 = vmatmul.mubr.msk.bf16.gmra.mxu0 %vm843_vm9, %v6689_v5  ;;  %5837 = vmatmul.mubr.msk.bf16.gmra.mxu1 %vm843_vm9, %v6886_v14  ;;  %v2129_v5 = vsel %vm6882_vm15, %v5296_v42, %v2128_v40  ;;  %v6948_v42 = vcombine.low %v2143_v35, %v2146_v38  ;;  %v2158_v40 = vrot.slane %v2156_v48, 4  ;;  %v6958_v41 = vcombine.low %v2150_v45, %v2153_v8  ;;  %v6986_v35 = vld [vmem:[#allocation2 + $0x7c] sm:$0xf] }
  0xc6   : > { %5818 = vmatprep.mubr.msk.bf16.mxu0 %vm843_vm9, %v6721_v9  ;;  %5840 = vmatprep.mubr.msk.bf16.mxu1 %vm843_vm9, %v6889_v2  ;;  %v2132_v9 = vsel %vm6882_vm15, %v2130_v19, %v2131_v27  ;;  %v2083_v27 = vld [vmem:[#allocation2 + $0x6c] sm:$0xe]  ;;  %v2173_v19 = vrot.slane %v6818_v4, 5  ;;  %v2179_v4 = vrot.slane %v2177_v24, 4  ;;  %v2252_v13 = vsel %vm874_vm8, %v6793_v62, 0 }
  0xc7   : > { %v6927_v33 = vcombine.low %v2129_v5, %v2132_v9  ;;  %v2160_v57 = vsel %vm6882_vm15, %v2158_v40, %v2159_v50  ;;  %v2170_v5 = vrot.slane %v6780_v39, 5  ;;  %v6972_v9 = vcombine.low %v2164_v7, %v2167_v63  ;;  %v1296_v62 = vld [vmem:[#allocation2 + $0x8c] sm:$0x1] }
  0xc8   : > { %v5304_v30 = vrot.slane %v2083_v27, 9  ;;  %v2178_v39 = vsel %vm6882_vm15, %v5303_v22, %v2177_v24  ;;  %v2406_v44 = vsel %vm874_vm8, %v6850_v10, 0  ;;  %v7001_v10 = vld [vmem:[%s8416_s1 + $0x10] sm:$0x3]  ;;  %v5339_v48 = vrot.slane %v2085_v23, 9 }
  0xc9   : > { %v2171_v28 = vsel %vm6882_vm15, %v5302_v17, %v2170_v5  ;;  %v2172_v16 = vrot.slane %v2170_v5, 4  ;;  %v1739_v50 = vshrl.u32 %v1291_v20, 16  ;;  %v2546_v49 = vrot.slane %v1295_v29, 5  ;;  %v1294_v27 = vld [vmem:[#allocation2 + $0x84] sm:$0xf] }
  0xca   : > { %v2549_v38 = vrot.slane %v1296_v62, 5  ;;  %v1742_v54 = vshll.u32 %v1291_v20, 16  ;;  %v1748_v55 = vshll.u32 %v6986_v35, 16  ;;  %v1752_v36 = vshrl.u32 %v6986_v35, 16  ;;  %v7027_v5 = vld [vmem:[#allocation2 + $0x80] sm:$0x1] }
  0xcb   : > { %v2174_v37 = vsel %vm6882_vm15, %v2172_v16, %v2173_v19  ;;  %v2548_v8 = vrot.slane %v2546_v49, 4  ;;  %v1907_v19 = vshrl.u32 %v1294_v27, 16  ;;  %v1910_v22 = vshll.u32 %v1294_v27, 16 }
  0xcc   : > { %v6988_v47 = vcombine.low %v2171_v28, %v2174_v37  ;;  %v1744_v7 = vrot.slane %v1742_v54, 5  ;;  %v1750_v6 = vrot.slane %v1748_v55, 5  ;;  %v1754_v17 = vrot.slane %v1752_v36, 4 }
  0xcd   : > { %5819 = vmatmul.mubr.msk.bf16.gmra.mxu0 %vm843_vm9, %v6226_v15  ;;  %5841 = vmatmul.mubr.msk.bf16.gmra.mxu1 %vm843_vm9, %v6919_v21  ;;  %v2184_v15 = vrot.slane %v6816_v1, 5  ;;  %v2181_v1 = vsel %vm6882_vm15, %v2179_v4, %v2180_v26  ;;  %v7023_v40 = vsel %vm6882_vm15, %v2548_v8, %v2549_v38  ;;  %v1916_v63 = vshll.u32 %v1295_v29, 16 }
  0xce   : > { %5846 = vmatprep.mubr.msk.bf16.mxu0 %vm843_vm9, %v6768_v3  ;;  %5868 = vmatprep.mubr.msk.bf16.mxu1 %vm843_vm9, %v6774_v18  ;;  %v6966_v3 = vcombine.low %v2157_v60, %v2160_v57  ;;  %v7003_v25 = vcombine.low %v2178_v39, %v2181_v1  ;;  %v1741_v60 = vrot.slane %v1739_v50, 4  ;;  %v1920_v24 = vshrl.u32 %v1295_v29, 16 }
  0xcf   : > { %v2185_v59 = vsel %vm6882_vm15, %v5304_v30, %v2184_v15  ;;  %v2186_v45 = vrot.slane %v2184_v15, 4  ;;  %v1755_v28 = vor.u32 %v1754_v17, %v1750_v6  ;;  %v1758_v16 = vshll.u32 %v7027_v5, 16 }
  0xd0   : > { %v1745_v26 = vor.u32 %v1744_v7, %v1741_v60  ;;  %v1909_v30 = vrot.slane %v1907_v19, 4  ;;  %v1912_v39 = vrot.slane %v1910_v22, 5  ;;  %v1922_v4 = vrot.slane %v1920_v24, 4 }
  0xd1   : > { %v1760_v23 = vrot.slane %v1758_v16, 5  ;;  %v1926_v20 = vshll.u32 %v1296_v62, 16  ;;  %v2392_v51 = vrot.slane %v6986_v35, 5 }
  0xd2   : > { %v1746_v15 = vrot.slane %v1745_v26, 4 }
  0xd5   : > { %5847 = vmatmul.mubr.msk.bf16.vlgmr.msra.gmra.mxu0 %vm843_vm9, %v6774_v18  ;;  %5869 = vmatmul.mubr.msk.bf16.vlgmr.msra.gmra.mxu1 %vm843_vm9, %v6809_v46  ;;  %v2188_v18 = vsel %vm6882_vm15, %v2186_v45, %v2187_v34  ;;  %v1756_v34 = vrot.slane %v1755_v28, 4 }
  0xd6   : > { %5889 = vmatpush3.bf16.msra.mxu0 %v2252_v13  ;;  %5850 = vmatprep.mubr.msk.bf16.mxu0 %vm843_vm9, %v6809_v46  ;;  %v7013_v61 = vcombine.low %v2185_v59, %v2188_v18  ;;  %v7019_v46 = vsel %vm6882_vm15, %v5339_v48, %v2546_v49  ;;  %v1928_v59 = vrot.slane %v1926_v20, 5 }
  0xd7   : > { %5872 = vmatprep.mubr.msk.bf16.mxu1 %vm843_vm9, %v6813_v53  ;;  %5911 = vmatpush3.bf16.msra.mxu1 %v2406_v44  ;;  %v5341_v57 = vcombine.low %v7019_v46, %v7023_v40  ;;  %v1751_v44 = vsel %vm6670_vm12, %v1746_v15, %v1750_v6  ;;  %v1761_v37 = vsel %vm6670_vm12, %v1756_v34, %v1760_v23 }
  0xd8   : > { %6160 = vmatprep.subr.msk.bf16.mxu0 %vm874_vm8, %v7001_v10  ;;  %v5272_v29 = vcombine.low %v1751_v44, %v1761_v37 }
  0xdd   : > { %5851 = vmatmul.mubr.msk.bf16.gmra.mxu0 %vm843_vm9, %v6813_v53  ;;  %5873 = vmatmul.mubr.msk.bf16.gmra.mxu1 %vm843_vm9, %v6855_v58  ;;  %v1918_v53 = vrot.slane %v1916_v63, 5 }
  0xde   : > { %5854 = vmatprep.mubr.msk.bf16.mxu0 %vm843_vm9, %v6855_v58  ;;  %5876 = vmatprep.mubr.msk.bf16.mxu1 %vm843_vm9, %v6861_v32  ;;  %v1913_v58 = vor.u32 %v1912_v39, %v1909_v30 }
  0xdf   : > { %v1923_v13 = vor.u32 %v1922_v4, %v1918_v53 }
  0xe1   : > { %v1924_v1 = vrot.slane %v1923_v13, 4 }
  0xe3   : > { %v1929_v45 = vsel %vm6670_vm12, %v1924_v1, %v1928_v59 }
  0xe5   : > { %5855 = vmatmul.mubr.msk.bf16.gmra.mxu0 %vm843_vm9, %v6861_v32  ;;  %5877 = vmatmul.mubr.msk.bf16.gmra.mxu1 %vm843_vm9, %v6886_v14  ;;  %v1914_v32 = vrot.slane %v1913_v58, 4 }
  0xe6   : > { %5858 = vmatprep.mubr.msk.bf16.mxu0 %vm843_vm9, %v6886_v14  ;;  %5880 = vmatprep.mubr.msk.bf16.mxu1 %vm843_vm9, %v6889_v2 }
  0xe7   : > { %v1919_v14 = vsel %vm6670_vm12, %v1914_v32, %v1918_v53 }
  0xe8   : > { %v5284_v62 = vcombine.low %v1919_v14, %v1929_v45 }
  0xed   : > { %5859 = vmatmul.mubr.msk.bf16.gmra.mxu0 %vm843_vm9, %v6889_v2  ;;  %5881 = vmatmul.mubr.msk.bf16.gmra.mxu1 %vm843_vm9, %v6919_v21  ;;  %v2560_v2 = vsel %vm874_vm8, %v7001_v10, 0 }
  0xee   : > { %5862 = vmatprep.mubr.msk.bf16.mxu0 %vm843_vm9, %v6919_v21  ;;  %5884 = vmatprep.mubr.msk.bf16.mxu1 %vm843_vm9, %v5272_v29  ;;  %v2394_v21 = vrot.slane %v2392_v51, 4 }
  0xf5   : > { %5863 = vmatmul.mubr.msk.bf16.gmra.mxu0 %vm843_vm9, %v5272_v29  ;;  %5885 = vmatmul.mubr.msk.bf16.gmra.mxu1 %vm843_vm9, %v5284_v62 }
  0xf6   : > { %5890 = vmatprep.mubr.msk.bf16.mxu0 %vm843_vm9, %v5306_v52  ;;  %5912 = vmatprep.mubr.msk.bf16.mxu1 %vm843_vm9, %v6927_v33  ;;  %v5326_v52 = vrot.slane %v2084_v43, 9 }
  0xf8   : > { %v2393_v35 = vsel %vm6882_vm15, %v5326_v52, %v2392_v51 }
  0xfd   : > { %5891 = vmatmul.mubr.msk.bf16.vlgmr.msra.gmra.mxu0 %vm843_vm9, %v6927_v33  ;;  %5913 = vmatmul.mubr.msk.bf16.vlgmr.msra.gmra.mxu1 %vm843_vm9, %v6933_v56  ;;  %v2395_v33 = vrot.slane %v7027_v5, 5 }
  0xfe   : > { %5933 = vmatpush3.bf16.msra.mxu0 %v2560_v2  ;;  %5894 = vmatprep.mubr.msk.bf16.mxu0 %vm843_vm9, %v6933_v56 }
  0xff   : > { %5916 = vmatprep.mubr.msk.bf16.mxu1 %vm843_vm9, %v6948_v42  ;;  %v2396_v10 = vsel %vm6882_vm15, %v2394_v21, %v2395_v33 }
 0x100   : > { %v5328_v48 = vcombine.low %v2393_v35, %v2396_v10 }
 0x105   : > { %5895 = vmatmul.mubr.msk.bf16.gmra.mxu0 %vm843_vm9, %v6948_v42  ;;  %5917 = vmatmul.mubr.msk.bf16.gmra.mxu1 %vm843_vm9, %v6958_v41 }
 0x106   : > { %5898 = vmatprep.mubr.msk.bf16.mxu0 %vm843_vm9, %v6958_v41  ;;  %5920 = vmatprep.mubr.msk.bf16.mxu1 %vm843_vm9, %v6966_v3 }
 0x10d   : > { %5899 = vmatmul.mubr.msk.bf16.gmra.mxu0 %vm843_vm9, %v6966_v3  ;;  %5921 = vmatmul.mubr.msk.bf16.gmra.mxu1 %vm843_vm9, %v6972_v9 }
 0x10e   : > { %5902 = vmatprep.mubr.msk.bf16.mxu0 %vm843_vm9, %v6972_v9  ;;  %5924 = vmatprep.mubr.msk.bf16.mxu1 %vm843_vm9, %v6988_v47 }
 0x115   : > { %5903 = vmatmul.mubr.msk.bf16.gmra.mxu0 %vm843_vm9, %v6988_v47  ;;  %5925 = vmatmul.mubr.msk.bf16.gmra.mxu1 %vm843_vm9, %v7003_v25 }
 0x116   : > { %5906 = vmatprep.mubr.msk.bf16.mxu0 %vm843_vm9, %v7003_v25  ;;  %5928 = vmatprep.mubr.msk.bf16.mxu1 %vm843_vm9, %v7013_v61 }
 0x11d   : > { %5907 = vmatmul.mubr.msk.bf16.gmra.mxu0 %vm843_vm9, %v7013_v61  ;;  %5929 = vmatmul.mubr.msk.bf16.gmra.mxu1 %vm843_vm9, %v5328_v48 }
 0x11e   : > { %5934 = vmatprep.mubr.msk.bf16.mxu0 %vm843_vm9, %v6933_v56 }
 0x125   : > { %5935 = vmatmul.mubr.msk.bf16.vlgmr.msra.gmra.mxu0 %vm843_vm9, %v6948_v42 }
 0x126   : > { %5938 = vmatprep.mubr.msk.bf16.mxu0 %vm843_vm9, %v6958_v41 }
 0x12d   : > { %5939 = vmatmul.mubr.msk.bf16.gmra.mxu0 %vm843_vm9, %v6966_v3 }
 0x12e   : > { %5942 = vmatprep.mubr.msk.bf16.mxu0 %vm843_vm9, %v6972_v9 }
 0x135   : > { %5943 = vmatmul.mubr.msk.bf16.gmra.mxu0 %vm843_vm9, %v6988_v47 }
 0x136   : > { %5946 = vmatprep.mubr.msk.bf16.mxu0 %vm843_vm9, %v7003_v25 }
 0x13d   : > { %5947 = vmatmul.mubr.msk.bf16.gmra.mxu0 %vm843_vm9, %v7013_v61 }
 0x13e   : > { %5950 = vmatprep.mubr.msk.bf16.mxu0 %vm843_vm9, %v5328_v48 }
 0x145   : > { %v5760_v56 = vpop.f32.mrf.mxu0  ;;  %v5782_v42 = vpop.f32.mrf.mxu1  ;;  %5951 = vmatmul.mubr.msk.bf16.gmra.mxu0 %vm843_vm9, %v5341_v57 }
 0x146   : > { %v7133_v41 = vadd.f32 %v5782_v42, %v5760_v56 }
 0x147   : > { %v912_v3 = vpop.f32.mrf.mxu0  ;;  %v1036_v9 = vpop.f32.mrf.mxu1 }
 0x148   : > { %v7135_v47 = vadd.f32 %v1036_v9, %v912_v3 }
 0x149   : > { %v5761_v50 = vpop.f32.mrf.mxu0  ;;  %v5783_v25 = vpop.f32.mrf.mxu1 }
 0x14a   : > { %v7137_v18 = vadd.f32 %v5783_v25, %v5761_v50 }
 0x14b   : > { %v915_v49 = vpop.f32.mrf.mxu0  ;;  %v1039_v38 = vpop.f32.mrf.mxu1 }
 0x14c   : > { %v7139_v54 = vadd.f32 %v1039_v38, %v915_v49 }
 0x14d   : > { %v5764_v55 = vpop.f32.mrf.mxu0  ;;  %v5786_v36 = vpop.f32.mrf.mxu1 }
 0x14e   : > { %v7141_v61 = vadd.f32 %v5786_v36, %v5764_v55 }
 0x14f   : > { %v928_v46 = vpop.f32.mrf.mxu0  ;;  %v1052_v8 = vpop.f32.mrf.mxu1 }
 0x150   : > { %v7143_v60 = vadd.f32 %v1052_v8, %v928_v46 }
 0x151   : > { %v5765_v40 = vpop.f32.mrf.mxu0  ;;  %v5787_v7 = vpop.f32.mrf.mxu1 }
 0x152   : > { %v7145_v6 = vadd.f32 %v5787_v7, %v5765_v40 }
 0x153   : > { %v931_v17 = vpop.f32.mrf.mxu0  ;;  %v1055_v27 = vpop.f32.mrf.mxu1 }
 0x154   : > { %v7147_v57 = vadd.f32 %v1055_v27, %v931_v17 }
 0x155   : > { %v5768_v5 = vpop.f32.mrf.mxu0  ;;  %v5790_v19 = vpop.f32.mrf.mxu1 }
 0x156   : > { %v7149_v22 = vadd.f32 %v5790_v19, %v5768_v5 }
 0x157   : > { %v944_v63 = vpop.f32.mrf.mxu0  ;;  %v1068_v24 = vpop.f32.mrf.mxu1 }
 0x158   : > { %v7151_v26 = vadd.f32 %v1068_v24, %v944_v63 }
 0x159   : > { %v5769_v28 = vpop.f32.mrf.mxu0  ;;  %v5791_v16 = vpop.f32.mrf.mxu1 }
 0x15a   : > { %v7153_v30 = vadd.f32 %v5791_v16, %v5769_v28 }
 0x15b   : > { %v947_v39 = vpop.f32.mrf.mxu0  ;;  %v1071_v53 = vpop.f32.mrf.mxu1 }
 0x15c   : > { %v7155_v4 = vadd.f32 %v1071_v53, %v947_v39 }
 0x15d   : > { %v5772_v15 = vpop.f32.mrf.mxu0  ;;  %v5794_v34 = vpop.f32.mrf.mxu1 }
 0x15e   : > { %v7157_v23 = vadd.f32 %v5794_v34, %v5772_v15 }
 0x15f   : > { %v960_v58 = vpop.f32.mrf.mxu0  ;;  %v1084_v13 = vpop.f32.mrf.mxu1 }
 0x160   : > { %v7159_v20 = vadd.f32 %v1084_v13, %v960_v58 }
 0x161   : > { %v5773_v44 = vpop.f32.mrf.mxu0  ;;  %v5795_v37 = vpop.f32.mrf.mxu1 }
 0x162   : > { %v7161_v29 = vadd.f32 %v5795_v37, %v5773_v44 }
 0x163   : > { %v963_v32 = vpop.f32.mrf.mxu0  ;;  %v1087_v1 = vpop.f32.mrf.mxu1 }
 0x164   : > { %v7163_v59 = vadd.f32 %v1087_v1, %v963_v32 }
 0x165   : > { %v5776_v14 = vpop.f32.mrf.mxu0  ;;  %v5798_v45 = vpop.f32.mrf.mxu1 }
 0x166   : > { %v7165_v62 = vadd.f32 %v5798_v45, %v5776_v14 }
 0x167   : > { %v976_v2 = vpop.f32.mrf.mxu0  ;;  %v1100_v51 = vpop.f32.mrf.mxu1 }
 0x168   : > { %v7167_v43 = vadd.f32 %v1100_v51, %v976_v2 }
 0x169   : > { %v5777_v52 = vpop.f32.mrf.mxu0  ;;  %v5799_v21 = vpop.f32.mrf.mxu1 }
 0x16a   : > { %v7169_v33 = vadd.f32 %v5799_v21, %v5777_v52 }
 0x16b   : > { %v979_v35 = vpop.f32.mrf.mxu0  ;;  %v1103_v10 = vpop.f32.mrf.mxu1 }
 0x16c   : > { %v7211_v48 = vadd.f32 %v1103_v10, %v979_v35 }
 0x16d   : > { %v5804_v56 = vpop.f32.mrf.mxu0  ;;  %v5826_v42 = vpop.f32.mrf.mxu1 }
 0x16e   : > { %v1243_v3 = vadd.f32 %v5804_v56, %v7133_v41 }
 0x16f   : > { %v1162_v9 = vpop.f32.mrf.mxu0  ;;  %v1639_v50 = vpop.f32.mrf.mxu1 }
 0x170   : > { %v1241_v25 = vadd.f32 %v1162_v9, %v7135_v47  ;;  %v7215_v49 = vadd.f32 %v5826_v42, %v1243_v3 }
 0x171   : > { %v5805_v41 = vpop.f32.mrf.mxu0  ;;  %v5827_v47 = vpop.f32.mrf.mxu1 }
 0x172   : > { %v1244_v38 = vadd.f32 %v5805_v41, %v7137_v18  ;;  %v7238_v55 = vadd.f32 %v1639_v50, %v1241_v25 }
 0x173   : > { %v1165_v36 = vpop.f32.mrf.mxu0  ;;  %v1642_v46 = vpop.f32.mrf.mxu1 }
 0x174   : > { %v1242_v8 = vadd.f32 %v1165_v36, %v7139_v54  ;;  %v7241_v40 = vadd.f32 %v5827_v47, %v1244_v38 }
 0x175   : > { %v5808_v7 = vpop.f32.mrf.mxu0  ;;  %v5830_v17 = vpop.f32.mrf.mxu1 }
 0x176   : > { %v1247_v27 = vadd.f32 %v5808_v7, %v7141_v61  ;;  %v7244_v5 = vadd.f32 %v1642_v46, %v1242_v8 }
 0x177   : > { %v1178_v19 = vpop.f32.mrf.mxu0  ;;  %v1655_v0 = vpop.f32.mrf.mxu1 }
 0x178   : > { %v1245_v63 = vadd.f32 %v1178_v19, %v7143_v60  ;;  %v7247_v24 = vadd.f32 %v5830_v17, %v1247_v27 }
 0x179   : > { %v5809_v18 = vpop.f32.mrf.mxu0  ;;  %v5831_v28 = vpop.f32.mrf.mxu1 }
 0x17a   : > { %v1248_v16 = vadd.f32 %v5809_v18, %v7145_v6  ;;  %v7250_v39 = vadd.f32 %v1655_v0, %v1245_v63 }
 0x17b   : > { %v1181_v54 = vpop.f32.mrf.mxu0  ;;  %v1658_v53 = vpop.f32.mrf.mxu1 }
 0x17c   : > { %v1246_v15 = vadd.f32 %v1181_v54, %v7147_v57  ;;  %v7253_v34 = vadd.f32 %v5831_v28, %v1248_v16 }
 0x17d   : > { %v5812_v61 = vpop.f32.mrf.mxu0  ;;  %v5834_v58 = vpop.f32.mrf.mxu1 }
 0x17e   : > { %v1251_v13 = vadd.f32 %v5812_v61, %v7149_v22  ;;  %v7256_v44 = vadd.f32 %v1658_v53, %v1246_v15 }
 0x17f   : > { %v1194_v60 = vpop.f32.mrf.mxu0  ;;  %v1671_v37 = vpop.f32.mrf.mxu1 }
 0x180   : > { %v1249_v32 = vadd.f32 %v1194_v60, %v7151_v26  ;;  %v7259_v1 = vadd.f32 %v5834_v58, %v1251_v13 }
 0x181   : > { %v5813_v6 = vpop.f32.mrf.mxu0  ;;  %v5835_v14 = vpop.f32.mrf.mxu1 }
 0x182   : > { %v1252_v45 = vadd.f32 %v5813_v6, %v7153_v30  ;;  %v7262_v2 = vadd.f32 %v1671_v37, %v1249_v32 }
 0x183   : > { %v1197_v57 = vpop.f32.mrf.mxu0  ;;  %v1674_v51 = vpop.f32.mrf.mxu1 }
 0x184   : > { %v1250_v52 = vadd.f32 %v1197_v57, %v7155_v4  ;;  %v7265_v21 = vadd.f32 %v5835_v14, %v1252_v45 }
 0x185   : > { %v5816_v22 = vpop.f32.mrf.mxu0  ;;  %v5838_v35 = vpop.f32.mrf.mxu1 }
 0x186   : > { %v1255_v10 = vadd.f32 %v5816_v22, %v7157_v23  ;;  %v7268_v56 = vadd.f32 %v1674_v51, %v1250_v52 }
 0x187   : > { %v1210_v26 = vpop.f32.mrf.mxu0  ;;  %v1687_v42 = vpop.f32.mrf.mxu1 }
 0x188   : > { %v1253_v3 = vadd.f32 %v1210_v26, %v7159_v20  ;;  %v7271_v9 = vadd.f32 %v5838_v35, %v1255_v10 }
 0x189   : > { %v5817_v30 = vpop.f32.mrf.mxu0  ;;  %v5839_v50 = vpop.f32.mrf.mxu1 }
 0x18a   : > { %v1256_v25 = vadd.f32 %v5817_v30, %v7161_v29  ;;  %v7274_v41 = vadd.f32 %v1687_v42, %v1253_v3 }
 0x18b   : > { %v1213_v4 = vpop.f32.mrf.mxu0  ;;  %v1690_v47 = vpop.f32.mrf.mxu1 }
 0x18c   : > { %v1254_v38 = vadd.f32 %v1213_v4, %v7163_v59  ;;  %v1733_v36 = vadd.f32 %v5839_v50, %v1256_v25 }
 0x18d   : > { %v5820_v23 = vpop.f32.mrf.mxu0  ;;  %v5842_v46 = vpop.f32.mrf.mxu1 }
 0x18e   : > { %v1259_v8 = vadd.f32 %v5820_v23, %v7165_v62  ;;  %v1731_v7 = vadd.f32 %v1690_v47, %v1254_v38 }
 0x18f   : > { %v1226_v17 = vpop.f32.mrf.mxu0  ;;  %v1703_v20 = vpop.f32.mrf.mxu1 }
 0x190   : > { %v1257_v27 = vadd.f32 %v1226_v17, %v7167_v43  ;;  %v1736_v19 = vadd.f32 %v5842_v46, %v1259_v8 }
 0x191   : > { %v5821_v0 = vpop.f32.mrf.mxu0  ;;  %v5843_v63 = vpop.f32.mrf.mxu1 }
 0x192   : > { %v1260_v29 = vadd.f32 %v5821_v0, %v7169_v33  ;;  %v1734_v18 = vadd.f32 %v1703_v20, %v1257_v27 }
 0x193   : > { %v1229_v28 = vpop.f32.mrf.mxu0  ;;  %v1706_v16 = vpop.f32.mrf.mxu1 }
 0x194   : > { %v1258_v59 = vadd.f32 %v1229_v28, %v7211_v48  ;;  %v1737_v54 = vadd.f32 %v5843_v63, %v1260_v29 }
 0x195   : > { %v5848_v53 = vpop.f32.mrf.mxu0  ;;  %v7281_v15 = vpop.f32.mrf.mxu1 }
 0x196   : > { %v1735_v62 = vadd.f32 %v1706_v16, %v1258_v59  ;;  %v7284_v61 = vadd.f32 %v5848_v53, %v7215_v49 }
 0x197   : > { %v1807_v58 = vpop.f32.mrf.mxu0  ;;  %v7286_v43 = vpop.f32.mrf.mxu1 }
 0x198   : > { %v7289_v13 = vadd.f32 %v1807_v58, %v7238_v55 }
 0x199   : > { %v5849_v33 = vpop.f32.mrf.mxu0  ;;  %v7291_v60 = vpop.f32.mrf.mxu1 }
 0x19a   : > { %v7294_v37 = vadd.f32 %v5849_v33, %v7241_v40 }
 0x19b   : > { %v1810_v48 = vpop.f32.mrf.mxu0  ;;  %v7296_v32 = vpop.f32.mrf.mxu1 }
 0x19c   : > { %v7299_v6 = vadd.f32 %v1810_v48, %v7244_v5 }
 0x19d   : > { %v5852_v49 = vpop.f32.mrf.mxu0  ;;  %v7301_v14 = vpop.f32.mrf.mxu1 }
 0x19e   : > { %v7304_v45 = vadd.f32 %v5852_v49, %v7247_v24 }
 0x19f   : > { %v1823_v55 = vpop.f32.mrf.mxu0  ;;  %v7306_v57 = vpop.f32.mrf.mxu1 }
 0x1a0   : > { %v7309_v51 = vadd.f32 %v1823_v55, %v7250_v39 }
 0x1a1   : > { %v5853_v40 = vpop.f32.mrf.mxu0  ;;  %v7311_v52 = vpop.f32.mrf.mxu1 }
 0x1a2   : > { %v7314_v22 = vadd.f32 %v5853_v40, %v7253_v34 }
 0x1a3   : > { %v1826_v5 = vpop.f32.mrf.mxu0  ;;  %v7316_v35 = vpop.f32.mrf.mxu1 }
 0x1a4   : > { %v7319_v10 = vadd.f32 %v1826_v5, %v7256_v44 }
 0x1a5   : > { %v5856_v24 = vpop.f32.mrf.mxu0  ;;  %v7321_v26 = vpop.f32.mrf.mxu1 }
 0x1a6   : > { %v7324_v42 = vadd.f32 %v5856_v24, %v7259_v1 }
 0x1a7   : > { %v1839_v39 = vpop.f32.mrf.mxu0  ;;  %v7326_v3 = vpop.f32.mrf.mxu1 }
 0x1a8   : > { %v7329_v30 = vadd.f32 %v1839_v39, %v7262_v2 }
 0x1a9   : > { %v5857_v34 = vpop.f32.mrf.mxu0  ;;  %v7331_v50 = vpop.f32.mrf.mxu1 }
 0x1aa   : > { %v7334_v25 = vadd.f32 %v5857_v34, %v7265_v21 }
 0x1ab   : > { %v1842_v44 = vpop.f32.mrf.mxu0  ;;  %v7336_v4 = vpop.f32.mrf.mxu1 }
 0x1ac   : > { %v7339_v47 = vadd.f32 %v1842_v44, %v7268_v56 }
 0x1ad   : > { %v5860_v1 = vpop.f32.mrf.mxu0  ;;  %v7341_v38 = vpop.f32.mrf.mxu1 }
 0x1ae   : > { %v7344_v23 = vadd.f32 %v5860_v1, %v7271_v9 }
 0x1af   : > { %v1855_v2 = vpop.f32.mrf.mxu0  ;;  %v7346_v46 = vpop.f32.mrf.mxu1 }
 0x1b0   : > { %v7349_v8 = vadd.f32 %v1855_v2, %v7274_v41 }
 0x1b1   : > { %v5861_v21 = vpop.f32.mrf.mxu0  ;;  %v7351_v17 = vpop.f32.mrf.mxu1 }
 0x1b2   : > { %v7353_v20 = vadd.f32 %v5861_v21, %v1733_v36 }
 0x1b3   : > { %v1858_v27 = vpop.f32.mrf.mxu0  ;;  %v7355_v56 = vpop.f32.mrf.mxu1 }
 0x1b4   : > { %v7357_v0 = vadd.f32 %v1858_v27, %v1731_v7 }
 0x1b5   : > { %v5864_v63 = vpop.f32.mrf.mxu0  ;;  %v7359_v29 = vpop.f32.mrf.mxu1 }
 0x1b6   : > { %v7361_v9 = vadd.f32 %v5864_v63, %v1736_v19 }
 0x1b7   : > { %v1871_v28 = vpop.f32.mrf.mxu0  ;;  %v7363_v16 = vpop.f32.mrf.mxu1 }
 0x1b8   : > { %v7365_v41 = vadd.f32 %v1871_v28, %v1734_v18 }
 0x1b9   : > { %v5865_v59 = vpop.f32.mrf.mxu0  ;;  %v7367_v53 = vpop.f32.mrf.mxu1 }
 0x1ba   : > { %8443 = vst [vmem:[#allocation7_spill] sm:$0xff] %v7367_v53  ;;  %v7369_v36 = vadd.f32 %v5865_v59, %v1737_v54  ;;  %v2058_v53 = vadd.f32 %v7306_v57, %v7309_v51 }
 0x1bb   : > { %v1874_v58 = vpop.f32.mrf.mxu0  ;;  %v7371_v33 = vpop.f32.mrf.mxu1 }
 0x1bc   : > { %8444 = vst [vmem:[#allocation8_spill] sm:$0xff] %v7371_v33  ;;  %v7373_v7 = vadd.f32 %v1874_v58, %v1735_v62 }
 0x1bd   : > { %v5892_v48 = vpop.f32.mrf.mxu0  ;;  %v5914_v49 = vpop.f32.mrf.mxu1 }
 0x1be   : > { %8445 = vst [vmem:[#allocation9_spill] sm:$0xff] %v7373_v7 }
 0x1bf   : > { %v2288_v55 = vpop.f32.mrf.mxu0  ;;  %v7375_v19 = vpop.f32.mrf.mxu1 }
 0x1c0   : > { %8446 = vst [vmem:[#allocation10_spill] sm:$0xff] %v7375_v19 }
 0x1c1   : > { %v5893_v40 = vpop.f32.mrf.mxu0  ;;  %v7377_v5 = vpop.f32.mrf.mxu1 }
 0x1c2   : > { %8447 = vst [vmem:[#allocation11_spill] sm:$0xff] %v7377_v5 }
 0x1c3   : > { %v2291_v18 = vpop.f32.mrf.mxu0  ;;  %v7379_v24 = vpop.f32.mrf.mxu1 }
 0x1c4   : > { %8448 = vst [vmem:[#allocation12_spill] sm:$0xff] %v7379_v24 }
 0x1c5   : > { %v5896_v39 = vpop.f32.mrf.mxu0  ;;  %v7381_v34 = vpop.f32.mrf.mxu1 }
 0x1c6   : > { %8449 = vst [vmem:[#allocation13_spill] sm:$0xff] %v7381_v34 }
 0x1c7   : > { %v2304_v54 = vpop.f32.mrf.mxu0  ;;  %v7383_v44 = vpop.f32.mrf.mxu1 }
 0x1c8   : > { %8450 = vst [vmem:[#allocation14_spill] sm:$0xff] %v7383_v44 }
 0x1c9   : > { %v5897_v1 = vpop.f32.mrf.mxu0  ;;  %v5919_v62 = vpop.f32.mrf.mxu1 }
 0x1cb   : > { %v2307_v2 = vpop.f32.mrf.mxu0  ;;  %v2461_v21 = vpop.f32.mrf.mxu1 }
 0x1cd   : > { %v5900_v27 = vpop.f32.mrf.mxu0  ;;  %v7385_v63 = vpop.f32.mrf.mxu1 }
 0x1ce   : > { %8451 = vst [vmem:[#allocation15_spill] sm:$0xff] %v7385_v63  ;;  %v2056_v63 = vadd.f32 %v7281_v15, %v7284_v61  ;;  %v2059_v15 = vadd.f32 %v7316_v35, %v7319_v10  ;;  %v2064_v61 = vadd.f32 %v7321_v26, %v7324_v42  ;;  %v2069_v35 = vadd.f32 %v7351_v17, %v7353_v20  ;;  %v8459_v17 = vld [vmem:[#allocation9_spill] sm:$0xff]  ;;  %v8460_v20 = vld [vmem:[#allocation8_spill] sm:$0xff] }
 0x1cf   : > { %v2320_v28 = vpop.f32.mrf.mxu0  ;;  %v7387_v59 = vpop.f32.mrf.mxu1  ;;  %v2371_v26 = vadd.f32 %v2304_v54, %v2058_v53  ;;  %v2071_v53 = vadd.f32 %v8460_v20, %v8459_v17 }
 0x1d0   : > { %8452 = vst [vmem:[#allocation16_spill] sm:$0xff] %v7387_v59  ;;  %v2054_v59 = vadd.f32 %v7286_v43, %v7289_v13  ;;  %v2062_v43 = vadd.f32 %v7326_v3, %v7329_v30  ;;  %v2067_v3 = vadd.f32 %v7355_v56, %v7357_v0  ;;  %v2072_v30 = vadd.f32 %v7359_v29, %v7361_v9  ;;  %v8462_v0 = vld [vmem:[#allocation11_spill] sm:$0xff]  ;;  %v8463_v29 = vld [vmem:[#allocation12_spill] sm:$0xff] }
 0x1d1   : > { %v5901_v58 = vpop.f32.mrf.mxu0  ;;  %v7389_v31 = vpop.f32.mrf.mxu1 }
 0x1d2   : > { %8453 = vst [vmem:[#allocation17_spill] sm:$0xff] %v7389_v31  ;;  %v2367_v57 = vadd.f32 %v2288_v55, %v2054_v59 }
 0x1d3   : > { %v2323_v11 = vpop.f32.mrf.mxu0  ;;  %v7391_v12 = vpop.f32.mrf.mxu1 }
 0x1d4   : > { %8454 = vst [vmem:[#allocation18_spill] sm:$0xff] %v7391_v12  ;;  %v2057_v12 = vadd.f32 %v7291_v60, %v7294_v37  ;;  %v2065_v60 = vadd.f32 %v7331_v50, %v7334_v25  ;;  %v2063_v37 = vadd.f32 %v7336_v4, %v7339_v47  ;;  %v2070_v50 = vadd.f32 %v7363_v16, %v7365_v41  ;;  %v7445_v16 = vld [vmem:[%s8417_s2] ss:$0 sm:$0xff]  ;;  %v8464_v41 = vld [vmem:[#allocation13_spill] sm:$0xff] }
 0x1d5   : > { %v5904_v34 = vpop.f32.mrf.mxu0  ;;  %v7393_v24 = vpop.f32.mrf.mxu1  ;;  %v2372_v25 = vadd.f32 %v2307_v2, %v2059_v15 }
 0x1d6   : > { %8455 = vst [vmem:[#allocation19_spill] sm:$0xff] %v7393_v24  ;;  %v2055_v24 = vadd.f32 %v7296_v32, %v7299_v6  ;;  %v2068_v32 = vadd.f32 %v7341_v38, %v7344_v23  ;;  %v2369_v6 = vadd.f32 %v5892_v48, %v2056_v63  ;;  %v2370_v51 = vadd.f32 %v5893_v40, %v2057_v12  ;;  %v8458_v12 = vld [vmem:[#allocation7_spill] sm:$0xff] }
 0x1d7   : > { %v2336_v44 = vpop.f32.mrf.mxu0  ;;  %v7395_v5 = vpop.f32.mrf.mxu1  ;;  %v2073_v47 = vadd.f32 %v8458_v12, %v7369_v36  ;;  %v2377_v23 = vadd.f32 %v5900_v27, %v2064_v61  ;;  %v2376_v54 = vadd.f32 %v2323_v11, %v2063_v37  ;;  %v8466_v27 = vld [vmem:[#allocation15_spill] sm:$0xff] }
 0x1d8   : > { %8456 = vst [vmem:[#allocation20_spill] sm:$0xff] %v7395_v5  ;;  %v2060_v5 = vadd.f32 %v7301_v14, %v7304_v45  ;;  %v2066_v45 = vadd.f32 %v7346_v46, %v7349_v8  ;;  %v2523_v38 = vadd.f32 %v5914_v49, %v2369_v6  ;;  %v2375_v46 = vadd.f32 %v2320_v28, %v2062_v43  ;;  %v8465_v49 = vld [vmem:[#allocation14_spill] sm:$0xff]  ;;  %v8467_v28 = vld [vmem:[#allocation16_spill] sm:$0xff] }
 0x1d9   : > { %v5905_v19 = vpop.f32.mrf.mxu0  ;;  %v7397_v7 = vpop.f32.mrf.mxu1  ;;  %v2524_v48 = vadd.f32 %v8462_v0, %v2370_v51  ;;  %v2525_v40 = vadd.f32 %v8465_v49, %v2371_v26  ;;  %v7454_v63 = vadd.f32 %v8466_v27, %v2377_v23  ;;  %v3036_v27 = vld [vmem:[#allocation3] sm:$0xf] }
 0x1da   : > { %8457 = vst [vmem:[#allocation21_spill] sm:$0xff] %v7397_v7  ;;  %v2061_v7 = vadd.f32 %v7311_v52, %v7314_v22  ;;  %v2368_v52 = vadd.f32 %v2291_v18, %v2055_v24  ;;  %v2373_v10 = vadd.f32 %v5896_v39, %v2060_v5  ;;  %v7451_v24 = vadd.f32 %v2461_v21, %v2372_v25 }
 0x1db   : > { %v2339_v33 = vpop.f32.mrf.mxu0  ;;  %v2493_v14 = vpop.f32.mrf.mxu1  ;;  %v2378_v39 = vadd.f32 %v5901_v58, %v2065_v60  ;;  %v7457_v59 = vadd.f32 %v8467_v28, %v2375_v46  ;;  %v2379_v6 = vadd.f32 %v2336_v44, %v2066_v45  ;;  %v8468_v60 = vld [vmem:[#allocation17_spill] sm:$0xff] }
 0x1dc   : > { %v2374_v42 = vadd.f32 %v5897_v1, %v2061_v7  ;;  %v8461_v7 = vld [vmem:[#allocation10_spill] sm:$0xff]  ;;  %v2522_v9 = vadd.f32 %v8463_v29, %v2368_v52  ;;  %v2527_v36 = vadd.f32 %v8464_v41, %v2373_v10  ;;  %v2381_v1 = vadd.f32 %v5904_v34, %v2068_v32 }
 0x1dd   : > { %v5908_v31 = vpop.f32.mrf.mxu0  ;;  %v5930_v8 = vpop.f32.mrf.mxu1  ;;  %v2521_v56 = vadd.f32 %v8461_v7, %v2367_v57  ;;  %v2380_v57 = vadd.f32 %v2339_v33, %v2067_v3  ;;  %v7462_v37 = vadd.f32 %v8468_v60, %v2378_v39  ;;  %v8469_v32 = vld [vmem:[#allocation18_spill] sm:$0xff]  ;;  %v8470_v26 = vld [vmem:[#allocation19_spill] sm:$0xff] }
 0x1de   : > { %v7449_v5 = vadd.f32 %v5919_v62, %v2374_v42  ;;  %v2382_v62 = vadd.f32 %v5905_v19, %v2069_v35  ;;  %v2385_v51 = vadd.f32 %v5908_v31, %v2072_v30  ;;  %v7465_v10 = vadd.f32 %v8469_v32, %v2376_v54  ;;  %v3045_v41 = vld [vmem:[#allocation3 + $0xc] sm:$0xf] }
 0x1df   : > { %v2352_v13 = vpop.f32.mrf.mxu0  ;;  %v2506_v15 = vpop.f32.mrf.mxu1  ;;  %v7468_v42 = vadd.f32 %v8470_v26, %v2381_v1  ;;  %v8471_v35 = vld [vmem:[#allocation20_spill] sm:$0xff]  ;;  %v7477_v12 = vadd.f32 %v2493_v14, %v2380_v57 }
 0x1e0   : > { %v2383_v52 = vadd.f32 %v2352_v13, %v2070_v50  ;;  %v7472_v3 = vadd.f32 %v8471_v35, %v2379_v6 }
 0x1e1   : > { %v5909_v22 = vpop.f32.mrf.mxu0  ;;  %v5931_v19 = vpop.f32.mrf.mxu1  ;;  %v8472_v30 = vld [vmem:[#allocation21_spill] sm:$0xff] }
 0x1e2   : > { %v2386_v25 = vadd.f32 %v5909_v22, %v2073_v47  ;;  %v7475_v50 = vadd.f32 %v8472_v30, %v2382_v62  ;;  %v7481_v46 = vadd.f32 %v2506_v15, %v2383_v52  ;;  %v3049_v52 = vld [vmem:[#allocation3 + $0x14] sm:$0x1] }
 0x1e3   : > { %v2355_v4 = vpop.f32.mrf.mxu0 }
 0x1e4   : > { %v7483_v20 = vadd.f32 %v2355_v4, %v2071_v53  ;;  %v7485_v7 = vadd.f32 %v5931_v19, %v2386_v25 }
 0x1e5   : > { %v5936_v55 = vpop.f32.mrf.mxu0 }
 0x1e6   : > { %v2677_v18 = vadd.f32 %v5936_v55, %v2523_v38  ;;  %v7479_v38 = vadd.f32 %v5930_v8, %v2385_v51 }
 0x1e7   : > { %v2596_v2 = vpop.f32.mrf.mxu0 }
 0x1e8   : > { %v2704_v61 = vadd.f32 %v7445_v16, %v2677_v18  ;;  %v2675_v43 = vadd.f32 %v2596_v2, %v2521_v56 }
 0x1e9   : > { %v5937_v21 = vpop.f32.mrf.mxu0 }
 0x1ea   : > { %v2724_v58 = vmax.f32 %v2704_v61, 0.0  ;;  %v2702_v11 = vadd.f32 %v7445_v16, %v2675_v43  ;;  %v2678_v34 = vadd.f32 %v5937_v21, %v2524_v48 }
 0x1eb   : > { %v2599_v44 = vpop.f32.mrf.mxu0 }
 0x1ec   : > { %v5540_v33 = vpack.c.bf16 %v2724_v58, %v2724_v58  ;;  %v2722_v31 = vmax.f32 %v2702_v11, 0.0  ;;  %v2705_v13 = vadd.f32 %v7445_v16, %v2678_v34  ;;  %v2676_v45 = vadd.f32 %v2599_v44, %v2522_v9 }
 0x1ed   : > { %v5940_v23 = vpop.f32.mrf.mxu0 }
 0x1ee   : > { %v2852_v22 = vshrl.u32 %v5540_v33, 16  ;;  %v5538_v47 = vpack.c.bf16 %v2722_v31, %v2722_v31  ;;  %v2725_v17 = vmax.f32 %v2705_v13, 0.0  ;;  %v2703_v56 = vadd.f32 %v7445_v16, %v2676_v45 }
 0x1ef   : > { %v2681_v0 = vadd.f32 %v5940_v23, %v2527_v36  ;;  %v2612_v48 = vpop.f32.mrf.mxu0  ;;  %v2855_v9 = vshll.u32 %v5540_v33, 16 }
 0x1f0   : > { %v2854_v29 = vrot.slane %v2852_v22, 7  ;;  %v2835_v14 = vshrl.u32 %v5538_v47, 16  ;;  %v5541_v55 = vpack.c.bf16 %v2725_v17, %v2725_v17  ;;  %v2838_v49 = vshll.u32 %v5538_v47, 16  ;;  %v3042_v47 = vld [vmem:[#allocation3 + $0x8] sm:$0x1] }
 0x1f1   : > { %v2723_v4 = vmax.f32 %v2703_v56, 0.0  ;;  %v2708_v53 = vadd.f32 %v7445_v16, %v2681_v0  ;;  %v2679_v18 = vadd.f32 %v2612_v48, %v2525_v40  ;;  %v5941_v39 = vpop.f32.mrf.mxu0 }
 0x1f2   : > { %v2857_v54 = vor.u32 %v2855_v9, %v2854_v29  ;;  %v2858_v36 = vrot.slane %v2854_v29, 4  ;;  %v2837_v1 = vrot.slane %v2835_v14, 7  ;;  %v2860_v2 = vshrl.u32 %v5541_v55, 16  ;;  %v3059_v14 = vld [vmem:[#allocation3 + $0x24] sm:$0xf] }
 0x1f3   : > { %v2863_v28 = vshll.u32 %v5541_v55, 16  ;;  %v5539_v15 = vpack.c.bf16 %v2723_v4, %v2723_v4  ;;  %v2728_v61 = vmax.f32 %v2708_v53, 0.0  ;;  %v2706_v43 = vadd.f32 %v7445_v16, %v2679_v18  ;;  %v2615_v6 = vpop.f32.mrf.mxu0 }
 0x1f4   : > { %v3046_v62 = vsel %vm7490_vm4, %v2857_v54, %v3045_v41  ;;  %v2840_v57 = vor.u32 %v2838_v49, %v2837_v1  ;;  %v2841_v51 = vrot.slane %v2837_v1, 4  ;;  %v2862_v21 = vrot.slane %v2860_v2, 7 }
 0x1f5   : > { %3047 = vst [vmem:[#allocation3 + $0xc] sm:$0xf] %v3046_v62  ;;  %v2843_v58 = vshrl.u32 %v5539_v15, 16  ;;  %v2846_v11 = vshll.u32 %v5539_v15, 16  ;;  %v5544_v34 = vpack.c.bf16 %v2728_v61, %v2728_v61  ;;  %v2726_v60 = vmax.f32 %v2706_v43, 0.0  ;;  %v5944_v32 = vpop.f32.mrf.mxu0 }
 0x1f6   : > { %v3037_v26 = vsel %vm7490_vm4, %v2840_v57, %v3036_v27  ;;  %v2865_v25 = vor.u32 %v2863_v28, %v2862_v21  ;;  %v2867_v44 = vrot.slane %v2862_v21, 4  ;;  %v2682_v19 = vadd.f32 %v5941_v39, %v7449_v5  ;;  %v3052_v28 = vld [vmem:[#allocation3 + $0x18] sm:$0xf] }
 0x1f7   : > { %3038 = vst [vmem:[#allocation3] sm:$0xf] %v3037_v26  ;;  %v2845_v33 = vrot.slane %v2843_v58, 7  ;;  %v2886_v31 = vshrl.u32 %v5544_v34, 16  ;;  %v2889_v13 = vshll.u32 %v5544_v34, 16  ;;  %v5542_v45 = vpack.c.bf16 %v2726_v60, %v2726_v60  ;;  %v2628_v35 = vpop.f32.mrf.mxu0 }
 0x1f8   : > { %v2866_v23 = vsel %vm6466_vm6, %v2858_v36, %v2865_v25  ;;  %v3050_v22 = vsel %vm7500_vm2, %v2867_v44, %v3049_v52  ;;  %v2709_v17 = vadd.f32 %v7445_v16, %v2682_v19  ;;  %v2680_v56 = vadd.f32 %v2615_v6, %v7451_v24  ;;  %v3063_v26 = vld [vmem:[#allocation3 + $0x2c] sm:$0x1] }
 0x1f9   : > { %3048 = vst.msk [vmem:[#allocation3 + $0x10] sm:$0xf] %vm2742_vm0, %v2866_v23  ;;  %3051 = vst [vmem:[#allocation3 + $0x14] sm:$0x1] %v3050_v22  ;;  %v2848_v5 = vor.u32 %v2846_v11, %v2845_v33  ;;  %v2850_v0 = vrot.slane %v2845_v33, 4  ;;  %v2888_v48 = vrot.slane %v2886_v31, 7  ;;  %v5945_v9 = vpop.f32.mrf.mxu0  ;;  %v2685_v4 = vadd.f32 %v5944_v32, %v7454_v63 }
 0x1fa   : > { %v2869_v29 = vshrl.u32 %v5542_v45, 16  ;;  %v2872_v55 = vshll.u32 %v5542_v45, 16  ;;  %v2729_v41 = vmax.f32 %v2709_v17, 0.0  ;;  %v2707_v49 = vadd.f32 %v7445_v16, %v2680_v56 }
 0x1fb   : > { %v2849_v53 = vsel %vm6466_vm6, %v2841_v51, %v2848_v5  ;;  %v3043_v24 = vsel %vm7500_vm2, %v2850_v0, %v3042_v47  ;;  %v2891_v18 = vor.u32 %v2889_v13, %v2888_v48  ;;  %v2892_v39 = vrot.slane %v2888_v48, 4  ;;  %v2631_v54 = vpop.f32.mrf.mxu0  ;;  %v3056_v48 = vld [vmem:[#allocation3 + $0x20] sm:$0x1] }
 0x1fc   : > { %3039 = vst.msk [vmem:[#allocation3 + $0x4] sm:$0xf] %vm2742_vm0, %v2849_v53  ;;  %3044 = vst [vmem:[#allocation3 + $0x8] sm:$0x1] %v3043_v24  ;;  %v2871_v36 = vrot.slane %v2869_v29, 7  ;;  %v5545_v1 = vpack.c.bf16 %v2729_v41, %v2729_v41  ;;  %v2727_v2 = vmax.f32 %v2707_v49, 0.0  ;;  %v2712_v27 = vadd.f32 %v7445_v16, %v2685_v4 }
 0x1fd   : > { %v3060_v63 = vsel %vm7490_vm4, %v2891_v18, %v3059_v14  ;;  %v2683_v15 = vadd.f32 %v2628_v35, %v7457_v59  ;;  %v2686_v61 = vadd.f32 %v5945_v9, %v7462_v37  ;;  %v2684_v43 = vadd.f32 %v2631_v54, %v7465_v10  ;;  %v5948_v6 = vpop.f32.mrf.mxu0  ;;  %v3073_v53 = vld [vmem:[#allocation3 + $0x3c] sm:$0xf] }
 0x1fe   : > { %3061 = vst [vmem:[#allocation3 + $0x24] sm:$0xf] %v3060_v63  ;;  %v2874_v62 = vor.u32 %v2872_v55, %v2871_v36  ;;  %v2875_v57 = vrot.slane %v2871_v36, 4  ;;  %v2894_v51 = vshrl.u32 %v5545_v1, 16  ;;  %v2897_v21 = vshll.u32 %v5545_v1, 16 }
 0x1ff   : > { %v5543_v52 = vpack.c.bf16 %v2727_v2, %v2727_v2  ;;  %v2732_v58 = vmax.f32 %v2712_v27, 0.0  ;;  %v2710_v11 = vadd.f32 %v7445_v16, %v2683_v15  ;;  %v2713_v34 = vadd.f32 %v7445_v16, %v2686_v61  ;;  %v2644_v60 = vpop.f32.mrf.mxu0 }
 0x200   : > { %v3053_v59 = vsel %vm7490_vm4, %v2874_v62, %v3052_v28  ;;  %v2896_v32 = vrot.slane %v2894_v51, 7  ;;  %v2711_v37 = vadd.f32 %v7445_v16, %v2684_v43  ;;  %v2689_v10 = vadd.f32 %v5948_v6, %v7468_v42  ;;  %v3066_v62 = vld [vmem:[#allocation3 + $0x30] sm:$0xf]  ;;  %v3077_v51 = vld [vmem:[#allocation3 + $0x44] sm:$0x1] }
 0x201   : > { %3054 = vst [vmem:[#allocation3 + $0x18] sm:$0xf] %v3053_v59  ;;  %v2877_v25 = vshrl.u32 %v5543_v52, 16  ;;  %v2880_v44 = vshll.u32 %v5543_v52, 16  ;;  %v5548_v19 = vpack.c.bf16 %v2732_v58, %v2732_v58  ;;  %v2730_v33 = vmax.f32 %v2710_v11, 0.0  ;;  %v5949_v31 = vpop.f32.mrf.mxu0 }
 0x202   : > { %v2899_v13 = vor.u32 %v2897_v21, %v2896_v32  ;;  %v2901_v45 = vrot.slane %v2896_v32, 4  ;;  %v2733_v35 = vmax.f32 %v2713_v34, 0.0  ;;  %v2731_v23 = vmax.f32 %v2711_v37, 0.0  ;;  %v3070_v32 = vld [vmem:[#allocation3 + $0x38] sm:$0x1] }
 0x203   : > { %v2879_v22 = vrot.slane %v2877_v25, 7  ;;  %v2920_v47 = vshrl.u32 %v5548_v19, 16  ;;  %v2923_v17 = vshll.u32 %v5548_v19, 16  ;;  %v5546_v56 = vpack.c.bf16 %v2730_v33, %v2730_v33  ;;  %v2647_v5 = vpop.f32.mrf.mxu0  ;;  %v2509_v19 = vpop.f32.mrf.mxu1 }
 0x204   : > { %v2900_v0 = vsel %vm6466_vm6, %v2892_v39, %v2899_v13  ;;  %v3064_v42 = vsel %vm7500_vm2, %v2901_v45, %v3063_v26  ;;  %v5549_v29 = vpack.c.bf16 %v2733_v35, %v2733_v35  ;;  %v5547_v9 = vpack.c.bf16 %v2731_v23, %v2731_v23 }
 0x205   : > { %3062 = vst.msk [vmem:[#allocation3 + $0x28] sm:$0xf] %vm2742_vm0, %v2900_v0  ;;  %3065 = vst [vmem:[#allocation3 + $0x2c] sm:$0x1] %v3064_v42  ;;  %v2882_v14 = vor.u32 %v2880_v44, %v2879_v22  ;;  %v2884_v55 = vrot.slane %v2879_v22, 4  ;;  %v2922_v41 = vrot.slane %v2920_v47, 7  ;;  %v5952_v4 = vpop.f32.mrf.mxu0  ;;  %v2687_v21 = vadd.f32 %v2644_v60, %v7472_v3 }
 0x206   : > { %v2903_v49 = vshrl.u32 %v5546_v56, 16  ;;  %v2906_v24 = vshll.u32 %v5546_v56, 16  ;;  %v2928_v18 = vshrl.u32 %v5549_v29, 16  ;;  %v2931_v54 = vshll.u32 %v5549_v29, 16 }
 0x207   : > { %v2911_v36 = vshrl.u32 %v5547_v9, 16  ;;  %v2883_v39 = vsel %vm6466_vm6, %v2875_v57, %v2882_v14  ;;  %v3057_v1 = vsel %vm7500_vm2, %v2884_v55, %v3056_v48  ;;  %v2925_v2 = vor.u32 %v2923_v17, %v2922_v41  ;;  %v2660_v43 = vpop.f32.mrf.mxu0 }
 0x208   : > { %v2926_v27 = vrot.slane %v2922_v41, 4  ;;  %3055 = vst.msk [vmem:[#allocation3 + $0x1c] sm:$0xf] %vm2742_vm0, %v2883_v39  ;;  %3058 = vst [vmem:[#allocation3 + $0x20] sm:$0x1] %v3057_v1  ;;  %v2905_v63 = vrot.slane %v2903_v49, 7  ;;  %v2716_v57 = vadd.f32 %v7445_v16, %v2689_v10  ;;  %v2690_v52 = vadd.f32 %v5949_v31, %v7475_v50 }
 0x209   : > { %v2930_v28 = vrot.slane %v2928_v18, 7  ;;  %v2913_v15 = vrot.slane %v2911_v36, 7  ;;  %v2914_v61 = vshll.u32 %v5547_v9, 16  ;;  %v3074_v6 = vsel %vm7490_vm4, %v2925_v2, %v3073_v53  ;;  %v5953_v10 = vpop.f32.mrf.mxu0  ;;  %v3080_v39 = vld [vmem:[#allocation3 + $0x48] sm:$0xf] }
 0x20a   : > { %3075 = vst [vmem:[#allocation3 + $0x3c] sm:$0xf] %v3074_v6  ;;  %v2908_v58 = vor.u32 %v2906_v24, %v2905_v63  ;;  %v2909_v11 = vrot.slane %v2905_v63, 4  ;;  %v2736_v25 = vmax.f32 %v2716_v57, 0.0  ;;  %v2714_v44 = vadd.f32 %v7445_v16, %v2687_v21 }
 0x20b   : > { %v2933_v34 = vor.u32 %v2931_v54, %v2930_v28  ;;  %v2935_v59 = vrot.slane %v2930_v28, 4  ;;  %v2916_v37 = vor.u32 %v2914_v61, %v2913_v15  ;;  %v2918_v26 = vrot.slane %v2913_v15, 4  ;;  %v3091_v15 = vld [vmem:[#allocation3 + $0x5c] sm:$0x1]  ;;  %v2663_v21 = vpop.f32.mrf.mxu0 }
 0x20c   : > { %v3067_v33 = vsel %vm7490_vm4, %v2908_v58, %v3066_v62  ;;  %v2717_v60 = vadd.f32 %v7445_v16, %v2690_v52  ;;  %v5552_v45 = vpack.c.bf16 %v2736_v25, %v2736_v25  ;;  %v2734_v35 = vmax.f32 %v2714_v44, 0.0  ;;  %v3084_v25 = vld [vmem:[#allocation3 + $0x50] sm:$0x1] }
 0x20d   : > { %v2934_v3 = vsel %vm6466_vm6, %v2926_v27, %v2933_v34  ;;  %v3078_v50 = vsel %vm7500_vm2, %v2935_v59, %v3077_v51  ;;  %3068 = vst [vmem:[#allocation3 + $0x30] sm:$0xf] %v3067_v33  ;;  %v2917_v31 = vsel %vm6466_vm6, %v2909_v11, %v2916_v37  ;;  %v3071_v13 = vsel %vm7500_vm2, %v2918_v26, %v3070_v32 }
 0x20e   : > { %3076 = vst.msk [vmem:[#allocation3 + $0x40] sm:$0xf] %vm2742_vm0, %v2934_v3  ;;  %3079 = vst [vmem:[#allocation3 + $0x44] sm:$0x1] %v3078_v50  ;;  %v2737_v23 = vmax.f32 %v2717_v60, 0.0  ;;  %v2688_v22 = vadd.f32 %v2647_v5, %v7477_v12  ;;  %v2693_v47 = vadd.f32 %v5952_v4, %v7479_v38  ;;  %v2691_v17 = vadd.f32 %v2660_v43, %v7481_v46 }
 0x20f   : > { %3069 = vst.msk [vmem:[#allocation3 + $0x34] sm:$0xf] %vm2742_vm0, %v2917_v31  ;;  %3072 = vst [vmem:[#allocation3 + $0x38] sm:$0x1] %v3071_v13  ;;  %v2538_v56 = vadd.f32 %v2509_v19, %v7483_v20  ;;  %v2954_v0 = vshrl.u32 %v5552_v45, 16  ;;  %v5550_v42 = vpack.c.bf16 %v2734_v35, %v2734_v35  ;;  %v2694_v48 = vadd.f32 %v5953_v10, %v7485_v7 }
 0x210   : > { %v5553_v29 = vpack.c.bf16 %v2737_v23, %v2737_v23  ;;  %v2715_v9 = vadd.f32 %v7445_v16, %v2688_v22  ;;  %v2720_v14 = vadd.f32 %v7445_v16, %v2693_v47  ;;  %v2718_v55 = vadd.f32 %v7445_v16, %v2691_v17  ;;  %v3087_v5 = vld [vmem:[#allocation3 + $0x54] sm:$0xf]  ;;  %v3101_v31 = vld [vmem:[#allocation3 + $0x6c] sm:$0xf]  ;;  %v3094_v13 = vld [vmem:[#allocation3 + $0x60] sm:$0xf] }
 0x211   : > { %v2956_v41 = vrot.slane %v2954_v0, 7  ;;  %v2957_v49 = vshll.u32 %v5552_v45, 16  ;;  %v2937_v12 = vshrl.u32 %v5550_v42, 16  ;;  %v2721_v38 = vadd.f32 %v7445_v16, %v2694_v48 }
 0x212   : > { %v2940_v46 = vshll.u32 %v5550_v42, 16  ;;  %v2962_v4 = vshrl.u32 %v5553_v29, 16  ;;  %v2735_v20 = vmax.f32 %v2715_v9, 0.0  ;;  %v2740_v53 = vmax.f32 %v2720_v14, 0.0 }
 0x213   : > { %v2959_v24 = vor.u32 %v2957_v49, %v2956_v41  ;;  %v2939_v18 = vrot.slane %v2937_v12, 7  ;;  %v2965_v7 = vshll.u32 %v5553_v29, 16  ;;  %v2738_v54 = vmax.f32 %v2718_v55, 0.0  ;;  %v3105_v29 = vld [vmem:[#allocation3 + $0x74] sm:$0x1] }
 0x214   : > { %v2960_v36 = vrot.slane %v2956_v41, 4  ;;  %v2964_v1 = vrot.slane %v2962_v4, 7  ;;  %v5551_v2 = vpack.c.bf16 %v2735_v20, %v2735_v20  ;;  %v5556_v27 = vpack.c.bf16 %v2740_v53, %v2740_v53 }
 0x215   : > { %v3088_v63 = vsel %vm7490_vm4, %v2959_v24, %v3087_v5  ;;  %v2942_v28 = vor.u32 %v2940_v46, %v2939_v18  ;;  %v5554_v61 = vpack.c.bf16 %v2738_v54, %v2738_v54  ;;  %v2741_v43 = vmax.f32 %v2721_v38, 0.0  ;;  %v3098_v46 = vld [vmem:[#allocation3 + $0x68] sm:$0x1] }
 0x216   : > { %3089 = vst [vmem:[#allocation3 + $0x54] sm:$0xf] %v3088_v63  ;;  %v2967_v6 = vor.u32 %v2965_v7, %v2964_v1  ;;  %v2969_v62 = vrot.slane %v2964_v1, 4  ;;  %v2945_v51 = vshrl.u32 %v5551_v2, 16  ;;  %v2948_v57 = vshll.u32 %v5551_v2, 16 }
 0x217   : > { %v3081_v52 = vsel %vm7490_vm4, %v2942_v28, %v3080_v39  ;;  %v2988_v58 = vshrl.u32 %v5556_v27, 16  ;;  %v2991_v11 = vshll.u32 %v5556_v27, 16  ;;  %v2971_v34 = vshrl.u32 %v5554_v61, 16 }
 0x218   : > { %3082 = vst [vmem:[#allocation3 + $0x48] sm:$0xf] %v3081_v52  ;;  %v2968_v59 = vsel %vm6466_vm6, %v2960_v36, %v2967_v6  ;;  %v3092_v32 = vsel %vm7500_vm2, %v2969_v62, %v3091_v15  ;;  %v2947_v37 = vrot.slane %v2945_v51, 7  ;;  %v2974_v26 = vshll.u32 %v5554_v61, 16 }
 0x219   : > { %3090 = vst.msk [vmem:[#allocation3 + $0x58] sm:$0xf] %vm2742_vm0, %v2968_v59  ;;  %3093 = vst [vmem:[#allocation3 + $0x5c] sm:$0x1] %v3092_v32  ;;  %v2990_v44 = vrot.slane %v2988_v58, 7  ;;  %v2973_v19 = vrot.slane %v2971_v34, 7  ;;  %v5557_v33 = vpack.c.bf16 %v2741_v43, %v2741_v43  ;;  %v2692_v3 = vadd.f32 %v2663_v21, %v2538_v56 }
 0x21a   : > { %v2943_v50 = vrot.slane %v2939_v18, 4  ;;  %v2950_v60 = vor.u32 %v2948_v57, %v2947_v37  ;;  %v2952_v10 = vrot.slane %v2947_v37, 4 }
 0x21b   : > { %v2993_v45 = vor.u32 %v2991_v11, %v2990_v44  ;;  %v2976_v35 = vor.u32 %v2974_v26, %v2973_v19  ;;  %v2996_v47 = vshrl.u32 %v5557_v33, 16  ;;  %v2719_v0 = vadd.f32 %v7445_v16, %v2692_v3 }
 0x21c   : > { %v2951_v23 = vsel %vm6466_vm6, %v2943_v50, %v2950_v60  ;;  %v3085_v22 = vsel %vm7500_vm2, %v2952_v10, %v3084_v25  ;;  %v2999_v48 = vshll.u32 %v5557_v33, 16  ;;  %v2994_v14 = vrot.slane %v2990_v44, 4 }
 0x21d   : > { %3083 = vst.msk [vmem:[#allocation3 + $0x4c] sm:$0xf] %vm2742_vm0, %v2951_v23  ;;  %3086 = vst [vmem:[#allocation3 + $0x50] sm:$0x1] %v3085_v22  ;;  %v3102_v17 = vsel %vm7490_vm4, %v2993_v45, %v3101_v31  ;;  %v3095_v56 = vsel %vm7490_vm4, %v2976_v35, %v3094_v13  ;;  %v2998_v42 = vrot.slane %v2996_v47, 7  ;;  %v2739_v9 = vmax.f32 %v2719_v0, 0.0 }
 0x21e   : > { %3103 = vst [vmem:[#allocation3 + $0x6c] sm:$0xf] %v3102_v17  ;;  %3096 = vst [vmem:[#allocation3 + $0x60] sm:$0xf] %v3095_v56  ;;  %v2977_v4 = vrot.slane %v2973_v19, 4 }
 0x21f   : > { %v3001_v55 = vor.u32 %v2999_v48, %v2998_v42  ;;  %v3003_v41 = vrot.slane %v2998_v42, 4  ;;  %v5555_v49 = vpack.c.bf16 %v2739_v9, %v2739_v9 }
 0x221   : > { %v3002_v12 = vsel %vm6466_vm6, %v2994_v14, %v3001_v55  ;;  %v3106_v38 = vsel %vm7500_vm2, %v3003_v41, %v3105_v29  ;;  %v2979_v16 = vshrl.u32 %v5555_v49, 16  ;;  %v2982_v5 = vshll.u32 %v5555_v49, 16 }
 0x222   : > { %3104 = vst.msk [vmem:[#allocation3 + $0x70] sm:$0xf] %vm2742_vm0, %v3002_v12  ;;  %3107 = vst [vmem:[#allocation3 + $0x74] sm:$0x1] %v3106_v38 }
 0x223   : > { %v2981_v8 = vrot.slane %v2979_v16, 7 }
 0x224   : > { %3111 = sbr.rel (%p5373_p11) target bundleno = 556 (0x22c), region = 72 }
 0x225   : > { %v2984_v20 = vor.u32 %v2982_v5, %v2981_v8  ;;  %v2986_v53 = vrot.slane %v2981_v8, 4 }
 0x227   : > { %v2985_v24 = vsel %vm6466_vm6, %v2977_v4, %v2984_v20  ;;  %v3099_v18 = vsel %vm7500_vm2, %v2986_v53, %v3098_v46 }
 0x228   : > { %3097 = vst.msk [vmem:[#allocation3 + $0x64] sm:$0xf] %vm2742_vm0, %v2985_v24  ;;  %3100 = vst [vmem:[#allocation3 + $0x68] sm:$0x1] %v3099_v18 }
 0x229   : > { %v6278_v7 = vmov 0  }
 0x22a   : > { %3112 = vst.msk [vmem:[#allocation3] sm:$0xf] %vm2742_vm0, %v6278_v7  ;;  %3113 = vst.msk [vmem:[#allocation3 + $0x4] sm:$0xf] %vm2742_vm0, %v6278_v7 }
 0x22b   : > { %3114 = vst.msk [vmem:[#allocation3 + $0x8] sm:$0x1] %vm2745_vm1, %v6278_v7 }
 0x22c PF: > { %p5374_p12 = scmp.lt.s32.totalorder %s690_s15, 16 }
 0x22e   : > { %3118 = sbr.rel (%p5374_p12) target bundleno = 566 (0x236), region = 76 }
 0x233   : > { %v6279_v40 = vmov 0  }
 0x234   : > { %3120 = vst.msk [vmem:[#allocation3 + $0x6c] sm:$0xf] %vm2742_vm0, %v6279_v40  ;;  %3121 = vst.msk [vmem:[#allocation3 + $0x70] sm:$0xf] %vm2742_vm0, %v6279_v40 }
 0x235   : > { %3122 = vst.msk [vmem:[#allocation3 + $0x74] sm:$0x1] %vm2745_vm1, %v6279_v40 }
 0x236 PF: > { %v5375_v30 = vld [vmem:[%s8418_s3 + $0xc] sm:$0xf]  ;;  %vm3211_vm3 = vcmask 1043456   ;;  %v7612_v54 = vld [vmem:[#allocation3 + $0xc] sm:$0xff]   ;;  %vm3186_vm5 = vcmask 64512   ;;  %v7625_v27 = vld [vmem:[#allocation3 + $0x24] sm:$0xff]  }
 0x237   : > { %6161 = vmatprep.subr.msk.bf16.mxu1 %vm3211_vm3, %v5375_v30  ;;  %v3213_v36 = vsel %vm3211_vm3, %v5375_v30, 0  ;;  %5956 = vmatprep.mubr.msk.bf16.mxu1 %vm3186_vm5, %v7612_v54  ;;  %v7618_v39 = vld [vmem:[#allocation3 + $0x18] sm:$0xff]   ;;  %v3143_v1 = vld [vmem:[%s8418_s3] sm:$0xf]  ;;  %v5401_v28 = vld [vmem:[%s8418_s3 + $0x18] sm:$0xf] }
 0x238   : > { %5955 = vmatpush3.bf16.msra.mxu1 %v3213_v36  ;;  %v3321_v2 = vsel %vm3211_vm3, %v3143_v1, 0  ;;  %5992 = vmatprep.mubr.msk.bf16.mxu0 %vm3186_vm5, %v7618_v39  ;;  %v7633_v63 = vld [vmem:[#allocation3 + $0x30] sm:$0xff]   ;;  %v7638_v15 = vld [vmem:[#allocation3 + $0x3c] sm:$0xff]   ;;  %v3431_v61 = vsel %vm3211_vm3, %v5401_v28, 0  ;;  %v3549_v51 = vld [vmem:[#allocation3 + $0xc] sm:$0xf] }
 0x239   : > { %6162 = vmatprep.subr.msk.bf16.mxu1 %vm3211_vm3, %v3143_v1  ;;  %6163 = vmatprep.subr.msk.bf16.mxu0 %vm3211_vm3, %v5401_v28  ;;  %v5411_v43 = vld [vmem:[%s8418_s3 + $0x4] sm:$0xf]  ;;  %v5428_v6 = vld [vmem:[%s8418_s3 + $0x10] sm:$0xf]  ;;  %v7651_v57 = vld [vmem:[#allocation3 + $0x10] sm:$0xf] }
 0x23a   : > { %5991 = vmatpush3.bf16.msra.mxu0 %v3431_v61  ;;  %v3967_v62 = vsel %vm3211_vm3, %v5428_v6, 0  ;;  %v7655_v21 = vld [vmem:[#allocation3 + $0x14] sm:$0x1]  ;;  %v3601_v52 = vshrl.u32 %v3549_v51, 16  ;;  %v3604_v58 = vshll.u32 %v3549_v51, 16  ;;  %v3610_v11 = vshll.u32 %v7651_v57, 16 }
 0x23b   : > { %5957 = vmatmul.mubr.msk.bf16.vlgmr.msra.gmra.mxu1 %vm3186_vm5, %v7618_v39  ;;  %6165 = vmatprep.subr.msk.bf16.mxu0 %vm3211_vm3, %v5428_v6  ;;  %v3614_v34 = vshrl.u32 %v7651_v57, 16  ;;  %v3552_v25 = vld [vmem:[#allocation3 + $0x18] sm:$0xf]  ;;  %v3620_v44 = vshll.u32 %v7655_v21, 16  ;;  %v7666_v19 = vld [vmem:[#allocation3 + $0x1c] sm:$0xf] }
 0x23c   : > { %5973 = vmatpush3.bf16.msra.mxu1 %v3321_v2  ;;  %5960 = vmatprep.mubr.msk.bf16.mxu1 %vm3186_vm5, %v7625_v27  ;;  %v3603_v59 = vrot.slane %v3601_v52, 4  ;;  %v3606_v32 = vrot.slane %v3604_v58, 5  ;;  %v3612_v37 = vrot.slane %v3610_v11, 5  ;;  %v7668_v33 = vld [vmem:[#allocation3 + $0x48] sm:$0xff]   ;;  %v3625_v60 = vshrl.u32 %v3552_v25, 16  ;;  %v7670_v31 = vld [vmem:[#allocation3 + $0x54] sm:$0xff]  }
 0x23d   : > { %6164 = vmatprep.subr.msk.bf16.mxu1 %vm3211_vm3, %v5411_v43  ;;  %5993 = vmatmul.mubr.msk.bf16.vlgmr.msra.gmra.mxu0 %vm3186_vm5, %v7625_v27  ;;  %v3616_v26 = vrot.slane %v3614_v34, 4  ;;  %v3628_v10 = vshll.u32 %v3552_v25, 16  ;;  %v3634_v13 = vshll.u32 %v7666_v19, 16  ;;  %v3638_v45 = vshrl.u32 %v7666_v19, 16  ;;  %v7677_v47 = vld [vmem:[%s8418_s3 + $0x8] sm:$0xf] }
 0x23e   : > { %6027 = vmatpush3.bf16.msra.mxu0 %v3967_v62  ;;  %5996 = vmatprep.mubr.msk.bf16.mxu0 %vm3186_vm5, %v7633_v63  ;;  %v3607_v3 = vor.u32 %v3606_v32, %v3603_v59  ;;  %v3622_v22 = vrot.slane %v3620_v44, 5  ;;  %v7681_v17 = vld [vmem:[#allocation3 + $0x20] sm:$0x1]  ;;  %v3627_v56 = vrot.slane %v3625_v60, 4  ;;  %v3555_v9 = vld [vmem:[#allocation3 + $0x24] sm:$0xf] }
 0x23f   : > { %v3617_v50 = vor.u32 %v3616_v26, %v3612_v37  ;;  %v3630_v0 = vrot.slane %v3628_v10, 5  ;;  %6167 = vmatprep.subr.msk.bf16.mxu0 %vm3211_vm3, %v7677_v47  ;;  %v3546_v42 = vld [vmem:[#allocation3] sm:$0xf]  ;;  %v7691_v48 = vrot.slane %v3634_v13, 5  ;;  %v3640_v29 = vrot.slane %v3638_v45, 4 }
 0x240   : > { %v3608_v35 = vrot.slane %v3607_v3, 4  ;;  %v3644_v49 = vshll.u32 %v7681_v17, 16  ;;  %v7698_v12 = vld [vmem:[#allocation3 + $0x28] sm:$0xf]  ;;  %v6234_v38 = vld [vmem:[#allocation3 + $0x60] sm:$0xff]   ;;  %v3577_v8 = vshrl.u32 %v3546_v42, 16 }
 0x241   : > { %v3618_v23 = vrot.slane %v3617_v50, 4  ;;  %v3631_v16 = vor.u32 %v3630_v0, %v3627_v56  ;;  %v6235_v5 = vld [vmem:[#allocation3] sm:$0xff]   ;;  %v3580_v46 = vshll.u32 %v3546_v42, 16  ;;  %v3649_v4 = vshrl.u32 %v3555_v9, 16  ;;  %v3558_v53 = vld [vmem:[#allocation3 + $0x30] sm:$0xf] }
 0x242   : > { %v3613_v55 = vsel %vm6670_vm12, %v3608_v35, %v3612_v37  ;;  %v3652_v20 = vshll.u32 %v3555_v9, 16  ;;  %v3819_v24 = vsel %vm3211_vm3, %v5411_v43, 0  ;;  %v3641_v7 = vor.u32 %v3640_v29, %v7691_v48  ;;  %v7704_v40 = vld [vmem:[#allocation3 + $0x4] sm:$0xf]  ;;  %v7706_v30 = vld [vmem:[#allocation3 + $0x2c] sm:$0x1] }
 0x243   : > { %5961 = vmatmul.mubr.msk.bf16.gmra.mxu1 %vm3186_vm5, %v7633_v63  ;;  %v3623_v41 = vsel %vm6670_vm12, %v3618_v23, %v3622_v22  ;;  %v3658_v36 = vshll.u32 %v7698_v12, 16  ;;  %v7709_v1 = vrot.slane %v3644_v49, 5  ;;  %v3651_v2 = vrot.slane %v3649_v4, 4  ;;  %v7712_v6 = vld [vmem:[#allocation3 + $0x34] sm:$0xf]  ;;  %v6236_v49 = vld [vmem:[#allocation3 + $0x6c] sm:$0xff]  }
 0x244   : > { %5964 = vmatprep.mubr.msk.bf16.mxu1 %vm3186_vm5, %v7638_v15  ;;  %v7701_v18 = vcombine.low %v3613_v55, %v3623_v41  ;;  %v3654_v28 = vrot.slane %v3652_v20, 5  ;;  %v3662_v61 = vshrl.u32 %v7698_v12, 16  ;;  %v3632_v43 = vrot.slane %v3631_v16, 4  ;;  %v3561_v32 = vld [vmem:[#allocation3 + $0x3c] sm:$0xf] }
 0x245   : > { %5997 = vmatmul.mubr.msk.bf16.gmra.mxu0 %vm3186_vm5, %v7638_v15  ;;  %v7715_v62 = vrot.slane %v3577_v8, 4  ;;  %v7717_v51 = vrot.slane %v3658_v36, 5  ;;  %v3673_v52 = vshrl.u32 %v3558_v53, 16  ;;  %v7722_v58 = vrot.slane %v3580_v46, 5  ;;  %v7726_v26 = vld [vmem:[#allocation3 + $0x8] sm:$0x1] }
 0x246   : > { %6000 = vmatprep.mubr.msk.bf16.mxu0 %vm3186_vm5, %v7668_v33  ;;  %v3586_v11 = vshll.u32 %v7704_v40, 16  ;;  %v3664_v34 = vrot.slane %v3662_v61, 4  ;;  %v3676_v59 = vshll.u32 %v3558_v53, 16  ;;  %v3642_v37 = vrot.slane %v3641_v7, 4  ;;  %v7733_v45 = vld [vmem:[#allocation3 + $0x40] sm:$0xf] }
 0x247   : > { %v3668_v25 = vshll.u32 %v7706_v30, 16  ;;  %v3682_v44 = vshll.u32 %v7712_v6, 16  ;;  %v3686_v3 = vshrl.u32 %v7712_v6, 16  ;;  %v3590_v50 = vshrl.u32 %v7704_v40, 16  ;;  %v7735_v35 = vld [vmem:[#allocation3 + $0x38] sm:$0x1] }
 0x248   : > { %v3655_v60 = vor.u32 %v3654_v28, %v3651_v2  ;;  %v3665_v10 = vor.u32 %v3664_v34, %v7717_v51  ;;  %v3675_v13 = vrot.slane %v3673_v52, 4  ;;  %v3678_v23 = vrot.slane %v3676_v59, 5  ;;  %v7746_v9 = vld [vmem:[%s8418_s3 + $0x1c] sm:$0xf]  ;;  %v7763_v2 = vld [vmem:[#allocation3 + $0x44] sm:$0x1] }
 0x249   : > { %v7737_v22 = vrot.slane %v3682_v44, 5  ;;  %v3688_v56 = vrot.slane %v3686_v3, 4  ;;  %v3697_v0 = vshrl.u32 %v3561_v32, 16  ;;  %v3637_v42 = vsel %vm6670_vm12, %v3632_v43, %v7691_v48  ;;  %v7758_v7 = vld [vmem:[#allocation3 + $0x4c] sm:$0xf] }
 0x24a   : > { %v3596_v29 = vshll.u32 %v7726_v26, 16  ;;  %v7750_v55 = vsel %vm3211_vm3, %v7677_v47, 0  ;;  %v3700_v41 = vshll.u32 %v3561_v32, 16  ;;  %v3670_v16 = vrot.slane %v3668_v25, 5  ;;  %v7784_v3 = vld [vmem:[#allocation3 + $0x58] sm:$0xf] }
 0x24b   : > { %5965 = vmatmul.mubr.msk.bf16.gmra.mxu1 %vm3186_vm5, %v7668_v33  ;;  %v3699_v8 = vrot.slane %v3697_v0, 4  ;;  %v3706_v48 = vshll.u32 %v7733_v45, 16  ;;  %v3656_v46 = vrot.slane %v3655_v60, 4  ;;  %v3692_v4 = vshll.u32 %v7735_v35, 16 }
 0x24c   : > { %5968 = vmatprep.mubr.msk.bf16.mxu1 %vm3186_vm5, %v7670_v31  ;;  %v3702_v20 = vrot.slane %v3700_v41, 5  ;;  %v3710_v53 = vshrl.u32 %v7733_v45, 16  ;;  %v3666_v47 = vrot.slane %v3665_v10, 4  ;;  %v3679_v36 = vor.u32 %v3678_v23, %v3675_v13  ;;  %v7789_v41 = vld [vmem:[#allocation3 + $0x50] sm:$0x1] }
 0x24d   : > { %6001 = vmatmul.mubr.msk.bf16.gmra.mxu0 %vm3186_vm5, %v7670_v31  ;;  %v7765_v28 = vrot.slane %v3706_v48, 5  ;;  %v7769_v61 = vrot.slane %v3586_v11, 5  ;;  %v3592_v59 = vrot.slane %v3590_v50, 4  ;;  %v3694_v11 = vrot.slane %v3692_v4, 5  ;;  %v3570_v4 = vld [vmem:[#allocation3 + $0x60] sm:$0xf] }
 0x24e   : > { %6004 = vmatprep.mubr.msk.bf16.mxu0 %vm3186_vm5, %v6234_v38  ;;  %v3703_v43 = vor.u32 %v3702_v20, %v3699_v8  ;;  %v3712_v52 = vrot.slane %v3710_v53, 4  ;;  %v3716_v44 = vshll.u32 %v7763_v2, 16  ;;  %v3671_v50 = vsel %vm6670_vm12, %v3666_v47, %v3670_v16 }
 0x24f   : > { %v3680_v60 = vrot.slane %v3679_v36, 4  ;;  %v3734_v13 = vshrl.u32 %v7758_v7, 16  ;;  %v3754_v8 = vshll.u32 %v7784_v3, 16  ;;  %v3583_v20 = vor.u32 %v7722_v58, %v7715_v62  ;;  %v7816_v58 = vld [vmem:[%s8418_s3 + $0x20] sm:$0xf] }
 0x250   : > { %v3713_v25 = vor.u32 %v3712_v52, %v7765_v28  ;;  %v3704_v23 = vrot.slane %v3703_v43, 4  ;;  %v3718_v16 = vrot.slane %v3716_v44, 5  ;;  %v3593_v43 = vor.u32 %v3592_v59, %v7769_v61 }
 0x251   : > { %v3756_v36 = vrot.slane %v3754_v8, 5  ;;  %v3685_v52 = vsel %vm6670_vm12, %v3680_v60, %v7737_v22 }
 0x252   : > { %v3594_v60 = vrot.slane %v3593_v43, 4 }
 0x253   : > { %5969 = vmatmul.mubr.msk.bf16.gmra.mxu1 %vm3186_vm5, %v6234_v38  ;;  %v3647_v38 = vsel %vm6670_vm12, %v3642_v37, %v7709_v1  ;;  %v3689_v1 = vor.u32 %v3688_v56, %v7737_v22  ;;  %v3730_v37 = vshll.u32 %v7758_v7, 16 }
 0x254   : > { %5974 = vmatprep.mubr.msk.bf16.mxu1 %vm3186_vm5, %v6235_v5  ;;  %v3564_v5 = vld [vmem:[#allocation3 + $0x48] sm:$0xf] }
 0x255   : > { %v3721_v34 = vshrl.u32 %v3564_v5, 16  ;;  %6005 = vmatmul.mubr.msk.bf16.gmra.mxu0 %vm3186_vm5, %v6236_v49  ;;  %v3724_v32 = vshll.u32 %v3564_v5, 16  ;;  %v3690_v10 = vrot.slane %v3689_v1, 4  ;;  %v7791_v49 = vrot.slane %v3730_v37, 5  ;;  %v7801_v1 = vld [vmem:[#allocation3 + $0x64] sm:$0xf] }
 0x256   : > { %6028 = vmatprep.mubr.msk.bf16.mxu0 %vm3186_vm5, %v7701_v18  ;;  %v3714_v5 = vrot.slane %v3713_v25, 4 }
 0x257   : > { %v3723_v56 = vrot.slane %v3721_v34, 4  ;;  %v7811_v34 = vld [vmem:[#allocation3 + $0x5c] sm:$0x1] }
 0x258   : > { %v3719_v37 = vsel %vm6670_vm12, %v3714_v5, %v3718_v16 }
 0x25b   : > { %5975 = vmatmul.mubr.msk.bf16.vlgmr.msra.gmra.mxu1 %vm3186_vm5, %v7612_v54  ;;  %v7772_v54 = vcombine.low %v3637_v42, %v3647_v38  ;;  %v3736_v38 = vrot.slane %v3734_v13, 4 }
 0x25c   : > { %6009 = vmatpush3.bf16.msra.mxu1 %v3819_v24  ;;  %5978 = vmatprep.mubr.msk.bf16.mxu1 %vm3186_vm5, %v7618_v39  ;;  %v3567_v24 = vld [vmem:[#allocation3 + $0x54] sm:$0xf]  ;;  %v3661_v39 = vsel %vm6670_vm12, %v3656_v46, %v7717_v51  ;;  %v3726_v51 = vrot.slane %v3724_v32, 5  ;;  %v3758_v46 = vshrl.u32 %v7784_v3, 16  ;;  %v3740_v32 = vshll.u32 %v7789_v41, 16 }
 0x25d   : > { %6166 = vmatprep.subr.msk.bf16.mxu1 %vm3211_vm3, %v7746_v9  ;;  %v3745_v0 = vshrl.u32 %v3567_v24, 16  ;;  %v3748_v42 = vshll.u32 %v3567_v24, 16  ;;  %v7794_v48 = vcombine.low %v3661_v39, %v3671_v50  ;;  %6029 = vmatmul.mubr.msk.bf16.vlgmr.msra.gmra.mxu0 %vm3186_vm5, %v7772_v54  ;;  %v3737_v22 = vor.u32 %v3736_v38, %v7791_v49 }
 0x25e   : > { %v3760_v62 = vrot.slane %v3758_v46, 4  ;;  %v3727_v59 = vor.u32 %v3726_v51, %v3723_v56  ;;  %6063 = vmatpush3.bf16.msra.mxu0 %v7750_v55  ;;  %v3935_v24 = vshrl.u32 %v3570_v4, 16  ;;  %v3938_v39 = vshll.u32 %v3570_v4, 16 }
 0x25f   : > { %v3747_v53 = vrot.slane %v3745_v0, 4  ;;  %v3750_v47 = vrot.slane %v3748_v42, 5  ;;  %6032 = vmatprep.mubr.msk.bf16.mxu0 %vm3186_vm5, %v7794_v48  ;;  %v3948_v50 = vshrl.u32 %v7801_v1, 16  ;;  %6169 = vmatprep.subr.msk.bf16.mxu0 %vm3211_vm3, %v7816_v58  ;;  %v3584_v55 = vrot.slane %v3583_v20, 4  ;;  %v7843_v20 = vld [vmem:[#allocation3 + $0x68] sm:$0x1] }
 0x260   : > { %v3761_v44 = vor.u32 %v3760_v62, %v3756_v36  ;;  %v3728_v56 = vrot.slane %v3727_v59, 4  ;;  %v3738_v0 = vrot.slane %v3737_v22, 4  ;;  %v3742_v42 = vrot.slane %v3740_v32, 5 }
 0x261   : > { %v3751_v25 = vor.u32 %v3750_v47, %v3747_v53  ;;  %v3937_v51 = vrot.slane %v3935_v24, 4  ;;  %v3940_v38 = vrot.slane %v3938_v39, 5  ;;  %v3950_v5 = vrot.slane %v3948_v50, 4 }
 0x262   : > { %v3762_v46 = vrot.slane %v3761_v44, 4  ;;  %v4266_v62 = vrot.slane %v7704_v40, 5  ;;  %v4273_v40 = vrot.slane %v7651_v57, 5  ;;  %v4231_v44 = vld [vmem:[#allocation3 + $0xc] sm:$0xe]  ;;  %v4115_v57 = vsel %vm3211_vm3, %v7746_v9, 0 }
 0x263   : > { %5979 = vmatmul.mubr.msk.bf16.gmra.mxu1 %vm3186_vm5, %v7625_v27  ;;  %v3695_v27 = vsel %vm6670_vm12, %v3690_v10, %v3694_v11  ;;  %v3944_v11 = vshll.u32 %v7801_v1, 16  ;;  %v3598_v10 = vrot.slane %v3596_v29, 5  ;;  %v3752_v16 = vrot.slane %v3751_v25, 4 }
 0x264   : > { %5982 = vmatprep.mubr.msk.bf16.mxu1 %vm3186_vm5, %v7633_v63  ;;  %v3709_v63 = vsel %vm6670_vm12, %v3704_v23, %v7765_v28  ;;  %v3764_v28 = vshll.u32 %v7811_v34, 16  ;;  %v7837_v13 = vcombine.low %v3685_v52, %v3695_v27  ;;  %v3589_v29 = vsel %vm6670_vm12, %v3584_v55, %v7769_v61 }
 0x265   : > { %v7839_v23 = vcombine.low %v3709_v63, %v3719_v37  ;;  %v3946_v8 = vrot.slane %v3944_v11, 5  ;;  %v3599_v53 = vsel %vm6670_vm12, %v3594_v60, %v3598_v10  ;;  %v3941_v47 = vor.u32 %v3940_v38, %v3937_v51  ;;  %v4232_v60 = vld [vmem:[#allocation3 + $0x18] sm:$0xe]  ;;  %v7897_v38 = vld [vmem:[%s8418_s3 + $0x14] sm:$0xf] }
 0x266   : > { %v3766_v4 = vrot.slane %v3764_v28, 5  ;;  %6033 = vmatmul.mubr.msk.bf16.gmra.mxu0 %vm3186_vm5, %v7837_v13  ;;  %v3954_v61 = vshll.u32 %v7843_v20, 16  ;;  %v3757_v52 = vsel %vm6670_vm12, %v3752_v16, %v3756_v36  ;;  %v5412_v63 = vcombine.low %v3589_v29, %v3599_v53  ;;  %v4234_v29 = vld [vmem:[#allocation3 + $0x30] sm:$0xe] }
 0x267   : > { %6036 = vmatprep.mubr.msk.bf16.mxu0 %vm3186_vm5, %v7839_v23  ;;  %v3951_v43 = vor.u32 %v3950_v5, %v3946_v8  ;;  %v3942_v32 = vrot.slane %v3941_v47, 4  ;;  %v4268_v11 = vrot.slane %v4266_v62, 4  ;;  %v4269_v36 = vrot.slane %v7726_v26, 5  ;;  %v4801_v28 = vld [vmem:[%s8420_s5] sm:$0xf] }
 0x268   : > { %v3767_v27 = vsel %vm6670_vm12, %v3762_v46, %v3766_v4  ;;  %v3956_v24 = vrot.slane %v3954_v61, 5  ;;  %v4280_v55 = vrot.slane %v7666_v19, 5  ;;  %v5450_v19 = vrot.slane %v4232_v60, 9  ;;  %v4233_v46 = vld [vmem:[#allocation3 + $0x24] sm:$0xe] }
 0x269   : > { %v7869_v22 = vcombine.low %v3757_v52, %v3767_v27  ;;  %v3952_v37 = vrot.slane %v3951_v43, 4  ;;  %v3947_v25 = vsel %vm6670_vm12, %v3942_v32, %v3946_v8  ;;  %v4270_v50 = vsel %vm6882_vm15, %v4268_v11, %v4269_v36  ;;  %v4236_v32 = vld [vmem:[#allocation3 + $0x48] sm:$0xe] }
 0x26a   : > { %v4282_v8 = vrot.slane %v4280_v55, 4  ;;  %v4283_v5 = vrot.slane %v7681_v17, 5  ;;  %v4287_v17 = vrot.slane %v7698_v12, 5  ;;  %v4281_v9 = vsel %vm6882_vm15, %v5450_v19, %v4280_v55  ;;  %v3574_v19 = vld [vmem:[#allocation3 + $0x70] sm:$0xf] }
 0x26b   : > { %5983 = vmatmul.mubr.msk.bf16.gmra.mxu1 %vm3186_vm5, %v7638_v15  ;;  %v3733_v15 = vsel %vm6670_vm12, %v3728_v56, %v7791_v49  ;;  %v4230_v49 = vld [vmem:[#allocation3] sm:$0xe]  ;;  %v5449_v56 = vrot.slane %v4231_v44, 9  ;;  %v4294_v4 = vrot.slane %v7712_v6, 5  ;;  %v4290_v43 = vrot.slane %v7706_v30, 5 }
 0x26c   : > { %5986 = vmatprep.mubr.msk.bf16.mxu1 %vm3186_vm5, %v7668_v33  ;;  %v3743_v33 = vsel %vm6670_vm12, %v3738_v0, %v3742_v42  ;;  %v5448_v39 = vrot.slane %v4230_v49, 9  ;;  %v4275_v0 = vrot.slane %v4273_v40, 4  ;;  %v4276_v42 = vrot.slane %v7655_v21, 5 }
 0x26d   : > { %v7867_v59 = vcombine.low %v3733_v15, %v3743_v33  ;;  %v4274_v21 = vsel %vm6882_vm15, %v5449_v56, %v4273_v40  ;;  %v4284_v16 = vsel %vm6882_vm15, %v4282_v8, %v4283_v5  ;;  %v5451_v33 = vrot.slane %v4233_v46, 9 }
 0x26e   : > { %v4267_v26 = vsel %vm6882_vm15, %v5448_v39, %v4266_v62  ;;  %v7921_v15 = vcombine.low %v4281_v9, %v4284_v16  ;;  %v4289_v47 = vrot.slane %v4287_v17, 4  ;;  %v4639_v12 = vsel %vm3211_vm3, %v7816_v58, 0  ;;  %v3575_v16 = vld [vmem:[#allocation3 + $0x74] sm:$0x1] }
 0x26f   : > { %6037 = vmatmul.mubr.msk.bf16.gmra.mxu0 %vm3186_vm5, %v7867_v59  ;;  %v5457_v51 = vcombine.low %v4267_v26, %v4270_v50  ;;  %v5452_v61 = vrot.slane %v4234_v29, 9  ;;  %v4296_v52 = vrot.slane %v4294_v4, 4  ;;  %v4297_v27 = vrot.slane %v7735_v35, 5  ;;  %v4237_v26 = vld [vmem:[#allocation3 + $0x54] sm:$0xe] }
 0x270   : > { %6040 = vmatprep.mubr.msk.bf16.mxu0 %vm3186_vm5, %v7869_v22  ;;  %v4288_v30 = vsel %vm6882_vm15, %v5451_v33, %v4287_v17  ;;  %v4291_v6 = vsel %vm6882_vm15, %v4289_v47, %v4290_v43  ;;  %v4301_v58 = vrot.slane %v7733_v45, 5  ;;  %v4308_v49 = vrot.slane %v7758_v7, 5  ;;  %v4238_v43 = vld [vmem:[#allocation3 + $0x60] sm:$0xe] }
 0x271   : > { %v4295_v35 = vsel %vm6882_vm15, %v5452_v61, %v4294_v4  ;;  %v4298_v62 = vsel %vm6882_vm15, %v4296_v52, %v4297_v27  ;;  %v4304_v36 = vrot.slane %v7763_v2, 5  ;;  %v5454_v45 = vrot.slane %v4236_v32, 9  ;;  %v4239_v27 = vld [vmem:[#allocation3 + $0x6c] sm:$0xe] }
 0x272   : > { %v4303_v11 = vrot.slane %v4301_v58, 4  ;;  %v4310_v40 = vrot.slane %v4308_v49, 4  ;;  %v5455_v60 = vrot.slane %v4237_v26, 9  ;;  %v4318_v56 = vrot.slane %v7811_v34, 5 }
 0x273   : > { %5987 = vmatmul.mubr.msk.bf16.gmra.mxu1 %vm3186_vm5, %v7670_v31  ;;  %v3957_v31 = vsel %vm6670_vm12, %v3952_v37, %v3956_v24  ;;  %v7945_v37 = vcombine.low %v4288_v30, %v4291_v6  ;;  %v7947_v24 = vcombine.low %v4295_v35, %v4298_v62  ;;  %v4505_v34 = vsel %vm3211_vm3, %v7897_v38, 0 }
 0x274   : > { %6010 = vmatprep.mubr.msk.bf16.mxu1 %vm3186_vm5, %v5412_v63  ;;  %v7891_v10 = vcombine.low %v3947_v25, %v3957_v31  ;;  %v4235_v63 = vld [vmem:[#allocation3 + $0x3c] sm:$0xe]  ;;  %v4311_v25 = vrot.slane %v7789_v41, 5  ;;  %v4305_v2 = vsel %vm6882_vm15, %v4303_v11, %v4304_v36  ;;  %v4315_v31 = vrot.slane %v7784_v3, 5 }
 0x275   : > { %v5453_v39 = vrot.slane %v4235_v63, 9  ;;  %v4309_v41 = vsel %vm6882_vm15, %v5454_v45, %v4308_v49  ;;  %v4092_v5 = vshll.u32 %v3574_v19, 16  ;;  %v4102_v46 = vshll.u32 %v3575_v16, 16 }
 0x276   : > { %v4312_v44 = vsel %vm6882_vm15, %v4310_v40, %v4311_v25  ;;  %v4316_v3 = vsel %vm6882_vm15, %v5455_v60, %v4315_v31  ;;  %v4491_v4 = vrot.slane %v7801_v1, 5  ;;  %v5484_v6 = vrot.slane %v4239_v27, 9 }
 0x277   : > { %6041 = vmatmul.mubr.msk.bf16.gmra.mxu0 %vm3186_vm5, %v7891_v10  ;;  %v4302_v7 = vsel %vm6882_vm15, %v5453_v39, %v4301_v58  ;;  %v7970_v55 = vcombine.low %v4309_v41, %v4312_v44  ;;  %v4094_v17 = vrot.slane %v4092_v5, 5  ;;  %v4104_v47 = vrot.slane %v4102_v46, 5 }
 0x278   : > { %6064 = vmatprep.mubr.msk.bf16.mxu0 %vm3186_vm5, %v5457_v51  ;;  %v7968_v50 = vcombine.low %v4302_v7, %v4305_v2  ;;  %v3573_v51 = vld [vmem:[#allocation3 + $0x6c] sm:$0xf]  ;;  %v4628_v14 = vrot.slane %v3575_v16, 5 }
 0x279   : > { %v4086_v8 = vshll.u32 %v3573_v51, 16 }
 0x27b   : > { %6011 = vmatmul.mubr.msk.bf16.vlgmr.msra.gmra.mxu1 %vm3186_vm5, %v7701_v18  ;;  %v4277_v18 = vsel %vm6882_vm15, %v4275_v0, %v4276_v42 }
 0x27c   : > { %6045 = vmatpush3.bf16.msra.mxu1 %v4115_v57  ;;  %6014 = vmatprep.mubr.msk.bf16.mxu1 %vm3186_vm5, %v7772_v54  ;;  %v7919_v53 = vcombine.low %v4274_v21, %v4277_v18  ;;  %v4317_v57 = vrot.slane %v4315_v31, 4  ;;  %v4096_v21 = vshrl.u32 %v3574_v19, 16  ;;  %v4088_v18 = vrot.slane %v4086_v8, 5 }
 0x27d   : > { %6168 = vmatprep.subr.msk.bf16.mxu1 %vm3211_vm3, %v7897_v38 }
 0x27e   : > { %v4319_v0 = vsel %vm6882_vm15, %v4317_v57, %v4318_v56  ;;  %v4098_v9 = vrot.slane %v4096_v21, 4 }
 0x27f   : > { %6065 = vmatmul.mubr.msk.bf16.vlgmr.msra.gmra.mxu0 %vm3186_vm5, %v7919_v53  ;;  %v5464_v42 = vcombine.low %v4316_v3, %v4319_v0 }
 0x280   : > { %6099 = vmatpush3.bf16.msra.mxu0 %v4639_v12  ;;  %6068 = vmatprep.mubr.msk.bf16.mxu0 %vm3186_vm5, %v7921_v15  ;;  %v4494_v12 = vrot.slane %v7843_v20, 5 }
 0x283   : > { %6015 = vmatmul.mubr.msk.bf16.gmra.mxu1 %vm3186_vm5, %v7794_v48 }
 0x284   : > { %6018 = vmatprep.mubr.msk.bf16.mxu1 %vm3186_vm5, %v7837_v13 }
 0x287   : > { %6069 = vmatmul.mubr.msk.bf16.gmra.mxu0 %vm3186_vm5, %v7945_v37 }
 0x288   : > { %6072 = vmatprep.mubr.msk.bf16.mxu0 %vm3186_vm5, %v7947_v24 }
 0x28b   : > { %6019 = vmatmul.mubr.msk.bf16.gmra.mxu1 %vm3186_vm5, %v7839_v23 }
 0x28c   : > { %6022 = vmatprep.mubr.msk.bf16.mxu1 %vm3186_vm5, %v7867_v59 }
 0x28f   : > { %6073 = vmatmul.mubr.msk.bf16.gmra.mxu0 %vm3186_vm5, %v7968_v50 }
 0x290   : > { %6076 = vmatprep.mubr.msk.bf16.mxu0 %vm3186_vm5, %v7970_v55 }
 0x293   : > { %6023 = vmatmul.mubr.msk.bf16.gmra.mxu1 %vm3186_vm5, %v7869_v22 }
 0x294   : > { %6046 = vmatprep.mubr.msk.bf16.mxu1 %vm3186_vm5, %v7772_v54  ;;  %v4083_v54 = vshrl.u32 %v3573_v51, 16 }
 0x296   : > { %v4085_v38 = vrot.slane %v4083_v54, 4 }
 0x297   : > { %6077 = vmatmul.mubr.msk.bf16.gmra.mxu0 %vm3186_vm5, %v5464_v42 }
 0x298   : > { %6100 = vmatprep.mubr.msk.bf16.mxu0 %vm3186_vm5, %v7921_v15 }
 0x29b   : > { %6047 = vmatmul.mubr.msk.bf16.vlgmr.msra.gmra.mxu1 %vm3186_vm5, %v7794_v48  ;;  %v4089_v48 = vor.u32 %v4088_v18, %v4085_v38 }
 0x29c   : > { %6081 = vmatpush3.bf16.msra.mxu1 %v4505_v34  ;;  %6050 = vmatprep.mubr.msk.bf16.mxu1 %vm3186_vm5, %v7837_v13  ;;  %v4099_v13 = vor.u32 %v4098_v9, %v4094_v17 }
 0x29d   : > { %v4090_v29 = vrot.slane %v4089_v48, 4  ;;  %6170 = vmatprep.subr.msk.bf16.mxu1 %vm3211_vm3, %v4801_v28 }
 0x29e   : > { %v4100_v33 = vrot.slane %v4099_v13, 4 }
 0x29f   : > { %6101 = vmatmul.mubr.msk.bf16.vlgmr.msra.gmra.mxu0 %vm3186_vm5, %v7945_v37  ;;  %v4095_v61 = vsel %vm6670_vm12, %v4090_v29, %v4094_v17 }
 0x2a0   : > { %6104 = vmatprep.mubr.msk.bf16.mxu0 %vm3186_vm5, %v7947_v24  ;;  %v4105_v1 = vsel %vm6670_vm12, %v4100_v33, %v4104_v47 }
 0x2a1   : > { %v5439_v52 = vcombine.low %v4095_v61, %v4105_v1 }
 0x2a3   : > { %6051 = vmatmul.mubr.msk.bf16.gmra.mxu1 %vm3186_vm5, %v7839_v23  ;;  %v5473_v23 = vrot.slane %v4238_v43, 9 }
 0x2a4   : > { %6054 = vmatprep.mubr.msk.bf16.mxu1 %vm3186_vm5, %v7867_v59  ;;  %v4493_v59 = vrot.slane %v4491_v4, 4 }
 0x2a5   : > { %v4492_v20 = vsel %vm6882_vm15, %v5473_v23, %v4491_v4 }
 0x2a7   : > { %6105 = vmatmul.mubr.msk.bf16.gmra.mxu0 %vm3186_vm5, %v7968_v50 }
 0x2a8   : > { %6108 = vmatprep.mubr.msk.bf16.mxu0 %vm3186_vm5, %v7970_v55 }
 0x2ab   : > { %6055 = vmatmul.mubr.msk.bf16.gmra.mxu1 %vm3186_vm5, %v7869_v22  ;;  %v4625_v22 = vrot.slane %v3574_v19, 5 }
 0x2ac   : > { %6058 = vmatprep.mubr.msk.bf16.mxu1 %vm3186_vm5, %v7891_v10  ;;  %v4495_v10 = vsel %vm6882_vm15, %v4493_v59, %v4494_v12 }
 0x2ad   : > { %v5475_v30 = vcombine.low %v4492_v20, %v4495_v10  ;;  %v4627_v58 = vrot.slane %v4625_v22, 4  ;;  %v4626_v35 = vsel %vm6882_vm15, %v5484_v6, %v4625_v22 }
 0x2af   : > { %6109 = vmatmul.mubr.msk.bf16.gmra.mxu0 %vm3186_vm5, %v5464_v42  ;;  %v4629_v62 = vsel %vm6882_vm15, %v4627_v58, %v4628_v14 }
 0x2b0   : > { %6112 = vmatprep.mubr.msk.bf16.mxu0 %vm3186_vm5, %v5475_v30  ;;  %v5486_v63 = vcombine.low %v4626_v35, %v4629_v62 }
 0x2b3   : > { %6059 = vmatmul.mubr.msk.bf16.gmra.mxu1 %vm3186_vm5, %v5439_v52 }
 0x2b4   : > { %6082 = vmatprep.mubr.msk.bf16.mxu1 %vm3186_vm5, %v7919_v53  ;;  %v4933_v53 = vld [vmem:[%s8421_s6] sm:$0xf] }
 0x2b5   : > { %6171 = vmatprep.subr.msk.bf16.mxu0 %vm3211_vm3, %v4933_v53  ;;  %v4935_v49 = vsel %vm3211_vm3, %v4933_v53, 0 }
 0x2b6   : > { %6135 = vmatpush3.bf16.msra.mxu0 %v4935_v49 }
 0x2b7   : > { %6113 = vmatmul.mubr.msk.bf16.gmra.mxu0 %vm3186_vm5, %v5486_v63 }
 0x2bb   : > { %6083 = vmatmul.mubr.msk.bf16.vlgmr.msra.gmra.mxu1 %vm3186_vm5, %v7921_v15  ;;  %v4834_v15 = vsel %vm3211_vm3, %v4801_v28, 0 }
 0x2bc   : > { %6086 = vmatprep.mubr.msk.bf16.mxu1 %vm3186_vm5, %v7945_v37  ;;  %6117 = vmatpush3.bf16.msra.mxu1 %v4834_v15 }
 0x2c3   : > { %6087 = vmatmul.mubr.msk.bf16.gmra.mxu1 %vm3186_vm5, %v7947_v24 }
 0x2c4   : > { %6090 = vmatprep.mubr.msk.bf16.mxu1 %vm3186_vm5, %v7968_v50 }
 0x2cb   : > { %6091 = vmatmul.mubr.msk.bf16.gmra.mxu1 %vm3186_vm5, %v7970_v55 }
 0x2cc   : > { %6094 = vmatprep.mubr.msk.bf16.mxu1 %vm3186_vm5, %v5464_v42 }
 0x2d3   : > { %6095 = vmatmul.mubr.msk.bf16.gmra.mxu1 %vm3186_vm5, %v5475_v30 }
 0x2fb   : > { %v5958_v32 = vpop.f32.mrf.mxu1 }
 0x2fd   : > { %v3249_v37 = vpop.f32.mrf.mxu1  ;;  %v5994_v36 = vpop.f32.mrf.mxu0 }
 0x2ff   : > { %v5959_v24 = vpop.f32.mrf.mxu1  ;;  %v3467_v40 = vpop.f32.mrf.mxu0 }
 0x301   : > { %v3252_v39 = vpop.f32.mrf.mxu1  ;;  %v5995_v7 = vpop.f32.mrf.mxu0 }
 0x303   : > { %v5962_v11 = vpop.f32.mrf.mxu1  ;;  %v3470_v31 = vpop.f32.mrf.mxu0 }
 0x305   : > { %v3265_v45 = vpop.f32.mrf.mxu1  ;;  %v5998_v44 = vpop.f32.mrf.mxu0 }
 0x307   : > { %v5963_v25 = vpop.f32.mrf.mxu1  ;;  %v3483_v50 = vpop.f32.mrf.mxu0 }
 0x309   : > { %v3268_v2 = vpop.f32.mrf.mxu1  ;;  %v5999_v60 = vpop.f32.mrf.mxu0 }
 0x30b   : > { %v5966_v41 = vpop.f32.mrf.mxu1  ;;  %v3486_v56 = vpop.f32.mrf.mxu0 }
 0x30d   : > { %v3281_v26 = vpop.f32.mrf.mxu1  ;;  %v6002_v0 = vpop.f32.mrf.mxu0 }
 0x30f   : > { %v5967_v55 = vpop.f32.mrf.mxu1  ;;  %v3499_v42 = vpop.f32.mrf.mxu0 }
 0x311   : > { %v3284_v57 = vpop.f32.mrf.mxu1  ;;  %v6003_v19 = vpop.f32.mrf.mxu0 }
 0x313   : > { %v5970_v3 = vpop.f32.mrf.mxu1  ;;  %v3502_v8 = vpop.f32.mrf.mxu0 }
 0x315   : > { %v3297_v34 = vpop.f32.mrf.mxu1  ;;  %v6006_v18 = vpop.f32.mrf.mxu0 }
 0x317   : > { %v5971_v51 = vpop.f32.mrf.mxu1  ;;  %v3515_v48 = vpop.f32.mrf.mxu0 }
 0x319   : > { %v3300_v54 = vpop.f32.mrf.mxu1  ;;  %v6007_v29 = vpop.f32.mrf.mxu0 }
 0x31b   : > { %v5976_v5 = vpop.f32.mrf.mxu1  ;;  %v3518_v23 = vpop.f32.mrf.mxu0 }
 0x31c   : > { %v3366_v21 = vadd.f32 %v5976_v5, %v5958_v32 }
 0x31d   : > { %v3357_v38 = vpop.f32.mrf.mxu1  ;;  %v8060_v1 = vpop.f32.mrf.mxu0 }
 0x31e   : > { %v3358_v17 = vadd.f32 %v3357_v38, %v3249_v37  ;;  %v8052_v9 = vadd.f32 %v5994_v36, %v3366_v21 }
 0x31f   : > { %v5977_v16 = vpop.f32.mrf.mxu1  ;;  %v8064_v10 = vpop.f32.mrf.mxu0 }
 0x320   : > { %v3369_v13 = vadd.f32 %v5977_v16, %v5959_v24  ;;  %v8054_v46 = vadd.f32 %v3467_v40, %v3358_v17 }
 0x321   : > { %v3360_v4 = vpop.f32.mrf.mxu1  ;;  %v8068_v58 = vpop.f32.mrf.mxu0 }
 0x322   : > { %v3361_v33 = vadd.f32 %v3360_v4, %v3252_v39  ;;  %v8056_v47 = vadd.f32 %v5995_v7, %v3369_v13 }
 0x323   : > { %v5980_v43 = vpop.f32.mrf.mxu1  ;;  %v8072_v63 = vpop.f32.mrf.mxu0 }
 0x324   : > { %v3382_v59 = vadd.f32 %v5980_v43, %v5962_v11  ;;  %v8058_v12 = vadd.f32 %v3470_v31, %v3361_v33 }
 0x325   : > { %v3373_v61 = vpop.f32.mrf.mxu1 }
 0x326   : > { %v3374_v22 = vadd.f32 %v3373_v61, %v3265_v45  ;;  %v8062_v52 = vadd.f32 %v5998_v44, %v3382_v59  ;;  %v8076_v49 = vpop.f32.mrf.mxu0 }
 0x327   : > { %v5981_v20 = vpop.f32.mrf.mxu1 }
 0x328   : > { %v3385_v27 = vadd.f32 %v5981_v20, %v5963_v25  ;;  %v8066_v30 = vadd.f32 %v3483_v50, %v3374_v22  ;;  %v8078_v39 = vpop.f32.mrf.mxu0 }
 0x329   : > { %v3376_v6 = vpop.f32.mrf.mxu1 }
 0x32a   : > { %v3377_v14 = vadd.f32 %v3376_v6, %v3268_v2  ;;  %v8070_v35 = vadd.f32 %v5999_v60, %v3385_v27  ;;  %v8082_v40 = vpop.f32.mrf.mxu0 }
 0x32b   : > { %v5984_v62 = vpop.f32.mrf.mxu1 }
 0x32c   : > { %v3398_v28 = vadd.f32 %v5984_v62, %v5966_v41  ;;  %v8074_v53 = vadd.f32 %v3486_v56, %v3377_v14  ;;  %v8086_v31 = vpop.f32.mrf.mxu0 }
 0x32d   : > { %v3389_v15 = vpop.f32.mrf.mxu1 }
 0x32e   : > { %v3390_v32 = vadd.f32 %v3389_v15, %v3281_v26  ;;  %v3540_v37 = vadd.f32 %v6002_v0, %v3398_v28 }
 0x32f   : > { %v5985_v24 = vpop.f32.mrf.mxu1  ;;  %v6038_v50 = vpop.f32.mrf.mxu0 }
 0x330   : > { %v3401_v11 = vadd.f32 %v5985_v24, %v5967_v55  ;;  %v8080_v36 = vadd.f32 %v3499_v42, %v3390_v32 }
 0x331   : > { %v3392_v45 = vpop.f32.mrf.mxu1  ;;  %v8090_v55 = vpop.f32.mrf.mxu0 }
 0x332   : > { %v3393_v25 = vadd.f32 %v3392_v45, %v3284_v57  ;;  %v8084_v7 = vadd.f32 %v6003_v19, %v3401_v11 }
 0x333   : > { %v5988_v2 = vpop.f32.mrf.mxu1  ;;  %v8094_v57 = vpop.f32.mrf.mxu0 }
 0x334   : > { %v3414_v41 = vadd.f32 %v5988_v2, %v5970_v3  ;;  %v8088_v44 = vadd.f32 %v3502_v8, %v3393_v25  ;;  %8480 = vst [vmem:[#allocation7_spill] sm:$0xff] %v8094_v57 }
 0x335   : > { %v3405_v26 = vpop.f32.mrf.mxu1  ;;  %v8098_v3 = vpop.f32.mrf.mxu0 }
 0x336   : > { %v3406_v60 = vadd.f32 %v3405_v26, %v3297_v34  ;;  %v3544_v56 = vadd.f32 %v6006_v18, %v3414_v41  ;;  %8482 = vst [vmem:[#allocation8_spill] sm:$0xff] %v8098_v3 }
 0x337   : > { %v5989_v0 = vpop.f32.mrf.mxu1  ;;  %v6042_v34 = vpop.f32.mrf.mxu0 }
 0x338   : > { %v3417_v42 = vadd.f32 %v5989_v0, %v5971_v51  ;;  %v8092_v5 = vadd.f32 %v3515_v48, %v3406_v60 }
 0x339   : > { %v3408_v21 = vpop.f32.mrf.mxu1  ;;  %v8102_v13 = vpop.f32.mrf.mxu0 }
 0x33a   : > { %v3409_v19 = vadd.f32 %v3408_v21, %v3300_v54  ;;  %v8096_v38 = vadd.f32 %v6007_v29, %v3417_v42  ;;  %8484 = vst [vmem:[#allocation11_spill] sm:$0xff] %v8102_v13 }
 0x33b   : > { %v6012_v17 = vpop.f32.mrf.mxu1  ;;  %v8104_v51 = vpop.f32.mrf.mxu0 }
 0x33c   : > { %8481 = vst [vmem:[#allocation9_spill] sm:$0xff] %v8096_v38  ;;  %v8100_v8 = vadd.f32 %v3518_v23, %v3409_v19  ;;  %8485 = vst [vmem:[#allocation12_spill] sm:$0xff] %v8104_v51 }
 0x33d   : > { %v3855_v16 = vpop.f32.mrf.mxu1  ;;  %v8106_v33 = vpop.f32.mrf.mxu0 }
 0x33e   : > { %8483 = vst [vmem:[#allocation10_spill] sm:$0xff] %v8100_v8  ;;  %8486 = vst [vmem:[#allocation13_spill] sm:$0xff] %v8106_v33 }
 0x33f   : > { %v6013_v18 = vpop.f32.mrf.mxu1  ;;  %v8110_v54 = vpop.f32.mrf.mxu0 }
 0x341   : > { %v3858_v4 = vpop.f32.mrf.mxu1  ;;  %v8114_v59 = vpop.f32.mrf.mxu0 }
 0x343   : > { %v6016_v48 = vpop.f32.mrf.mxu1  ;;  %v8118_v61 = vpop.f32.mrf.mxu0 }
 0x345   : > { %v8108_v43 = vpop.f32.mrf.mxu1  ;;  %v8120_v20 = vpop.f32.mrf.mxu0 }
 0x347   : > { %v8112_v29 = vpop.f32.mrf.mxu1  ;;  %v8124_v14 = vpop.f32.mrf.mxu0 }
 0x349   : > { %v8116_v23 = vpop.f32.mrf.mxu1  ;;  %v8130_v15 = vpop.f32.mrf.mxu0 }
 0x34b   : > { %v6020_v22 = vpop.f32.mrf.mxu1  ;;  %v8134_v24 = vpop.f32.mrf.mxu0 }
 0x34c   : > { %v3928_v27 = vadd.f32 %v6020_v22, %v3540_v37  ;;  %8487 = vst [vmem:[#allocation14_spill] sm:$0xff] %v8134_v24 }
 0x34d   : > { %v8122_v6 = vpop.f32.mrf.mxu1  ;;  %v8136_v45 = vpop.f32.mrf.mxu0 }
 0x34e   : > { %v8126_v62 = vadd.f32 %v6038_v50, %v3928_v27  ;;  %8488 = vst [vmem:[#allocation15_spill] sm:$0xff] %v8136_v45  ;;  %v3921_v45 = vadd.f32 %v6013_v18, %v8056_v47  ;;  %v3922_v47 = vadd.f32 %v8108_v43, %v8066_v30  ;;  %v3923_v30 = vadd.f32 %v8116_v23, %v8074_v53 }
 0x34f   : > { %v8128_v28 = vpop.f32.mrf.mxu1  ;;  %v8140_v37 = vpop.f32.mrf.mxu0 }
 0x350   : > { %8489 = vst [vmem:[#allocation16_spill] sm:$0xff] %v8140_v37  ;;  %v4070_v43 = vadd.f32 %v8078_v39, %v3922_v47 }
 0x351   : > { %v8132_v32 = vpop.f32.mrf.mxu1  ;;  %v8146_v50 = vpop.f32.mrf.mxu0 }
 0x352   : > { %8492 = vst [vmem:[#allocation19_spill] sm:$0xff] %v8146_v50 }
 0x353   : > { %v6024_v11 = vpop.f32.mrf.mxu1  ;;  %v8150_v0 = vpop.f32.mrf.mxu0 }
 0x354   : > { %v3932_v25 = vadd.f32 %v6024_v11, %v3544_v56  ;;  %8494 = vst [vmem:[#allocation21_spill] sm:$0xff] %v8150_v0 }
 0x355   : > { %v8138_v2 = vpop.f32.mrf.mxu1  ;;  %v8152_v21 = vpop.f32.mrf.mxu0 }
 0x356   : > { %v8142_v41 = vadd.f32 %v6042_v34, %v3932_v25  ;;  %8495 = vst [vmem:[#allocation4_spill] sm:$0xff] %v8152_v21 }
 0x357   : > { %v8144_v26 = vpop.f32.mrf.mxu1  ;;  %v8154_v22 = vpop.f32.mrf.mxu0 }
 0x358   : > { %8490 = vst [vmem:[#allocation17_spill] sm:$0xff] %v8142_v41  ;;  %8491 = vst [vmem:[#allocation18_spill] sm:$0xff] %v8144_v26 }
 0x359   : > { %v8148_v60 = vpop.f32.mrf.mxu1  ;;  %8496 = vst [vmem:[#allocation5_spill] sm:$0xff] %v8154_v22  ;;  %v8156_v27 = vpop.f32.mrf.mxu0 }
 0x35a   : > { %8493 = vst [vmem:[#allocation20_spill] sm:$0xff] %v8148_v60  ;;  %8497 = vst [vmem:[#allocation6_spill] sm:$0xff] %v8156_v27 }
 0x35b   : > { %v6048_v42 = vpop.f32.mrf.mxu1  ;;  %v8158_v34 = vpop.f32.mrf.mxu0 }
 0x35c   : > { %8498 = vst [vmem:[#allocation22_spill] sm:$0xff] %v8158_v34  ;;  %v3920_v34 = vadd.f32 %v6012_v17, %v8052_v9 }
 0x35d   : > { %v4151_v19 = vpop.f32.mrf.mxu1  ;;  %v8160_v33 = vpop.f32.mrf.mxu0 }
 0x35e   : > { %8499 = vst [vmem:[#allocation23_spill] sm:$0xff] %v8160_v33  ;;  %v3918_v33 = vadd.f32 %v3855_v16, %v8054_v46  ;;  %v4068_v24 = vadd.f32 %v8060_v1, %v3920_v34  ;;  %v3924_v46 = vadd.f32 %v6016_v48, %v8062_v52 }
 0x35f   : > { %v6049_v56 = vpop.f32.mrf.mxu1  ;;  %v6102_v41 = vpop.f32.mrf.mxu0 }
 0x361   : > { %v4154_v11 = vpop.f32.mrf.mxu1  ;;  %v4675_v60 = vpop.f32.mrf.mxu0 }
 0x363   : > { %v6052_v25 = vpop.f32.mrf.mxu1  ;;  %v6103_v8 = vpop.f32.mrf.mxu0 }
 0x365   : > { %v4167_v51 = vpop.f32.mrf.mxu1  ;;  %v8164_v21 = vpop.f32.mrf.mxu0 }
 0x367   : > { %v6053_v50 = vpop.f32.mrf.mxu1  ;;  %v8170_v27 = vpop.f32.mrf.mxu0 }
 0x368   : > { %8502 = vst [vmem:[#allocation26_spill] sm:$0xff] %v8170_v27  ;;  %v4066_v27 = vadd.f32 %v8064_v10, %v3918_v33 }
 0x369   : > { %v4170_v0 = vpop.f32.mrf.mxu1  ;;  %v8178_v38 = vpop.f32.mrf.mxu0 }
 0x36a   : > { %v4214_v16 = vadd.f32 %v4151_v19, %v4066_v27  ;;  %v4218_v19 = vadd.f32 %v4167_v51, %v4070_v43  ;;  %v8510_v43 = vld [vmem:[#allocation18_spill] sm:$0xff] }
 0x36b   : > { %v8162_v37 = vpop.f32.mrf.mxu1  ;;  %v8188_v17 = vpop.f32.mrf.mxu0 }
 0x36c   : > { %v4470_v48 = vadd.f32 %v8114_v59, %v4214_v16  ;;  %v8213_v59 = vld [vmem:[%s8419_s4] ss:$0 sm:$0xff] }
 0x36d   : > { %v8166_v22 = vpop.f32.mrf.mxu1  ;;  %v8198_v33 = vpop.f32.mrf.mxu0 }
 0x36e   : > { %8500 = vst [vmem:[#allocation24_spill] sm:$0xff] %v8166_v22  ;;  %v4216_v22 = vadd.f32 %v6048_v42, %v4068_v24  ;;  %v4072_v42 = vadd.f32 %v8076_v49, %v3924_v46  ;;  %v3926_v49 = vadd.f32 %v8122_v6, %v8080_v36  ;;  %v4071_v36 = vadd.f32 %v8086_v31, %v3923_v30  ;;  %v8509_v30 = vld [vmem:[#allocation9_spill] sm:$0xff] }
 0x36f   : > { %v8168_v13 = vpop.f32.mrf.mxu1 }
 0x370   : > { %8501 = vst [vmem:[#allocation25_spill] sm:$0xff] %v8168_v13  ;;  %v3919_v13 = vadd.f32 %v3858_v4, %v8058_v12  ;;  %v4472_v4 = vadd.f32 %v8110_v54, %v4216_v22  ;;  %v4219_v34 = vadd.f32 %v4170_v0, %v4071_v36  ;;  %v8515_v36 = vld [vmem:[#allocation10_spill] sm:$0xff] }
 0x371   : > { %v8173_v3 = vpop.f32.mrf.mxu1 }
 0x372   : > { %v4067_v12 = vadd.f32 %v8072_v63, %v3919_v13  ;;  %v4220_v13 = vadd.f32 %v6052_v25, %v4072_v42  ;;  %v8507_v42 = vld [vmem:[#allocation14_spill] sm:$0xff] }
 0x373   : > { %v8176_v26 = vpop.f32.mrf.mxu1 }
 0x374   : > { %8503 = vst [vmem:[#allocation27_spill] sm:$0xff] %v8176_v26  ;;  %v4069_v26 = vadd.f32 %v8068_v58, %v3921_v45  ;;  %v4215_v24 = vadd.f32 %v4154_v11, %v4067_v12  ;;  %v3925_v58 = vadd.f32 %v8112_v29, %v8070_v35  ;;  %v8215_v29 = vpop.f32.mrf.mxu0  ;;  %v4476_v27 = vadd.f32 %v8124_v14, %v4220_v13 }
 0x375   : > { %v8182_v57 = vpop.f32.mrf.mxu1  ;;  %v3930_v14 = vadd.f32 %v8138_v2, %v8092_v5 }
 0x376   : > { %v4217_v18 = vadd.f32 %v6049_v56, %v4069_v26  ;;  %v4471_v23 = vadd.f32 %v8120_v20, %v4215_v24  ;;  %v4474_v20 = vadd.f32 %v8130_v15, %v4218_v19  ;;  %v8226_v46 = vpop.f32.mrf.mxu0 }
 0x377   : > { %v8186_v9 = vpop.f32.mrf.mxu1  ;;  %v8511_v13 = vld [vmem:[#allocation25_spill] sm:$0xff] }
 0x378   : > { %v4473_v26 = vadd.f32 %v8118_v61, %v4217_v18  ;;  %v4073_v61 = vadd.f32 %v8082_v40, %v3925_v58  ;;  %v6111_v2 = vpop.f32.mrf.mxu0 }
 0x379   : > { %v8194_v1 = vpop.f32.mrf.mxu1 }
 0x37a   : > { %v4221_v11 = vadd.f32 %v6053_v50, %v4073_v61  ;;  %v8504_v50 = vld [vmem:[#allocation7_spill] sm:$0xff] }
 0x37b   : > { %v6084_v10 = vpop.f32.mrf.mxu1 }
 0x37c   : > { %v4606_v52 = vadd.f32 %v6084_v10, %v4472_v4  ;;  %v8505_v4 = vld [vmem:[#allocation24_spill] sm:$0xff]  ;;  %v8506_v10 = vld [vmem:[#allocation26_spill] sm:$0xff] }
 0x37d   : > { %v4541_v63 = vpop.f32.mrf.mxu1 }
 0x37e   : > { %v4740_v54 = vadd.f32 %v6102_v41, %v4606_v52  ;;  %v4604_v45 = vadd.f32 %v4541_v63, %v4470_v48  ;;  %v3929_v41 = vadd.f32 %v8128_v28, %v8084_v7  ;;  %v8508_v52 = vld [vmem:[#allocation15_spill] sm:$0xff]  ;;  %v3933_v63 = vadd.f32 %v8510_v43, %v8509_v30  ;;  %v8524_v30 = vld [vmem:[#allocation5_spill] sm:$0xff] }
 0x37f   : > { %v6085_v35 = vpop.f32.mrf.mxu1  ;;  %v4475_v5 = vadd.f32 %v8508_v52, %v4219_v34  ;;  %v4710_v34 = vpop.f32.mrf.mxu0 }
 0x380   : > { %v4738_v53 = vadd.f32 %v4675_v60, %v4604_v45  ;;  %v4607_v39 = vadd.f32 %v6085_v35, %v4473_v26  ;;  %v4763_v6 = vadd.f32 %v8213_v59, %v4740_v54  ;;  %v4074_v60 = vadd.f32 %v8090_v55, %v3926_v49  ;;  %v8512_v45 = vld [vmem:[#allocation8_spill] sm:$0xff]  ;;  %v8513_v35 = vld [vmem:[#allocation11_spill] sm:$0xff] }
 0x381   : > { %v4544_v51 = vpop.f32.mrf.mxu1  ;;  %v4224_v55 = vadd.f32 %v8162_v37, %v8126_v62  ;;  %v4077_v15 = vadd.f32 %v8504_v50, %v3929_v41  ;;  %v8514_v41 = vld [vmem:[#allocation16_spill] sm:$0xff] }
 0x382   : > { %v4741_v22 = vadd.f32 %v6103_v8, %v4607_v39  ;;  %v4605_v56 = vadd.f32 %v4544_v51, %v4471_v23  ;;  %v4761_v40 = vadd.f32 %v8213_v59, %v4738_v53  ;;  %v3927_v8 = vadd.f32 %v8132_v32, %v8088_v44  ;;  %v8516_v51 = vld [vmem:[#allocation20_spill] sm:$0xff] }
 0x383   : > { %v6088_v25 = vpop.f32.mrf.mxu1  ;;  %v4779_v16 = vmax.f32 %v4763_v6, 0.0  ;;  %v4477_v44 = vadd.f32 %v8507_v42, %v4221_v11  ;;  %v4225_v54 = vadd.f32 %v8511_v13, %v4077_v15  ;;  %v4078_v53 = vadd.f32 %v8513_v35, %v3930_v14  ;;  %v8520_v14 = vld [vmem:[#allocation27_spill] sm:$0xff] }
 0x384   : > { %v4764_v7 = vadd.f32 %v8213_v59, %v4741_v22  ;;  %v4739_v31 = vadd.f32 %v8164_v21, %v4605_v56  ;;  %v4610_v28 = vadd.f32 %v6088_v25, %v4476_v27  ;;  %v4222_v21 = vadd.f32 %v8505_v4, %v4074_v60  ;;  %v8517_v27 = vld [vmem:[#allocation19_spill] sm:$0xff]  ;;  %v6114_v4 = vpop.f32.mrf.mxu0 }
 0x385   : > { %v4557_v0 = vpop.f32.mrf.mxu1  ;;  %v4777_v48 = vmax.f32 %v4761_v40, 0.0  ;;  %v4075_v26 = vadd.f32 %v8512_v45, %v3927_v8  ;;  %v4480_v61 = vadd.f32 %v8514_v41, %v4224_v55  ;;  %v3931_v6 = vadd.f32 %v8516_v51, %v8515_v36  ;;  %v8519_v8 = vld [vmem:[#allocation17_spill] sm:$0xff]  ;;  %v8525_v45 = vld [vmem:[#allocation6_spill] sm:$0xff] }
 0x386   : > { %v4780_v47 = vmax.f32 %v4764_v7, 0.0  ;;  %v4762_v18 = vadd.f32 %v8213_v59, %v4739_v31  ;;  %v4608_v12 = vadd.f32 %v4557_v0, %v4474_v20  ;;  %v4744_v24 = vadd.f32 %v8506_v10, %v4610_v28  ;;  %v4723_v13 = vpop.f32.mrf.mxu0 }
 0x387   : > { %v6089_v32 = vpop.f32.mrf.mxu1  ;;  %v4478_v11 = vadd.f32 %v8517_v27, %v4222_v21  ;;  %v4223_v40 = vadd.f32 %v8173_v3, %v4075_v26  ;;  %v4228_v55 = vadd.f32 %v8520_v14, %v8519_v8  ;;  %v4226_v0 = vadd.f32 %v8182_v57, %v4078_v53  ;;  %v8521_v3 = vld [vmem:[#allocation12_spill] sm:$0xff]  ;;  %v8522_v21 = vld [vmem:[#allocation13_spill] sm:$0xff]  ;;  %v8526_v53 = vld [vmem:[#allocation22_spill] sm:$0xff] }
 0x388   : > { %v4794_v62 = vpack.c.bf16 %v4780_v47, %v4779_v16  ;;  %v4778_v37 = vmax.f32 %v4762_v18, 0.0  ;;  %v4742_v58 = vadd.f32 %v8178_v38, %v4608_v12  ;;  %v4611_v49 = vadd.f32 %v6089_v32, %v4477_v44  ;;  %v6115_v51 = vpop.f32.mrf.mxu0  ;;  %v8527_v27 = vld [vmem:[#allocation23_spill] sm:$0xff] }
 0x389   : > { %v4560_v19 = vpop.f32.mrf.mxu1  ;;  %v4767_v38 = vadd.f32 %v8213_v59, %v4744_v24  ;;  %v4081_v16 = vadd.f32 %v8521_v3, %v3933_v63  ;;  %v4079_v10 = vadd.f32 %v8522_v21, %v3931_v6  ;;  %v4484_v43 = vadd.f32 %v8524_v30, %v4228_v55 }
 0x38a   : > { %v4793_v39 = vpack.c.bf16 %v4778_v37, %v4777_v48  ;;  %v4609_v23 = vadd.f32 %v4560_v19, %v4475_v5  ;;  %v4745_v22 = vadd.f32 %v8188_v17, %v4611_v49  ;;  %v4765_v60 = vadd.f32 %v8213_v59, %v4742_v58  ;;  %v8518_v17 = vld [vmem:[#allocation21_spill] sm:$0xff] }
 0x38b   : > { %v6092_v56 = vpop.f32.mrf.mxu1  ;;  %v4481_v28 = vadd.f32 %v8518_v17, %v4225_v54  ;;  %v4783_v47 = vmax.f32 %v4767_v38, 0.0  ;;  %v4229_v32 = vadd.f32 %v8186_v9, %v4081_v16  ;;  %v4482_v26 = vadd.f32 %v8525_v45, %v4226_v0  ;;  %v4726_v17 = vpop.f32.mrf.mxu0 }
 0x38c   : > { %v4743_v25 = vadd.f32 %v8198_v33, %v4609_v23  ;;  %v4614_v20 = vadd.f32 %v6092_v56, %v4480_v61  ;;  %6118 = vmatprep.mubr.msk.bf16.mxu1 %vm3186_vm5, %v4793_v39  ;;  %6136 = vmatprep.mubr.msk.bf16.mxu0 %vm3186_vm5, %v4793_v39  ;;  %v4768_v7 = vadd.f32 %v8213_v59, %v4745_v22  ;;  %v4781_v24 = vmax.f32 %v4765_v60, 0.0 }
 0x38d   : > { %v4573_v31 = vpop.f32.mrf.mxu1  ;;  %6119 = vmatmul.mubr.msk.bf16.vlgmr.msra.gmra.mxu1 %vm3186_vm5, %v4794_v62  ;;  %6137 = vmatmul.mubr.msk.bf16.vlgmr.msra.gmra.mxu0 %vm3186_vm5, %v4794_v62  ;;  %v4227_v49 = vadd.f32 %v8194_v1, %v4079_v10  ;;  %v4485_v39 = vadd.f32 %v8526_v53, %v4229_v32 }
 0x38e   : > { %v4766_v33 = vadd.f32 %v8213_v59, %v4743_v25  ;;  %v4748_v50 = vadd.f32 %v8215_v29, %v4614_v20  ;;  %v4612_v15 = vadd.f32 %v4573_v31, %v4478_v11  ;;  %v4784_v18 = vmax.f32 %v4768_v7, 0.0  ;;  %v8523_v29 = vld [vmem:[#allocation4_spill] sm:$0xff] }
 0x38f   : > { %v6093_v12 = vpop.f32.mrf.mxu1  ;;  %v4479_v48 = vadd.f32 %v8523_v29, %v4223_v40  ;;  %v4483_v11 = vadd.f32 %v8527_v27, %v4227_v49 }
 0x390   : > { %v4782_v42 = vmax.f32 %v4766_v33, 0.0  ;;  %v4615_v44 = vadd.f32 %v6093_v12, %v4481_v28  ;;  %v4796_v52 = vpack.c.bf16 %v4784_v18, %v4783_v47  ;;  %v4746_v5 = vadd.f32 %v8226_v46, %v4612_v15 }
 0x391   : > { %v4576_v62 = vpop.f32.mrf.mxu1  ;;  %v4771_v37 = vadd.f32 %v8213_v59, %v4748_v50 }
 0x392   : > { %v4795_v57 = vpack.c.bf16 %v4782_v42, %v4781_v24  ;;  %v4749_v58 = vadd.f32 %v6111_v2, %v4615_v44  ;;  %v4613_v63 = vadd.f32 %v4576_v62, %v4479_v48  ;;  %v4769_v46 = vadd.f32 %v8213_v59, %v4746_v5 }
 0x393   : > { %v6096_v54 = vpop.f32.mrf.mxu1  ;;  %v4787_v23 = vmax.f32 %v4771_v37, 0.0 }
 0x394   : > { %v4772_v9 = vadd.f32 %v8213_v59, %v4749_v58  ;;  %v4618_v19 = vadd.f32 %v6096_v54, %v4484_v43  ;;  %6122 = vmatprep.mubr.msk.bf16.mxu1 %vm3186_vm5, %v4795_v57  ;;  %6140 = vmatprep.mubr.msk.bf16.mxu0 %vm3186_vm5, %v4795_v57  ;;  %v4747_v35 = vadd.f32 %v4710_v34, %v4613_v63  ;;  %v4785_v34 = vmax.f32 %v4769_v46, 0.0 }
 0x395   : > { %v4589_v2 = vpop.f32.mrf.mxu1  ;;  %6123 = vmatmul.mubr.msk.bf16.gmra.mxu1 %vm3186_vm5, %v4796_v52  ;;  %6141 = vmatmul.mubr.msk.bf16.gmra.mxu0 %vm3186_vm5, %v4796_v52 }
 0x396   : > { %v4788_v41 = vmax.f32 %v4772_v9, 0.0  ;;  %v4752_v1 = vadd.f32 %v6114_v4, %v4618_v19  ;;  %v4616_v61 = vadd.f32 %v4589_v2, %v4482_v26  ;;  %v4770_v36 = vadd.f32 %v8213_v59, %v4747_v35 }
 0x397   : > { %v6097_v6 = vpop.f32.mrf.mxu1 }
 0x398   : > { %v4798_v38 = vpack.c.bf16 %v4788_v41, %v4787_v23  ;;  %v4750_v22 = vadd.f32 %v4723_v13, %v4616_v61  ;;  %v4619_v56 = vadd.f32 %v6097_v6, %v4485_v39  ;;  %v4786_v60 = vmax.f32 %v4770_v36, 0.0 }
 0x399   : > { %v4592_v25 = vpop.f32.mrf.mxu1  ;;  %v4775_v20 = vadd.f32 %v8213_v59, %v4752_v1 }
 0x39a   : > { %v4753_v40 = vadd.f32 %v6115_v51, %v4619_v56  ;;  %v4617_v7 = vadd.f32 %v4592_v25, %v4483_v11  ;;  %v4797_v31 = vpack.c.bf16 %v4786_v60, %v4785_v34  ;;  %v4773_v28 = vadd.f32 %v8213_v59, %v4750_v22 }
 0x39b   : > { %v4791_v55 = vmax.f32 %v4775_v20, 0.0 }
 0x39c   : > { %v4776_v8 = vadd.f32 %v8213_v59, %v4753_v40  ;;  %v4751_v14 = vadd.f32 %v4726_v17, %v4617_v7  ;;  %6126 = vmatprep.mubr.msk.bf16.mxu1 %vm3186_vm5, %v4797_v31  ;;  %6144 = vmatprep.mubr.msk.bf16.mxu0 %vm3186_vm5, %v4797_v31  ;;  %v4789_v15 = vmax.f32 %v4773_v28, 0.0 }
 0x39d   : > { %6127 = vmatmul.mubr.msk.bf16.gmra.mxu1 %vm3186_vm5, %v4798_v38  ;;  %6145 = vmatmul.mubr.msk.bf16.gmra.mxu0 %vm3186_vm5, %v4798_v38 }
 0x39e   : > { %v4792_v33 = vmax.f32 %v4776_v8, 0.0  ;;  %v4774_v50 = vadd.f32 %v8213_v59, %v4751_v14  ;;  %v8302_v59 = vld [vmem:[%s8422_s7] ss:$0 sm:$0xff] }
 0x3a0   : > { %v4800_v0 = vpack.c.bf16 %v4792_v33, %v4791_v55  ;;  %v4790_v3 = vmax.f32 %v4774_v50, 0.0 }
 0x3a2   : > { %v4799_v16 = vpack.c.bf16 %v4790_v3, %v4789_v15 }
 0x3a4   : > { %6130 = vmatprep.mubr.msk.bf16.mxu1 %vm3186_vm5, %v4799_v16  ;;  %6148 = vmatprep.mubr.msk.bf16.mxu0 %vm3186_vm5, %v4799_v16 }
 0x3a5   : > { %6131 = vmatmul.mubr.msk.bf16.gmra.mxu1 %vm3186_vm5, %v4800_v0  ;;  %6149 = vmatmul.mubr.msk.bf16.gmra.mxu0 %vm3186_vm5, %v4800_v0 }
 0x44d   : > { %v6120_v47 = vpop.f32.mrf.mxu1  ;;  %v6138_v18 = vpop.f32.mrf.mxu0 }
 0x44e   : > { %v4879_v12 = vadd.f32 %v6120_v47, %v8302_v59  ;;  %v4980_v4 = vadd.f32 %v6138_v18, %v8302_v59 }
 0x44f   : > { %v4870_v21 = vpop.f32.mrf.mxu1  ;;  %v4971_v10 = vpop.f32.mrf.mxu0 }
 0x450   : > { %5036 = vst.msk [vmem:[%s6455_s27 + $0x20] sm:$0xff] %vm3186_vm5, %v4879_v12  ;;  %5515 = vst.msk [vmem:[%s6455_s27 + $0x30] sm:$0xff] %vm3186_vm5, %v4980_v4  ;;  %v4871_v24 = vadd.f32 %v8302_v59, %v4870_v21  ;;  %v4972_v42 = vadd.f32 %v8302_v59, %v4971_v10 }
 0x451   : > { %v6121_v44 = vpop.f32.mrf.mxu1  ;;  %v6139_v32 = vpop.f32.mrf.mxu0 }
 0x452   : > { %5034 = vst.msk [vmem:[%s6455_s27] sm:$0xff] %vm3186_vm5, %v4871_v24  ;;  %5513 = vst.msk [vmem:[%s6455_s27 + $0x10] sm:$0xff] %vm3186_vm5, %v4972_v42  ;;  %v4882_v52 = vadd.f32 %v6121_v44, %v8302_v59  ;;  %v4983_v5 = vadd.f32 %v6139_v32, %v8302_v59 }
 0x453   : > { %v4873_v29 = vpop.f32.mrf.mxu1  ;;  %v4974_v48 = vpop.f32.mrf.mxu0 }
 0x454   : > { %5037 = vst.msk [vmem:[%s6455_s27 + $0x28] sm:$0xff] %vm3186_vm5, %v4882_v52  ;;  %5516 = vst.msk [vmem:[%s6455_s27 + $0x38] sm:$0xff] %vm3186_vm5, %v4983_v5  ;;  %v4874_v62 = vadd.f32 %v8302_v59, %v4873_v29  ;;  %v4975_v57 = vadd.f32 %v8302_v59, %v4974_v48 }
 0x455   : > { %v6124_v37 = vpop.f32.mrf.mxu1  ;;  %v6142_v58 = vpop.f32.mrf.mxu0 }
 0x456   : > { %5035 = vst.msk [vmem:[%s6455_s27 + $0x8] sm:$0xff] %vm3186_vm5, %v4874_v62  ;;  %5514 = vst.msk [vmem:[%s6455_s27 + $0x18] sm:$0xff] %vm3186_vm5, %v4975_v57  ;;  %v4895_v30 = vadd.f32 %v6124_v37, %v8302_v59  ;;  %v4996_v43 = vadd.f32 %v6142_v58, %v8302_v59 }
 0x457   : > { %v4886_v63 = vpop.f32.mrf.mxu1  ;;  %v4987_v13 = vpop.f32.mrf.mxu0 }
 0x458   : > { %5040 = vst.msk [vmem:[%s6455_s27 + $0x60] sm:$0xff] %vm3186_vm5, %v4895_v30  ;;  %5519 = vst.msk [vmem:[%s6455_s27 + $0x70] sm:$0xff] %vm3186_vm5, %v4996_v43  ;;  %v4887_v54 = vadd.f32 %v8302_v59, %v4886_v63  ;;  %v4988_v45 = vadd.f32 %v8302_v59, %v4987_v13 }
 0x459   : > { %v6125_v26 = vpop.f32.mrf.mxu1  ;;  %v6143_v49 = vpop.f32.mrf.mxu0 }
 0x45a   : > { %5038 = vst.msk [vmem:[%s6455_s27 + $0x40] sm:$0xff] %vm3186_vm5, %v4887_v54  ;;  %5517 = vst.msk [vmem:[%s6455_s27 + $0x50] sm:$0xff] %vm3186_vm5, %v4988_v45  ;;  %v4898_v9 = vadd.f32 %v6125_v26, %v8302_v59  ;;  %v4999_v19 = vadd.f32 %v6143_v49, %v8302_v59 }
 0x45b   : > { %v4889_v46 = vpop.f32.mrf.mxu1  ;;  %v4990_v35 = vpop.f32.mrf.mxu0 }
 0x45c   : > { %5041 = vst.msk [vmem:[%s6455_s27 + $0x68] sm:$0xff] %vm3186_vm5, %v4898_v9  ;;  %5520 = vst.msk [vmem:[%s6455_s27 + $0x78] sm:$0xff] %vm3186_vm5, %v4999_v19  ;;  %v4890_v2 = vadd.f32 %v8302_v59, %v4889_v46  ;;  %v4991_v53 = vadd.f32 %v8302_v59, %v4990_v35 }
 0x45d   : > { %v6128_v39 = vpop.f32.mrf.mxu1  ;;  %v6146_v23 = vpop.f32.mrf.mxu0 }
 0x45e   : > { %5039 = vst.msk [vmem:[%s6455_s27 + $0x48] sm:$0xff] %vm3186_vm5, %v4890_v2  ;;  %5518 = vst.msk [vmem:[%s6455_s27 + $0x58] sm:$0xff] %vm3186_vm5, %v4991_v53  ;;  %v4911_v41 = vadd.f32 %v6128_v39, %v8302_v59  ;;  %v5012_v1 = vadd.f32 %v6146_v23, %v8302_v59 }
 0x45f   : > { %v4902_v61 = vpop.f32.mrf.mxu1  ;;  %v5003_v36 = vpop.f32.mrf.mxu0 }
 0x460   : > { %5044 = vst.msk [vmem:[%s6455_s27 + $0xa0] sm:$0xff] %vm3186_vm5, %v4911_v41  ;;  %5523 = vst.msk [vmem:[%s6455_s27 + $0xb0] sm:$0xff] %vm3186_vm5, %v5012_v1  ;;  %v4903_v51 = vadd.f32 %v8302_v59, %v4902_v61  ;;  %v5004_v6 = vadd.f32 %v8302_v59, %v5003_v36 }
 0x461   : > { %v6129_v38 = vpop.f32.mrf.mxu1  ;;  %v6147_v22 = vpop.f32.mrf.mxu0 }
 0x462   : > { %5042 = vst.msk [vmem:[%s6455_s27 + $0x80] sm:$0xff] %vm3186_vm5, %v4903_v51  ;;  %5521 = vst.msk [vmem:[%s6455_s27 + $0x90] sm:$0xff] %vm3186_vm5, %v5004_v6  ;;  %v4914_v56 = vadd.f32 %v6129_v38, %v8302_v59  ;;  %v5015_v27 = vadd.f32 %v6147_v22, %v8302_v59 }
 0x463   : > { %v4905_v11 = vpop.f32.mrf.mxu1  ;;  %v5006_v34 = vpop.f32.mrf.mxu0 }
 0x464   : > { %5045 = vst.msk [vmem:[%s6455_s27 + $0xa8] sm:$0xff] %vm3186_vm5, %v4914_v56  ;;  %5524 = vst.msk [vmem:[%s6455_s27 + $0xb8] sm:$0xff] %vm3186_vm5, %v5015_v27  ;;  %v4906_v60 = vadd.f32 %v8302_v59, %v4905_v11  ;;  %v5007_v25 = vadd.f32 %v8302_v59, %v5006_v34 }
 0x465   : > { %v6132_v20 = vpop.f32.mrf.mxu1  ;;  %v6150_v40 = vpop.f32.mrf.mxu0 }
 0x466   : > { %5043 = vst.msk [vmem:[%s6455_s27 + $0x88] sm:$0xff] %vm3186_vm5, %v4906_v60  ;;  %5522 = vst.msk [vmem:[%s6455_s27 + $0x98] sm:$0xff] %vm3186_vm5, %v5007_v25  ;;  %v4927_v7 = vadd.f32 %v6132_v20, %v8302_v59  ;;  %v5028_v31 = vadd.f32 %v6150_v40, %v8302_v59 }
 0x467   : > { %v4918_v17 = vpop.f32.mrf.mxu1  ;;  %v5019_v28 = vpop.f32.mrf.mxu0 }
 0x468   : > { %5048 = vst.msk [vmem:[%s6455_s27 + $0xe0] sm:$0xff] %vm3186_vm5, %v4927_v7  ;;  %5527 = vst.msk [vmem:[%s6455_s27 + $0xf0] sm:$0xff] %vm3186_vm5, %v5028_v31  ;;  %v4919_v8 = vadd.f32 %v8302_v59, %v4918_v17  ;;  %v5020_v14 = vadd.f32 %v8302_v59, %v5019_v28 }
 0x469   : > { %v6133_v55 = vpop.f32.mrf.mxu1  ;;  %v6151_v33 = vpop.f32.mrf.mxu0 }
 0x46a   : > { %5046 = vst.msk [vmem:[%s6455_s27 + $0xc0] sm:$0xff] %vm3186_vm5, %v4919_v8  ;;  %5525 = vst.msk [vmem:[%s6455_s27 + $0xd0] sm:$0xff] %vm3186_vm5, %v5020_v14  ;;  %v4930_v50 = vadd.f32 %v6133_v55, %v8302_v59  ;;  %v5031_v15 = vadd.f32 %v6151_v33, %v8302_v59 }
 0x46b   : > { %v4921_v0 = vpop.f32.mrf.mxu1  ;;  %v5022_v3 = vpop.f32.mrf.mxu0 }
 0x46c   : > { %5049 = vst.msk [vmem:[%s6455_s27 + $0xe8] sm:$0xff] %vm3186_vm5, %v4930_v50  ;;  %5528 = vst.msk [vmem:[%s6455_s27 + $0xf8] sm:$0xff] %vm3186_vm5, %v5031_v15  ;;  %v4922_v16 = vadd.f32 %v8302_v59, %v4921_v0  ;;  %v5023_v47 = vadd.f32 %v8302_v59, %v5022_v3 }
 0x46e   : > { %5047 = vst.msk [vmem:[%s6455_s27 + $0xc8] sm:$0xff] %vm3186_vm5, %v4922_v16  ;;  %5526 = vst.msk [vmem:[%s6455_s27 + $0xd8] sm:$0xff] %vm3186_vm5, %v5023_v47 }
 0x46f PF: > { %s18_s9 = sadd.s32 1, %s6275_s9   ;;  %s8528_s27 = smov %s6267_s29 }
 0x470   : > { %p15_p13 = scmp.ge.s32.totalorder %s18_s9, 6   ;;  %s8529_s28 = smov %s6271_s30 }
 0x471   : > { %s8530_s29 = smov %s8533_s10  ;;  %s8531_s30 = smov %s8537_s11 }
 0x472   :  { %17 = sbr.rel (!%p15_p13) target bundleno = 3 (0x3), region = 133 }

</bundles_post_ra>
